<compile_context>
chip_gen: v5e
topology: v5e:2x2
jax: 0.10.0
libtpu: 0.0.40
codegen_flags: <defaults>
</compile_context>

<pallas_src>
import functools

import jax
import jax.numpy as jnp
from jax.experimental import pallas as pl
from jax.experimental.pallas import tpu as pltpu

EPS = 1e-5  # torch.nn.LayerNorm default eps


# --------------------------- in-kernel math helpers --------------------------

def _erf(x):
    # Abramowitz & Stegun 7.1.26 polynomial (abs err < 1.5e-7).  jnp.exp and
    # the approx reciprocal both go to the EUP, keeping the VALU path short.
    a1, a2, a3, a4, a5 = (0.254829592, -0.284496736, 1.421413741,
                          -1.453152027, 1.061405429)
    p = 0.3275911
    ax = jnp.abs(x)
    t = pl.reciprocal(1.0 + p * ax, approx=True)
    poly = ((((a5 * t + a4) * t + a3) * t + a2) * t + a1) * t
    y = 1.0 - poly * jnp.exp(-ax * ax)
    return jnp.where(x >= 0, y, -y)


def _gelu(x):
    # exact (erf-form) GELU == torch.nn.GELU() default
    return 0.5 * x * (1.0 + _erf(x * 0.7071067811865476))


# --------------------------------- fused kernel ------------------------------

def fused_mixer_kernel(x_ref, pw_ref, pb_ref,
                       tw1_ref, tb1_ref, tw2_ref, tb2_ref,
                       cw1_ref, cb1_ref, cw2_ref, cb2_ref,
                       amean_ref, fg_ref, fb_ref, hw_ref, hb_ref,
                       o_ref):
    n_layers = tw1_ref.shape[0]
    c = fg_ref.shape[1]
    bb = pb_ref.shape[1] // c

    # ---- per-patch FC for the whole batch block:
    #      (S, BB*D) @ blockdiag(Wp) (BB*D, BB*C) + tiled bias -> slab (S, BB*C)
    x = jnp.dot(x_ref[0], pw_ref[...],
                preferred_element_type=jnp.float32) + pb_ref[...]

    amean = amean_ref[...]          # (BB*C, BB*C) block-diag of ones(C,C)/C

    # Unrolled layer loop: N is static & small.  Switch to lax.fori_loop with
    # dynamically indexed weights if N grows beyond ~4 (bounds vreg liveness).
    for li in range(n_layers):
        # --------- token mixing: LN over S (axis 0, per (sample,channel) col),
        #           affine folded into tw1/tb1 on the host; one lane-dense
        #           matmul per Linear.
        mean = jnp.mean(x, axis=0, keepdims=True)                    # (1, BB*C)
        var = jnp.mean(x * x, axis=0, keepdims=True) - mean * mean
        h = (x - mean) * jax.lax.rsqrt(var + EPS)
        h = jnp.dot(tw1_ref[li], h,
                    preferred_element_type=jnp.float32) + tb1_ref[li]
        h = _gelu(h)
        h = jnp.dot(tw2_ref[li], h,
                    preferred_element_type=jnp.float32) + tb2_ref[li]
        x = x + h

        # --------- channel mixing: LN over C inside each sample's lane block
        #           (block means via MXU matmul -> no lane reshapes), affine
        #           folded into cw1/cb1; weights are block-diagonal.
        mean = jnp.dot(x, amean, preferred_element_type=jnp.float32)  # (S,BB*C)
        var = jnp.dot(x * x, amean,
                      preferred_element_type=jnp.float32) - mean * mean
        h = (x - mean) * jax.lax.rsqrt(var + EPS)
        h = jnp.dot(h, cw1_ref[li],
                    preferred_element_type=jnp.float32) + cb1_ref[li]
        h = _gelu(h)
        h = jnp.dot(h, cw2_ref[li],
                    preferred_element_type=jnp.float32) + cb2_ref[li]
        x = x + h

    # ---- head (once per grid step, negligible cost): per-sample joint
    #      LayerNorm([S, C]), mean over C, Linear(S->classes), Sigmoid.
    fg = fg_ref[...]
    fb = fb_ref[...]
    hw = hw_ref[...]
    hb = hb_ref[...]
    for b in range(bb):
        xb = x[:, b * c:(b + 1) * c]                      # (S, C) static slice
        mean = jnp.mean(xb)
        var = jnp.mean(xb * xb) - mean * mean
        xn = (xb - mean) * jax.lax.rsqrt(var + EPS) * fg + fb
        pooled = jnp.mean(xn, axis=1, keepdims=True)      # (S, 1) mean over C
        # Linear(S->Kp) via broadcast-mul + sublane sum (fine at S=16; switch
        # to an MXU matmul if S grows to ~196).
        logits = jnp.sum(pooled * hw, axis=0, keepdims=True) + hb    # (1, Kp)
        o_ref[0, b:b + 1, :] = jax.nn.sigmoid(logits)


# ------------------------------ pallas wrapper --------------------------------

@functools.partial(jax.jit, static_argnames=("bb", "classes_num"))
def mlp_mixer_forward(x, packed, *, bb, classes_num):
    if x.ndim == 3:
        x = x[None]
    B = x.shape[0]
    S, C = packed["fg"].shape
    N = packed["tw1"].shape[0]
    L = bb * C
    D = packed["pw"].shape[0] // bb
    Kp = packed["hw"].shape[1]

    # torch.reshape(x, (-1, S, D)) equivalent (plain row-major reshape).
    x = x.reshape(B, S, D).astype(jnp.float32)

    # Pad batch to a multiple of BB and rearrange each block into the slab
    # layout (S, BB*D): column b*D + d holds sample b's feature d (host-side
    # layout plumbing, done once per call by XLA).
    Bpad = ((B + bb - 1) // bb) * bb
    if Bpad != B:
        x = jnp.concatenate(
            [x, jnp.zeros((Bpad - B, S, D), jnp.float32)], axis=0)
    nb = Bpad // bb
    xr = x.reshape(nb, bb, S, D).transpose(0, 2, 1, 3).reshape(nb, S, bb * D)

    full2 = lambda shape: pl.BlockSpec(shape, lambda i: (0, 0))
    full3 = lambda shape: pl.BlockSpec(shape, lambda i: (0, 0, 0))

    out = pl.pallas_call(
        fused_mixer_kernel,
        out_shape=jax.ShapeDtypeStruct((nb, bb, Kp), jnp.float32),
        grid=(nb,),
        in_specs=[
            pl.BlockSpec((1, S, bb * D), lambda i: (i, 0, 0)),   # activations
            full2((bb * D, L)), full2((1, L)),                   # per-patch FC
            full3((N, S, S)), full3((N, S, 1)),                  # token W1', b1'
            full3((N, S, S)), full3((N, S, 1)),                  # token W2, b2
            full3((N, L, L)), full3((N, 1, L)),                  # channel W1', b1'
            full3((N, L, L)), full3((N, 1, L)),                  # channel W2, b2
            full2((L, L)),                                       # block-mean mat
            full2((S, C)), full2((S, C)),                        # final LN affine
            full2((S, Kp)), full2((1, Kp)),                      # head (padded)
        ],
        out_specs=pl.BlockSpec((1, bb, Kp), lambda i: (i, 0, 0)),
        compiler_params=pltpu.CompilerParams(
            dimension_semantics=("parallel",),
            vmem_limit_bytes=32 * 1024 * 1024),
    )(xr, packed["pw"], packed["pb"],
      packed["tw1"], packed["tb1"], packed["tw2"], packed["tb2"],
      packed["cw1"], packed["cb1"], packed["cw2"], packed["cb2"],
      packed["amean"], packed["fg"], packed["fb"],
      packed["hw"], packed["hb"])

    return out.reshape(Bpad, Kp)[:B, :classes_num]


# ------------------------------ params ----------------------------------------

def _pick_bb(batch, max_bb=8):
    """Samples per grid step: single-TC chips want one big step, v7x (2 TCs)
    wants >= 2 grid steps so both TensorCores get work."""
    kind = jax.devices()[0].device_kind.lower()
    if "v7" in kind and batch >= 2:
        bb = max(1, batch // 2)
    else:
        bb = batch
    return max(1, min(bb, max_bb))


def make_params(key, input_size, patch_size, C, N, classes_num):
    """Logical (torch-equivalent) parameters; LayerNorms at default init."""
    Cin, H, W = input_size
    S = (H * W) // (patch_size ** 2)
    D = Cin * patch_size * patch_size
    ks = iter(jax.random.split(key, 4 + 8 * N))
    w = lambda shape: (0.02 * jax.random.normal(next(ks), shape)).astype(jnp.float32)

    layers = []
    for _ in range(N):
        layers.append(dict(
            t_gamma=jnp.ones((S,), jnp.float32), t_beta=jnp.zeros((S,), jnp.float32),
            t_w1=w((S, S)), t_b1=w((S,)), t_w2=w((S, S)), t_b2=w((S,)),
            c_gamma=jnp.ones((C,), jnp.float32), c_beta=jnp.zeros((C,), jnp.float32),
            c_w1=w((C, C)), c_b1=w((C,)), c_w2=w((C, C)), c_b2=w((C,)),
        ))
    return dict(
        proj_w=w((D, C)), proj_b=w((C,)),
        layers=layers,
        final_g=jnp.ones((S, C), jnp.float32), final_b=jnp.zeros((S, C), jnp.float32),
        head_w=w((S, classes_num)), head_b=w((classes_num,)),
    )


def pack_params(p, bb):
    """Host-side weight preparation (normally done once at model conversion):
    fold LN affine + first bias into the first MLP weights (exact algebra),
    build block-diagonal weights / tiled biases for the (S, BB*C) slab layout,
    and pad the head to a lane-dense 128-wide class dim."""
    S, C = p["final_g"].shape
    N = len(p["layers"])
    eye = jnp.eye(bb, dtype=jnp.float32)
    blockdiag = lambda m: jnp.kron(eye, m)
    tile_row = lambda v: jnp.tile(v, (bb,))[None, :]
    classes = p["head_w"].shape[1]
    Kp = ((classes + 127) // 128) * 128

    tw1, tb1, tw2, tb2, cw1, cb1, cw2, cb2 = ([] for _ in range(8))
    for lyr in p["layers"]:
        # token side: W1' = W1 * gamma_t (column scale of the left-multiply
        # weight), b1' = W1 @ beta_t + b1.
        w1f = lyr["t_w1"] * lyr["t_gamma"][None, :]
        b1f = lyr["t_w1"] @ lyr["t_beta"] + lyr["t_b1"]
        tw1.append(w1f)
        tb1.append(b1f[:, None])
        tw2.append(lyr["t_w2"])
        tb2.append(lyr["t_b2"][:, None])
        # channel side: W1' = diag(gamma_c) @ W1, b1' = beta_c @ W1 + b1;
        # then block-diagonalised for the batched slab.
        c1f = lyr["c_gamma"][:, None] * lyr["c_w1"]
        cb1f = lyr["c_beta"] @ lyr["c_w1"] + lyr["c_b1"]
        cw1.append(blockdiag(c1f))
        cb1.append(tile_row(cb1f))
        cw2.append(blockdiag(lyr["c_w2"]))
        cb2.append(tile_row(lyr["c_b2"]))

    hw = jnp.zeros((S, Kp), jnp.float32).at[:, :classes].set(p["head_w"])
    hb = jnp.zeros((1, Kp), jnp.float32).at[0, :classes].set(p["head_b"])

    return dict(
        pw=blockdiag(p["proj_w"]),                  # (BB*D, BB*C)
        pb=tile_row(p["proj_b"]),                   # (1, BB*C)
        tw1=jnp.stack(tw1), tb1=jnp.stack(tb1),
        tw2=jnp.stack(tw2), tb2=jnp.stack(tb2),
        cw1=jnp.stack(cw1), cb1=jnp.stack(cb1),
        cw2=jnp.stack(cw2), cb2=jnp.stack(cb2),
        amean=blockdiag(jnp.full((C, C), 1.0 / C, jnp.float32)),  # (BB*C, BB*C)
        fg=p["final_g"], fb=p["final_b"],
        hw=hw, hb=hb,
    )


if __name__ == "__main__":
    input_size = (4, 16, 16)   # (C_in, H, W)
    patch_size = 4             # -> S = 16, D = 64
    C = 32                     # hidden channel dim
    N = 2                      # number of mixer layers
    classes_num = 10
    batch = 8

    key = jax.random.PRNGKey(0)
    pkey, xkey = jax.random.split(key)
    params = make_params(pkey, input_size, patch_size, C, N, classes_num)

    bb = _pick_bb(batch)
    packed = pack_params(params, bb)

    x = jax.random.normal(xkey, (batch,) + input_size, dtype=jnp.float32)

    out = mlp_mixer_forward(x, packed, bb=bb, classes_num=classes_num)
    out = jax.block_until_ready(out)
    assert out.shape == (batch, classes_num), out.shape
    assert bool(jnp.all(jnp.isfinite(out)))
    print("KERNEL_OK")
</pallas_src>

<mosaic_0001>
module attributes {stable_mosaic.version = 11 : i64} {
  func.func @fused_mixer_kernel(%arg0: i32, %arg1: memref<1x16x512xf32, #tpu.memory_space<vmem>>, %arg2: memref<512x256xf32, #tpu.memory_space<vmem>>, %arg3: memref<1x256xf32, #tpu.memory_space<vmem>>, %arg4: memref<2x16x16xf32, #tpu.memory_space<vmem>>, %arg5: memref<2x16x1xf32, #tpu.memory_space<vmem>>, %arg6: memref<2x16x16xf32, #tpu.memory_space<vmem>>, %arg7: memref<2x16x1xf32, #tpu.memory_space<vmem>>, %arg8: memref<2x256x256xf32, #tpu.memory_space<vmem>>, %arg9: memref<2x1x256xf32, #tpu.memory_space<vmem>>, %arg10: memref<2x256x256xf32, #tpu.memory_space<vmem>>, %arg11: memref<2x1x256xf32, #tpu.memory_space<vmem>>, %arg12: memref<256x256xf32, #tpu.memory_space<vmem>>, %arg13: memref<16x32xf32, #tpu.memory_space<vmem>>, %arg14: memref<16x32xf32, #tpu.memory_space<vmem>>, %arg15: memref<16x128xf32, #tpu.memory_space<vmem>>, %arg16: memref<1x128xf32, #tpu.memory_space<vmem>>, %arg17: memref<1x8x128xf32, #tpu.memory_space<vmem>>) attributes {dimension_semantics = [#tpu.dimension_semantics<parallel>], iteration_bounds = array<i64: 1>, scalar_prefetch = 0 : i64, scratch_operands = 0 : i64, tpu.core_type = #tpu.core_type<tc>, window_params = [{transform_indices = @transform_0, window_bounds = array<i64: 1, 16, 512>}, {pipeline_mode = #tpu.pipeline_mode<synchronous>, transform_indices = @transform_1, window_bounds = array<i64: 512, 256>}, {pipeline_mode = #tpu.pipeline_mode<synchronous>, transform_indices = @transform_2, window_bounds = array<i64: 1, 256>}, {pipeline_mode = #tpu.pipeline_mode<synchronous>, transform_indices = @transform_3, window_bounds = array<i64: 2, 16, 16>}, {pipeline_mode = #tpu.pipeline_mode<synchronous>, transform_indices = @transform_4, window_bounds = array<i64: 2, 16, 1>}, {pipeline_mode = #tpu.pipeline_mode<synchronous>, transform_indices = @transform_5, window_bounds = array<i64: 2, 16, 16>}, {pipeline_mode = #tpu.pipeline_mode<synchronous>, transform_indices = @transform_6, window_bounds = array<i64: 2, 16, 1>}, {pipeline_mode = #tpu.pipeline_mode<synchronous>, transform_indices = @transform_7, window_bounds = array<i64: 2, 256, 256>}, {pipeline_mode = #tpu.pipeline_mode<synchronous>, transform_indices = @transform_8, window_bounds = array<i64: 2, 1, 256>}, {pipeline_mode = #tpu.pipeline_mode<synchronous>, transform_indices = @transform_9, window_bounds = array<i64: 2, 256, 256>}, {pipeline_mode = #tpu.pipeline_mode<synchronous>, transform_indices = @transform_10, window_bounds = array<i64: 2, 1, 256>}, {pipeline_mode = #tpu.pipeline_mode<synchronous>, transform_indices = @transform_11, window_bounds = array<i64: 256, 256>}, {pipeline_mode = #tpu.pipeline_mode<synchronous>, transform_indices = @transform_12, window_bounds = array<i64: 16, 32>}, {pipeline_mode = #tpu.pipeline_mode<synchronous>, transform_indices = @transform_13, window_bounds = array<i64: 16, 32>}, {pipeline_mode = #tpu.pipeline_mode<synchronous>, transform_indices = @transform_14, window_bounds = array<i64: 16, 128>}, {pipeline_mode = #tpu.pipeline_mode<synchronous>, transform_indices = @transform_15, window_bounds = array<i64: 1, 128>}, {transform_indices = @transform_16, window_bounds = array<i64: 1, 8, 128>}]} {
    %c0 = arith.constant 0 : index
    %c0_0 = arith.constant 0 : index
    %c0_1 = arith.constant 0 : index
    %0 = vector.load %arg1[%c0, %c0_0, %c0_1] : memref<1x16x512xf32, #tpu.memory_space<vmem>>, vector<1x16x512xf32>
    %1 = vector.shape_cast %0 : vector<1x16x512xf32> to vector<16x512xf32>
    %c0_2 = arith.constant 0 : index
    %c0_3 = arith.constant 0 : index
    %2 = vector.load %arg2[%c0_2, %c0_3] : memref<512x256xf32, #tpu.memory_space<vmem>>, vector<512x256xf32>
    %cst = arith.constant dense<0.000000e+00> : vector<16x256xf32>
    %3 = tpu.matmul %1, %2, %cst {dimension_numbers = #tpu.dot_dimension_numbers<[1], [0], [0], [1], [0, 0, 1, 1], [], []>} : vector<16x512xf32>, vector<512x256xf32>, vector<16x256xf32> -> vector<16x256xf32>
    %c0_4 = arith.constant 0 : index
    %c0_5 = arith.constant 0 : index
    %4 = vector.load %arg3[%c0_4, %c0_5] : memref<1x256xf32, #tpu.memory_space<vmem>>, vector<1x256xf32>
    %5 = vector.broadcast %4 : vector<1x256xf32> to vector<16x256xf32>
    %6 = arith.addf %3, %5 : vector<16x256xf32>
    %c0_6 = arith.constant 0 : index
    %c0_7 = arith.constant 0 : index
    %7 = vector.load %arg12[%c0_6, %c0_7] : memref<256x256xf32, #tpu.memory_space<vmem>>, vector<256x256xf32>
    %cst_8 = arith.constant dense<0.000000e+00> : vector<256xf32>
    %8 = vector.multi_reduction <add>, %6, %cst_8 [0] : vector<16x256xf32> to vector<256xf32>
    %9 = vector.shape_cast %8 : vector<256xf32> to vector<1x256xf32>
    %cst_9 = arith.constant 1.600000e+01 : f32
    %10 = vector.broadcast %cst_9 : f32 to vector<1x256xf32>
    %11 = arith.divf %9, %10 : vector<1x256xf32>
    %12 = arith.mulf %6, %6 : vector<16x256xf32>
    %cst_10 = arith.constant dense<0.000000e+00> : vector<256xf32>
    %13 = vector.multi_reduction <add>, %12, %cst_10 [0] : vector<16x256xf32> to vector<256xf32>
    %14 = vector.shape_cast %13 : vector<256xf32> to vector<1x256xf32>
    %cst_11 = arith.constant 1.600000e+01 : f32
    %15 = vector.broadcast %cst_11 : f32 to vector<1x256xf32>
    %16 = arith.divf %14, %15 : vector<1x256xf32>
    %17 = arith.mulf %11, %11 : vector<1x256xf32>
    %18 = arith.subf %16, %17 : vector<1x256xf32>
    %19 = vector.broadcast %11 : vector<1x256xf32> to vector<16x256xf32>
    %20 = arith.subf %6, %19 : vector<16x256xf32>
    %cst_12 = arith.constant 9.99999974E-6 : f32
    %21 = vector.broadcast %cst_12 : f32 to vector<1x256xf32>
    %22 = arith.addf %18, %21 : vector<1x256xf32>
    %23 = math.rsqrt %22 : vector<1x256xf32>
    %24 = vector.broadcast %23 : vector<1x256xf32> to vector<16x256xf32>
    %25 = arith.mulf %20, %24 : vector<16x256xf32>
    %c0_13 = arith.constant 0 : index
    %c0_14 = arith.constant 0 : index
    %c0_15 = arith.constant 0 : index
    %26 = vector.load %arg4[%c0_13, %c0_14, %c0_15] : memref<2x16x16xf32, #tpu.memory_space<vmem>>, vector<1x16x16xf32>
    %27 = vector.shape_cast %26 : vector<1x16x16xf32> to vector<16x16xf32>
    %cst_16 = arith.constant dense<0.000000e+00> : vector<16x256xf32>
    %28 = tpu.matmul %27, %25, %cst_16 {dimension_numbers = #tpu.dot_dimension_numbers<[1], [0], [0], [1], [0, 0, 1, 1], [], []>} : vector<16x16xf32>, vector<16x256xf32>, vector<16x256xf32> -> vector<16x256xf32>
    %c0_17 = arith.constant 0 : index
    %c0_18 = arith.constant 0 : index
    %c0_19 = arith.constant 0 : index
    %29 = vector.load %arg5[%c0_17, %c0_18, %c0_19] : memref<2x16x1xf32, #tpu.memory_space<vmem>>, vector<1x16x1xf32>
    %30 = vector.shape_cast %29 : vector<1x16x1xf32> to vector<16x1xf32>
    %31 = vector.broadcast %30 : vector<16x1xf32> to vector<16x256xf32>
    %32 = arith.addf %28, %31 : vector<16x256xf32>
    %cst_20 = arith.constant 5.000000e-01 : f32
    %33 = vector.broadcast %cst_20 : f32 to vector<16x256xf32>
    %34 = arith.mulf %33, %32 : vector<16x256xf32>
    %cst_21 = arith.constant 0.707106769 : f32
    %35 = vector.broadcast %cst_21 : f32 to vector<16x256xf32>
    %36 = arith.mulf %32, %35 : vector<16x256xf32>
    %37 = math.absf %36 : vector<16x256xf32>
    %cst_22 = arith.constant 0.327591091 : f32
    %38 = vector.broadcast %cst_22 : f32 to vector<16x256xf32>
    %39 = arith.mulf %38, %37 : vector<16x256xf32>
    %cst_23 = arith.constant 1.000000e+00 : f32
    %40 = vector.broadcast %cst_23 : f32 to vector<16x256xf32>
    %41 = arith.addf %40, %39 : vector<16x256xf32>
    %42 = tpu.reciprocal %41 {approx = true} : vector<16x256xf32> -> vector<16x256xf32>
    %cst_24 = arith.constant 1.06140542 : f32
    %43 = vector.broadcast %cst_24 : f32 to vector<16x256xf32>
    %44 = arith.mulf %43, %42 : vector<16x256xf32>
    %cst_25 = arith.constant -1.45315206 : f32
    %45 = vector.broadcast %cst_25 : f32 to vector<16x256xf32>
    %46 = arith.addf %44, %45 : vector<16x256xf32>
    %47 = arith.mulf %46, %42 : vector<16x256xf32>
    %cst_26 = arith.constant 1.42141378 : f32
    %48 = vector.broadcast %cst_26 : f32 to vector<16x256xf32>
    %49 = arith.addf %47, %48 : vector<16x256xf32>
    %50 = arith.mulf %49, %42 : vector<16x256xf32>
    %cst_27 = arith.constant -0.284496725 : f32
    %51 = vector.broadcast %cst_27 : f32 to vector<16x256xf32>
    %52 = arith.addf %50, %51 : vector<16x256xf32>
    %53 = arith.mulf %52, %42 : vector<16x256xf32>
    %cst_28 = arith.constant 0.254829586 : f32
    %54 = vector.broadcast %cst_28 : f32 to vector<16x256xf32>
    %55 = arith.addf %53, %54 : vector<16x256xf32>
    %56 = arith.mulf %55, %42 : vector<16x256xf32>
    %cst_29 = arith.constant 0.000000e+00 : f32
    %57 = vector.broadcast %cst_29 : f32 to vector<16x256xf32>
    %58 = arith.subf %57, %37 : vector<16x256xf32>
    %59 = arith.mulf %58, %37 : vector<16x256xf32>
    %60 = math.exp %59 : vector<16x256xf32>
    %61 = arith.mulf %56, %60 : vector<16x256xf32>
    %cst_30 = arith.constant 1.000000e+00 : f32
    %62 = vector.broadcast %cst_30 : f32 to vector<16x256xf32>
    %63 = arith.subf %62, %61 : vector<16x256xf32>
    %cst_31 = arith.constant 0.000000e+00 : f32
    %64 = vector.broadcast %cst_31 : f32 to vector<16x256xf32>
    %65 = arith.cmpf oge, %36, %64 : vector<16x256xf32>
    %cst_32 = arith.constant 0.000000e+00 : f32
    %66 = vector.broadcast %cst_32 : f32 to vector<16x256xf32>
    %67 = arith.subf %66, %63 : vector<16x256xf32>
    %68 = arith.select %65, %63, %67 : vector<16x256xi1>, vector<16x256xf32>
    %cst_33 = arith.constant 1.000000e+00 : f32
    %69 = vector.broadcast %cst_33 : f32 to vector<16x256xf32>
    %70 = arith.addf %69, %68 : vector<16x256xf32>
    %71 = arith.mulf %34, %70 : vector<16x256xf32>
    %c0_34 = arith.constant 0 : index
    %c0_35 = arith.constant 0 : index
    %c0_36 = arith.constant 0 : index
    %72 = vector.load %arg6[%c0_34, %c0_35, %c0_36] : memref<2x16x16xf32, #tpu.memory_space<vmem>>, vector<1x16x16xf32>
    %73 = vector.shape_cast %72 : vector<1x16x16xf32> to vector<16x16xf32>
    %cst_37 = arith.constant dense<0.000000e+00> : vector<16x256xf32>
    %74 = tpu.matmul %73, %71, %cst_37 {dimension_numbers = #tpu.dot_dimension_numbers<[1], [0], [0], [1], [0, 0, 1, 1], [], []>} : vector<16x16xf32>, vector<16x256xf32>, vector<16x256xf32> -> vector<16x256xf32>
    %c0_38 = arith.constant 0 : index
    %c0_39 = arith.constant 0 : index
    %c0_40 = arith.constant 0 : index
    %75 = vector.load %arg7[%c0_38, %c0_39, %c0_40] : memref<2x16x1xf32, #tpu.memory_space<vmem>>, vector<1x16x1xf32>
    %76 = vector.shape_cast %75 : vector<1x16x1xf32> to vector<16x1xf32>
    %77 = vector.broadcast %76 : vector<16x1xf32> to vector<16x256xf32>
    %78 = arith.addf %74, %77 : vector<16x256xf32>
    %79 = arith.addf %6, %78 : vector<16x256xf32>
    %cst_41 = arith.constant dense<0.000000e+00> : vector<16x256xf32>
    %80 = tpu.matmul %79, %7, %cst_41 {dimension_numbers = #tpu.dot_dimension_numbers<[1], [0], [0], [1], [0, 0, 1, 1], [], []>} : vector<16x256xf32>, vector<256x256xf32>, vector<16x256xf32> -> vector<16x256xf32>
    %81 = arith.mulf %79, %79 : vector<16x256xf32>
    %cst_42 = arith.constant dense<0.000000e+00> : vector<16x256xf32>
    %82 = tpu.matmul %81, %7, %cst_42 {dimension_numbers = #tpu.dot_dimension_numbers<[1], [0], [0], [1], [0, 0, 1, 1], [], []>} : vector<16x256xf32>, vector<256x256xf32>, vector<16x256xf32> -> vector<16x256xf32>
    %83 = arith.mulf %80, %80 : vector<16x256xf32>
    %84 = arith.subf %82, %83 : vector<16x256xf32>
    %85 = arith.subf %79, %80 : vector<16x256xf32>
    %cst_43 = arith.constant 9.99999974E-6 : f32
    %86 = vector.broadcast %cst_43 : f32 to vector<16x256xf32>
    %87 = arith.addf %84, %86 : vector<16x256xf32>
    %88 = math.rsqrt %87 : vector<16x256xf32>
    %89 = arith.mulf %85, %88 : vector<16x256xf32>
    %c0_44 = arith.constant 0 : index
    %c0_45 = arith.constant 0 : index
    %c0_46 = arith.constant 0 : index
    %90 = vector.load %arg8[%c0_44, %c0_45, %c0_46] : memref<2x256x256xf32, #tpu.memory_space<vmem>>, vector<1x256x256xf32>
    %91 = vector.shape_cast %90 : vector<1x256x256xf32> to vector<256x256xf32>
    %cst_47 = arith.constant dense<0.000000e+00> : vector<16x256xf32>
    %92 = tpu.matmul %89, %91, %cst_47 {dimension_numbers = #tpu.dot_dimension_numbers<[1], [0], [0], [1], [0, 0, 1, 1], [], []>} : vector<16x256xf32>, vector<256x256xf32>, vector<16x256xf32> -> vector<16x256xf32>
    %c0_48 = arith.constant 0 : index
    %c0_49 = arith.constant 0 : index
    %c0_50 = arith.constant 0 : index
    %93 = vector.load %arg9[%c0_48, %c0_49, %c0_50] : memref<2x1x256xf32, #tpu.memory_space<vmem>>, vector<1x1x256xf32>
    %94 = vector.shape_cast %93 : vector<1x1x256xf32> to vector<1x256xf32>
    %95 = vector.broadcast %94 : vector<1x256xf32> to vector<16x256xf32>
    %96 = arith.addf %92, %95 : vector<16x256xf32>
    %cst_51 = arith.constant 5.000000e-01 : f32
    %97 = vector.broadcast %cst_51 : f32 to vector<16x256xf32>
    %98 = arith.mulf %97, %96 : vector<16x256xf32>
    %cst_52 = arith.constant 0.707106769 : f32
    %99 = vector.broadcast %cst_52 : f32 to vector<16x256xf32>
    %100 = arith.mulf %96, %99 : vector<16x256xf32>
    %101 = math.absf %100 : vector<16x256xf32>
    %cst_53 = arith.constant 0.327591091 : f32
    %102 = vector.broadcast %cst_53 : f32 to vector<16x256xf32>
    %103 = arith.mulf %102, %101 : vector<16x256xf32>
    %cst_54 = arith.constant 1.000000e+00 : f32
    %104 = vector.broadcast %cst_54 : f32 to vector<16x256xf32>
    %105 = arith.addf %104, %103 : vector<16x256xf32>
    %106 = tpu.reciprocal %105 {approx = true} : vector<16x256xf32> -> vector<16x256xf32>
    %cst_55 = arith.constant 1.06140542 : f32
    %107 = vector.broadcast %cst_55 : f32 to vector<16x256xf32>
    %108 = arith.mulf %107, %106 : vector<16x256xf32>
    %cst_56 = arith.constant -1.45315206 : f32
    %109 = vector.broadcast %cst_56 : f32 to vector<16x256xf32>
    %110 = arith.addf %108, %109 : vector<16x256xf32>
    %111 = arith.mulf %110, %106 : vector<16x256xf32>
    %cst_57 = arith.constant 1.42141378 : f32
    %112 = vector.broadcast %cst_57 : f32 to vector<16x256xf32>
    %113 = arith.addf %111, %112 : vector<16x256xf32>
    %114 = arith.mulf %113, %106 : vector<16x256xf32>
    %cst_58 = arith.constant -0.284496725 : f32
    %115 = vector.broadcast %cst_58 : f32 to vector<16x256xf32>
    %116 = arith.addf %114, %115 : vector<16x256xf32>
    %117 = arith.mulf %116, %106 : vector<16x256xf32>
    %cst_59 = arith.constant 0.254829586 : f32
    %118 = vector.broadcast %cst_59 : f32 to vector<16x256xf32>
    %119 = arith.addf %117, %118 : vector<16x256xf32>
    %120 = arith.mulf %119, %106 : vector<16x256xf32>
    %cst_60 = arith.constant 0.000000e+00 : f32
    %121 = vector.broadcast %cst_60 : f32 to vector<16x256xf32>
    %122 = arith.subf %121, %101 : vector<16x256xf32>
    %123 = arith.mulf %122, %101 : vector<16x256xf32>
    %124 = math.exp %123 : vector<16x256xf32>
    %125 = arith.mulf %120, %124 : vector<16x256xf32>
    %cst_61 = arith.constant 1.000000e+00 : f32
    %126 = vector.broadcast %cst_61 : f32 to vector<16x256xf32>
    %127 = arith.subf %126, %125 : vector<16x256xf32>
    %cst_62 = arith.constant 0.000000e+00 : f32
    %128 = vector.broadcast %cst_62 : f32 to vector<16x256xf32>
    %129 = arith.cmpf oge, %100, %128 : vector<16x256xf32>
    %cst_63 = arith.constant 0.000000e+00 : f32
    %130 = vector.broadcast %cst_63 : f32 to vector<16x256xf32>
    %131 = arith.subf %130, %127 : vector<16x256xf32>
    %132 = arith.select %129, %127, %131 : vector<16x256xi1>, vector<16x256xf32>
    %cst_64 = arith.constant 1.000000e+00 : f32
    %133 = vector.broadcast %cst_64 : f32 to vector<16x256xf32>
    %134 = arith.addf %133, %132 : vector<16x256xf32>
    %135 = arith.mulf %98, %134 : vector<16x256xf32>
    %c0_65 = arith.constant 0 : index
    %c0_66 = arith.constant 0 : index
    %c0_67 = arith.constant 0 : index
    %136 = vector.load %arg10[%c0_65, %c0_66, %c0_67] : memref<2x256x256xf32, #tpu.memory_space<vmem>>, vector<1x256x256xf32>
    %137 = vector.shape_cast %136 : vector<1x256x256xf32> to vector<256x256xf32>
    %cst_68 = arith.constant dense<0.000000e+00> : vector<16x256xf32>
    %138 = tpu.matmul %135, %137, %cst_68 {dimension_numbers = #tpu.dot_dimension_numbers<[1], [0], [0], [1], [0, 0, 1, 1], [], []>} : vector<16x256xf32>, vector<256x256xf32>, vector<16x256xf32> -> vector<16x256xf32>
    %c0_69 = arith.constant 0 : index
    %c0_70 = arith.constant 0 : index
    %c0_71 = arith.constant 0 : index
    %139 = vector.load %arg11[%c0_69, %c0_70, %c0_71] : memref<2x1x256xf32, #tpu.memory_space<vmem>>, vector<1x1x256xf32>
    %140 = vector.shape_cast %139 : vector<1x1x256xf32> to vector<1x256xf32>
    %141 = vector.broadcast %140 : vector<1x256xf32> to vector<16x256xf32>
    %142 = arith.addf %138, %141 : vector<16x256xf32>
    %143 = arith.addf %79, %142 : vector<16x256xf32>
    %cst_72 = arith.constant dense<0.000000e+00> : vector<256xf32>
    %144 = vector.multi_reduction <add>, %143, %cst_72 [0] : vector<16x256xf32> to vector<256xf32>
    %145 = vector.shape_cast %144 : vector<256xf32> to vector<1x256xf32>
    %cst_73 = arith.constant 1.600000e+01 : f32
    %146 = vector.broadcast %cst_73 : f32 to vector<1x256xf32>
    %147 = arith.divf %145, %146 : vector<1x256xf32>
    %148 = arith.mulf %143, %143 : vector<16x256xf32>
    %cst_74 = arith.constant dense<0.000000e+00> : vector<256xf32>
    %149 = vector.multi_reduction <add>, %148, %cst_74 [0] : vector<16x256xf32> to vector<256xf32>
    %150 = vector.shape_cast %149 : vector<256xf32> to vector<1x256xf32>
    %cst_75 = arith.constant 1.600000e+01 : f32
    %151 = vector.broadcast %cst_75 : f32 to vector<1x256xf32>
    %152 = arith.divf %150, %151 : vector<1x256xf32>
    %153 = arith.mulf %147, %147 : vector<1x256xf32>
    %154 = arith.subf %152, %153 : vector<1x256xf32>
    %155 = vector.broadcast %147 : vector<1x256xf32> to vector<16x256xf32>
    %156 = arith.subf %143, %155 : vector<16x256xf32>
    %cst_76 = arith.constant 9.99999974E-6 : f32
    %157 = vector.broadcast %cst_76 : f32 to vector<1x256xf32>
    %158 = arith.addf %154, %157 : vector<1x256xf32>
    %159 = math.rsqrt %158 : vector<1x256xf32>
    %160 = vector.broadcast %159 : vector<1x256xf32> to vector<16x256xf32>
    %161 = arith.mulf %156, %160 : vector<16x256xf32>
    %c1 = arith.constant 1 : index
    %c0_77 = arith.constant 0 : index
    %c0_78 = arith.constant 0 : index
    %162 = vector.load %arg4[%c1, %c0_77, %c0_78] : memref<2x16x16xf32, #tpu.memory_space<vmem>>, vector<1x16x16xf32>
    %163 = vector.shape_cast %162 : vector<1x16x16xf32> to vector<16x16xf32>
    %cst_79 = arith.constant dense<0.000000e+00> : vector<16x256xf32>
    %164 = tpu.matmul %163, %161, %cst_79 {dimension_numbers = #tpu.dot_dimension_numbers<[1], [0], [0], [1], [0, 0, 1, 1], [], []>} : vector<16x16xf32>, vector<16x256xf32>, vector<16x256xf32> -> vector<16x256xf32>
    %c1_80 = arith.constant 1 : index
    %c0_81 = arith.constant 0 : index
    %c0_82 = arith.constant 0 : index
    %165 = vector.load %arg5[%c1_80, %c0_81, %c0_82] : memref<2x16x1xf32, #tpu.memory_space<vmem>>, vector<1x16x1xf32>
    %166 = vector.shape_cast %165 : vector<1x16x1xf32> to vector<16x1xf32>
    %167 = vector.broadcast %166 : vector<16x1xf32> to vector<16x256xf32>
    %168 = arith.addf %164, %167 : vector<16x256xf32>
    %cst_83 = arith.constant 5.000000e-01 : f32
    %169 = vector.broadcast %cst_83 : f32 to vector<16x256xf32>
    %170 = arith.mulf %169, %168 : vector<16x256xf32>
    %cst_84 = arith.constant 0.707106769 : f32
    %171 = vector.broadcast %cst_84 : f32 to vector<16x256xf32>
    %172 = arith.mulf %168, %171 : vector<16x256xf32>
    %173 = math.absf %172 : vector<16x256xf32>
    %cst_85 = arith.constant 0.327591091 : f32
    %174 = vector.broadcast %cst_85 : f32 to vector<16x256xf32>
    %175 = arith.mulf %174, %173 : vector<16x256xf32>
    %cst_86 = arith.constant 1.000000e+00 : f32
    %176 = vector.broadcast %cst_86 : f32 to vector<16x256xf32>
    %177 = arith.addf %176, %175 : vector<16x256xf32>
    %178 = tpu.reciprocal %177 {approx = true} : vector<16x256xf32> -> vector<16x256xf32>
    %cst_87 = arith.constant 1.06140542 : f32
    %179 = vector.broadcast %cst_87 : f32 to vector<16x256xf32>
    %180 = arith.mulf %179, %178 : vector<16x256xf32>
    %cst_88 = arith.constant -1.45315206 : f32
    %181 = vector.broadcast %cst_88 : f32 to vector<16x256xf32>
    %182 = arith.addf %180, %181 : vector<16x256xf32>
    %183 = arith.mulf %182, %178 : vector<16x256xf32>
    %cst_89 = arith.constant 1.42141378 : f32
    %184 = vector.broadcast %cst_89 : f32 to vector<16x256xf32>
    %185 = arith.addf %183, %184 : vector<16x256xf32>
    %186 = arith.mulf %185, %178 : vector<16x256xf32>
    %cst_90 = arith.constant -0.284496725 : f32
    %187 = vector.broadcast %cst_90 : f32 to vector<16x256xf32>
    %188 = arith.addf %186, %187 : vector<16x256xf32>
    %189 = arith.mulf %188, %178 : vector<16x256xf32>
    %cst_91 = arith.constant 0.254829586 : f32
    %190 = vector.broadcast %cst_91 : f32 to vector<16x256xf32>
    %191 = arith.addf %189, %190 : vector<16x256xf32>
    %192 = arith.mulf %191, %178 : vector<16x256xf32>
    %cst_92 = arith.constant 0.000000e+00 : f32
    %193 = vector.broadcast %cst_92 : f32 to vector<16x256xf32>
    %194 = arith.subf %193, %173 : vector<16x256xf32>
    %195 = arith.mulf %194, %173 : vector<16x256xf32>
    %196 = math.exp %195 : vector<16x256xf32>
    %197 = arith.mulf %192, %196 : vector<16x256xf32>
    %cst_93 = arith.constant 1.000000e+00 : f32
    %198 = vector.broadcast %cst_93 : f32 to vector<16x256xf32>
    %199 = arith.subf %198, %197 : vector<16x256xf32>
    %cst_94 = arith.constant 0.000000e+00 : f32
    %200 = vector.broadcast %cst_94 : f32 to vector<16x256xf32>
    %201 = arith.cmpf oge, %172, %200 : vector<16x256xf32>
    %cst_95 = arith.constant 0.000000e+00 : f32
    %202 = vector.broadcast %cst_95 : f32 to vector<16x256xf32>
    %203 = arith.subf %202, %199 : vector<16x256xf32>
    %204 = arith.select %201, %199, %203 : vector<16x256xi1>, vector<16x256xf32>
    %cst_96 = arith.constant 1.000000e+00 : f32
    %205 = vector.broadcast %cst_96 : f32 to vector<16x256xf32>
    %206 = arith.addf %205, %204 : vector<16x256xf32>
    %207 = arith.mulf %170, %206 : vector<16x256xf32>
    %c1_97 = arith.constant 1 : index
    %c0_98 = arith.constant 0 : index
    %c0_99 = arith.constant 0 : index
    %208 = vector.load %arg6[%c1_97, %c0_98, %c0_99] : memref<2x16x16xf32, #tpu.memory_space<vmem>>, vector<1x16x16xf32>
    %209 = vector.shape_cast %208 : vector<1x16x16xf32> to vector<16x16xf32>
    %cst_100 = arith.constant dense<0.000000e+00> : vector<16x256xf32>
    %210 = tpu.matmul %209, %207, %cst_100 {dimension_numbers = #tpu.dot_dimension_numbers<[1], [0], [0], [1], [0, 0, 1, 1], [], []>} : vector<16x16xf32>, vector<16x256xf32>, vector<16x256xf32> -> vector<16x256xf32>
    %c1_101 = arith.constant 1 : index
    %c0_102 = arith.constant 0 : index
    %c0_103 = arith.constant 0 : index
    %211 = vector.load %arg7[%c1_101, %c0_102, %c0_103] : memref<2x16x1xf32, #tpu.memory_space<vmem>>, vector<1x16x1xf32>
    %212 = vector.shape_cast %211 : vector<1x16x1xf32> to vector<16x1xf32>
    %213 = vector.broadcast %212 : vector<16x1xf32> to vector<16x256xf32>
    %214 = arith.addf %210, %213 : vector<16x256xf32>
    %215 = arith.addf %143, %214 : vector<16x256xf32>
    %cst_104 = arith.constant dense<0.000000e+00> : vector<16x256xf32>
    %216 = tpu.matmul %215, %7, %cst_104 {dimension_numbers = #tpu.dot_dimension_numbers<[1], [0], [0], [1], [0, 0, 1, 1], [], []>} : vector<16x256xf32>, vector<256x256xf32>, vector<16x256xf32> -> vector<16x256xf32>
    %217 = arith.mulf %215, %215 : vector<16x256xf32>
    %cst_105 = arith.constant dense<0.000000e+00> : vector<16x256xf32>
    %218 = tpu.matmul %217, %7, %cst_105 {dimension_numbers = #tpu.dot_dimension_numbers<[1], [0], [0], [1], [0, 0, 1, 1], [], []>} : vector<16x256xf32>, vector<256x256xf32>, vector<16x256xf32> -> vector<16x256xf32>
    %219 = arith.mulf %216, %216 : vector<16x256xf32>
    %220 = arith.subf %218, %219 : vector<16x256xf32>
    %221 = arith.subf %215, %216 : vector<16x256xf32>
    %cst_106 = arith.constant 9.99999974E-6 : f32
    %222 = vector.broadcast %cst_106 : f32 to vector<16x256xf32>
    %223 = arith.addf %220, %222 : vector<16x256xf32>
    %224 = math.rsqrt %223 : vector<16x256xf32>
    %225 = arith.mulf %221, %224 : vector<16x256xf32>
    %c1_107 = arith.constant 1 : index
    %c0_108 = arith.constant 0 : index
    %c0_109 = arith.constant 0 : index
    %226 = vector.load %arg8[%c1_107, %c0_108, %c0_109] : memref<2x256x256xf32, #tpu.memory_space<vmem>>, vector<1x256x256xf32>
    %227 = vector.shape_cast %226 : vector<1x256x256xf32> to vector<256x256xf32>
    %cst_110 = arith.constant dense<0.000000e+00> : vector<16x256xf32>
    %228 = tpu.matmul %225, %227, %cst_110 {dimension_numbers = #tpu.dot_dimension_numbers<[1], [0], [0], [1], [0, 0, 1, 1], [], []>} : vector<16x256xf32>, vector<256x256xf32>, vector<16x256xf32> -> vector<16x256xf32>
    %c1_111 = arith.constant 1 : index
    %c0_112 = arith.constant 0 : index
    %c0_113 = arith.constant 0 : index
    %229 = vector.load %arg9[%c1_111, %c0_112, %c0_113] : memref<2x1x256xf32, #tpu.memory_space<vmem>>, vector<1x1x256xf32>
    %230 = vector.shape_cast %229 : vector<1x1x256xf32> to vector<1x256xf32>
    %231 = vector.broadcast %230 : vector<1x256xf32> to vector<16x256xf32>
    %232 = arith.addf %228, %231 : vector<16x256xf32>
    %cst_114 = arith.constant 5.000000e-01 : f32
    %233 = vector.broadcast %cst_114 : f32 to vector<16x256xf32>
    %234 = arith.mulf %233, %232 : vector<16x256xf32>
    %cst_115 = arith.constant 0.707106769 : f32
    %235 = vector.broadcast %cst_115 : f32 to vector<16x256xf32>
    %236 = arith.mulf %232, %235 : vector<16x256xf32>
    %237 = math.absf %236 : vector<16x256xf32>
    %cst_116 = arith.constant 0.327591091 : f32
    %238 = vector.broadcast %cst_116 : f32 to vector<16x256xf32>
    %239 = arith.mulf %238, %237 : vector<16x256xf32>
    %cst_117 = arith.constant 1.000000e+00 : f32
    %240 = vector.broadcast %cst_117 : f32 to vector<16x256xf32>
    %241 = arith.addf %240, %239 : vector<16x256xf32>
    %242 = tpu.reciprocal %241 {approx = true} : vector<16x256xf32> -> vector<16x256xf32>
    %cst_118 = arith.constant 1.06140542 : f32
    %243 = vector.broadcast %cst_118 : f32 to vector<16x256xf32>
    %244 = arith.mulf %243, %242 : vector<16x256xf32>
    %cst_119 = arith.constant -1.45315206 : f32
    %245 = vector.broadcast %cst_119 : f32 to vector<16x256xf32>
    %246 = arith.addf %244, %245 : vector<16x256xf32>
    %247 = arith.mulf %246, %242 : vector<16x256xf32>
    %cst_120 = arith.constant 1.42141378 : f32
    %248 = vector.broadcast %cst_120 : f32 to vector<16x256xf32>
    %249 = arith.addf %247, %248 : vector<16x256xf32>
    %250 = arith.mulf %249, %242 : vector<16x256xf32>
    %cst_121 = arith.constant -0.284496725 : f32
    %251 = vector.broadcast %cst_121 : f32 to vector<16x256xf32>
    %252 = arith.addf %250, %251 : vector<16x256xf32>
    %253 = arith.mulf %252, %242 : vector<16x256xf32>
    %cst_122 = arith.constant 0.254829586 : f32
    %254 = vector.broadcast %cst_122 : f32 to vector<16x256xf32>
    %255 = arith.addf %253, %254 : vector<16x256xf32>
    %256 = arith.mulf %255, %242 : vector<16x256xf32>
    %cst_123 = arith.constant 0.000000e+00 : f32
    %257 = vector.broadcast %cst_123 : f32 to vector<16x256xf32>
    %258 = arith.subf %257, %237 : vector<16x256xf32>
    %259 = arith.mulf %258, %237 : vector<16x256xf32>
    %260 = math.exp %259 : vector<16x256xf32>
    %261 = arith.mulf %256, %260 : vector<16x256xf32>
    %cst_124 = arith.constant 1.000000e+00 : f32
    %262 = vector.broadcast %cst_124 : f32 to vector<16x256xf32>
    %263 = arith.subf %262, %261 : vector<16x256xf32>
    %cst_125 = arith.constant 0.000000e+00 : f32
    %264 = vector.broadcast %cst_125 : f32 to vector<16x256xf32>
    %265 = arith.cmpf oge, %236, %264 : vector<16x256xf32>
    %cst_126 = arith.constant 0.000000e+00 : f32
    %266 = vector.broadcast %cst_126 : f32 to vector<16x256xf32>
    %267 = arith.subf %266, %263 : vector<16x256xf32>
    %268 = arith.select %265, %263, %267 : vector<16x256xi1>, vector<16x256xf32>
    %cst_127 = arith.constant 1.000000e+00 : f32
    %269 = vector.broadcast %cst_127 : f32 to vector<16x256xf32>
    %270 = arith.addf %269, %268 : vector<16x256xf32>
    %271 = arith.mulf %234, %270 : vector<16x256xf32>
    %c1_128 = arith.constant 1 : index
    %c0_129 = arith.constant 0 : index
    %c0_130 = arith.constant 0 : index
    %272 = vector.load %arg10[%c1_128, %c0_129, %c0_130] : memref<2x256x256xf32, #tpu.memory_space<vmem>>, vector<1x256x256xf32>
    %273 = vector.shape_cast %272 : vector<1x256x256xf32> to vector<256x256xf32>
    %cst_131 = arith.constant dense<0.000000e+00> : vector<16x256xf32>
    %274 = tpu.matmul %271, %273, %cst_131 {dimension_numbers = #tpu.dot_dimension_numbers<[1], [0], [0], [1], [0, 0, 1, 1], [], []>} : vector<16x256xf32>, vector<256x256xf32>, vector<16x256xf32> -> vector<16x256xf32>
    %c1_132 = arith.constant 1 : index
    %c0_133 = arith.constant 0 : index
    %c0_134 = arith.constant 0 : index
    %275 = vector.load %arg11[%c1_132, %c0_133, %c0_134] : memref<2x1x256xf32, #tpu.memory_space<vmem>>, vector<1x1x256xf32>
    %276 = vector.shape_cast %275 : vector<1x1x256xf32> to vector<1x256xf32>
    %277 = vector.broadcast %276 : vector<1x256xf32> to vector<16x256xf32>
    %278 = arith.addf %274, %277 : vector<16x256xf32>
    %279 = arith.addf %215, %278 : vector<16x256xf32>
    %c0_135 = arith.constant 0 : index
    %c0_136 = arith.constant 0 : index
    %280 = vector.load %arg13[%c0_135, %c0_136] : memref<16x32xf32, #tpu.memory_space<vmem>>, vector<16x32xf32>
    %c0_137 = arith.constant 0 : index
    %c0_138 = arith.constant 0 : index
    %281 = vector.load %arg14[%c0_137, %c0_138] : memref<16x32xf32, #tpu.memory_space<vmem>>, vector<16x32xf32>
    %c0_139 = arith.constant 0 : index
    %c0_140 = arith.constant 0 : index
    %282 = vector.load %arg15[%c0_139, %c0_140] : memref<16x128xf32, #tpu.memory_space<vmem>>, vector<16x128xf32>
    %c0_141 = arith.constant 0 : index
    %c0_142 = arith.constant 0 : index
    %283 = vector.load %arg16[%c0_141, %c0_142] : memref<1x128xf32, #tpu.memory_space<vmem>>, vector<1x128xf32>
    %284 = vector.extract_strided_slice %279 {offsets = [0, 0], sizes = [16, 32], strides = [1, 1]} : vector<16x256xf32> to vector<16x32xf32>
    %285 = vector.shape_cast %284 : vector<16x32xf32> to vector<1x16x32xf32>
    %cst_143 = arith.constant dense<0.000000e+00> : vector<1xf32>
    %286 = vector.multi_reduction <add>, %285, %cst_143 [1, 2] : vector<1x16x32xf32> to vector<1xf32>
    %287 = vector.shape_cast %286 : vector<1xf32> to vector<1x1x1xf32>
    %288 = vector.extract %287[0, 0, 0] : f32 from vector<1x1x1xf32>
    %cst_144 = arith.constant 5.120000e+02 : f32
    %289 = arith.divf %288, %cst_144 : f32
    %290 = arith.mulf %284, %284 : vector<16x32xf32>
    %291 = vector.shape_cast %290 : vector<16x32xf32> to vector<1x16x32xf32>
    %cst_145 = arith.constant dense<0.000000e+00> : vector<1xf32>
    %292 = vector.multi_reduction <add>, %291, %cst_145 [1, 2] : vector<1x16x32xf32> to vector<1xf32>
    %293 = vector.shape_cast %292 : vector<1xf32> to vector<1x1x1xf32>
    %294 = vector.extract %293[0, 0, 0] : f32 from vector<1x1x1xf32>
    %cst_146 = arith.constant 5.120000e+02 : f32
    %295 = arith.divf %294, %cst_146 : f32
    %296 = arith.mulf %289, %289 : f32
    %297 = arith.subf %295, %296 : f32
    %298 = vector.broadcast %289 : f32 to vector<16x32xf32>
    %299 = arith.subf %284, %298 : vector<16x32xf32>
    %cst_147 = arith.constant 9.99999974E-6 : f32
    %300 = arith.addf %297, %cst_147 : f32
    %301 = math.rsqrt %300 : f32
    %302 = vector.broadcast %301 : f32 to vector<16x32xf32>
    %303 = arith.mulf %299, %302 : vector<16x32xf32>
    %304 = arith.mulf %303, %280 : vector<16x32xf32>
    %305 = arith.addf %304, %281 : vector<16x32xf32>
    %cst_148 = arith.constant dense<0.000000e+00> : vector<16xf32>
    %306 = vector.multi_reduction <add>, %305, %cst_148 [1] : vector<16x32xf32> to vector<16xf32>
    %307 = vector.shape_cast %306 : vector<16xf32> to vector<16x1xf32>
    %cst_149 = arith.constant 3.200000e+01 : f32
    %308 = vector.broadcast %cst_149 : f32 to vector<16x1xf32>
    %309 = arith.divf %307, %308 : vector<16x1xf32>
    %310 = vector.broadcast %309 : vector<16x1xf32> to vector<16x128xf32>
    %311 = arith.mulf %310, %282 : vector<16x128xf32>
    %cst_150 = arith.constant dense<0.000000e+00> : vector<128xf32>
    %312 = vector.multi_reduction <add>, %311, %cst_150 [0] : vector<16x128xf32> to vector<128xf32>
    %313 = vector.shape_cast %312 : vector<128xf32> to vector<1x128xf32>
    %314 = arith.addf %313, %283 : vector<1x128xf32>
    %315 = arith.negf %314 : vector<1x128xf32>
    %316 = math.exp %315 : vector<1x128xf32>
    %cst_151 = arith.constant 1.000000e+00 : f32
    %317 = vector.broadcast %cst_151 : f32 to vector<1x128xf32>
    %318 = arith.addf %317, %316 : vector<1x128xf32>
    %319 = arith.divf %317, %318 : vector<1x128xf32>
    %c0_152 = arith.constant 0 : index
    %c0_153 = arith.constant 0 : index
    %c0_154 = arith.constant 0 : index
    %320 = vector.load %arg17[%c0_152, %c0_153, %c0_154] : memref<1x8x128xf32, #tpu.memory_space<vmem>>, vector<1x1x128xf32>
    %321 = vector.shape_cast %320 : vector<1x1x128xf32> to vector<1x128xf32>
    %322 = vector.shape_cast %319 : vector<1x128xf32> to vector<1x1x128xf32>
    tpu.vector_store %arg17[%c0_152, %c0_153, %c0_154], %322 {strides = array<i32>} : memref<1x8x128xf32, #tpu.memory_space<vmem>>, vector<1x1x128xf32>,
    %323 = vector.extract_strided_slice %279 {offsets = [0, 32], sizes = [16, 32], strides = [1, 1]} : vector<16x256xf32> to vector<16x32xf32>
    %324 = vector.shape_cast %323 : vector<16x32xf32> to vector<1x16x32xf32>
    %cst_155 = arith.constant dense<0.000000e+00> : vector<1xf32>
    %325 = vector.multi_reduction <add>, %324, %cst_155 [1, 2] : vector<1x16x32xf32> to vector<1xf32>
    %326 = vector.shape_cast %325 : vector<1xf32> to vector<1x1x1xf32>
    %327 = vector.extract %326[0, 0, 0] : f32 from vector<1x1x1xf32>
    %cst_156 = arith.constant 5.120000e+02 : f32
    %328 = arith.divf %327, %cst_156 : f32
    %329 = arith.mulf %323, %323 : vector<16x32xf32>
    %330 = vector.shape_cast %329 : vector<16x32xf32> to vector<1x16x32xf32>
    %cst_157 = arith.constant dense<0.000000e+00> : vector<1xf32>
    %331 = vector.multi_reduction <add>, %330, %cst_157 [1, 2] : vector<1x16x32xf32> to vector<1xf32>
    %332 = vector.shape_cast %331 : vector<1xf32> to vector<1x1x1xf32>
    %333 = vector.extract %332[0, 0, 0] : f32 from vector<1x1x1xf32>
    %cst_158 = arith.constant 5.120000e+02 : f32
    %334 = arith.divf %333, %cst_158 : f32
    %335 = arith.mulf %328, %328 : f32
    %336 = arith.subf %334, %335 : f32
    %337 = vector.broadcast %328 : f32 to vector<16x32xf32>
    %338 = arith.subf %323, %337 : vector<16x32xf32>
    %cst_159 = arith.constant 9.99999974E-6 : f32
    %339 = arith.addf %336, %cst_159 : f32
    %340 = math.rsqrt %339 : f32
    %341 = vector.broadcast %340 : f32 to vector<16x32xf32>
    %342 = arith.mulf %338, %341 : vector<16x32xf32>
    %343 = arith.mulf %342, %280 : vector<16x32xf32>
    %344 = arith.addf %343, %281 : vector<16x32xf32>
    %cst_160 = arith.constant dense<0.000000e+00> : vector<16xf32>
    %345 = vector.multi_reduction <add>, %344, %cst_160 [1] : vector<16x32xf32> to vector<16xf32>
    %346 = vector.shape_cast %345 : vector<16xf32> to vector<16x1xf32>
    %cst_161 = arith.constant 3.200000e+01 : f32
    %347 = vector.broadcast %cst_161 : f32 to vector<16x1xf32>
    %348 = arith.divf %346, %347 : vector<16x1xf32>
    %349 = vector.broadcast %348 : vector<16x1xf32> to vector<16x128xf32>
    %350 = arith.mulf %349, %282 : vector<16x128xf32>
    %cst_162 = arith.constant dense<0.000000e+00> : vector<128xf32>
    %351 = vector.multi_reduction <add>, %350, %cst_162 [0] : vector<16x128xf32> to vector<128xf32>
    %352 = vector.shape_cast %351 : vector<128xf32> to vector<1x128xf32>
    %353 = arith.addf %352, %283 : vector<1x128xf32>
    %354 = arith.negf %353 : vector<1x128xf32>
    %355 = math.exp %354 : vector<1x128xf32>
    %cst_163 = arith.constant 1.000000e+00 : f32
    %356 = vector.broadcast %cst_163 : f32 to vector<1x128xf32>
    %357 = arith.addf %356, %355 : vector<1x128xf32>
    %358 = arith.divf %356, %357 : vector<1x128xf32>
    %c0_164 = arith.constant 0 : index
    %c1_165 = arith.constant 1 : index
    %c0_166 = arith.constant 0 : index
    %359 = vector.load %arg17[%c0_164, %c1_165, %c0_166] : memref<1x8x128xf32, #tpu.memory_space<vmem>>, vector<1x1x128xf32>
    %360 = vector.shape_cast %359 : vector<1x1x128xf32> to vector<1x128xf32>
    %361 = vector.shape_cast %358 : vector<1x128xf32> to vector<1x1x128xf32>
    tpu.vector_store %arg17[%c0_164, %c1_165, %c0_166], %361 {strides = array<i32>} : memref<1x8x128xf32, #tpu.memory_space<vmem>>, vector<1x1x128xf32>,
    %362 = vector.extract_strided_slice %279 {offsets = [0, 64], sizes = [16, 32], strides = [1, 1]} : vector<16x256xf32> to vector<16x32xf32>
    %363 = vector.shape_cast %362 : vector<16x32xf32> to vector<1x16x32xf32>
    %cst_167 = arith.constant dense<0.000000e+00> : vector<1xf32>
    %364 = vector.multi_reduction <add>, %363, %cst_167 [1, 2] : vector<1x16x32xf32> to vector<1xf32>
    %365 = vector.shape_cast %364 : vector<1xf32> to vector<1x1x1xf32>
    %366 = vector.extract %365[0, 0, 0] : f32 from vector<1x1x1xf32>
    %cst_168 = arith.constant 5.120000e+02 : f32
    %367 = arith.divf %366, %cst_168 : f32
    %368 = arith.mulf %362, %362 : vector<16x32xf32>
    %369 = vector.shape_cast %368 : vector<16x32xf32> to vector<1x16x32xf32>
    %cst_169 = arith.constant dense<0.000000e+00> : vector<1xf32>
    %370 = vector.multi_reduction <add>, %369, %cst_169 [1, 2] : vector<1x16x32xf32> to vector<1xf32>
    %371 = vector.shape_cast %370 : vector<1xf32> to vector<1x1x1xf32>
    %372 = vector.extract %371[0, 0, 0] : f32 from vector<1x1x1xf32>
    %cst_170 = arith.constant 5.120000e+02 : f32
    %373 = arith.divf %372, %cst_170 : f32
    %374 = arith.mulf %367, %367 : f32
    %375 = arith.subf %373, %374 : f32
    %376 = vector.broadcast %367 : f32 to vector<16x32xf32>
    %377 = arith.subf %362, %376 : vector<16x32xf32>
    %cst_171 = arith.constant 9.99999974E-6 : f32
    %378 = arith.addf %375, %cst_171 : f32
    %379 = math.rsqrt %378 : f32
    %380 = vector.broadcast %379 : f32 to vector<16x32xf32>
    %381 = arith.mulf %377, %380 : vector<16x32xf32>
    %382 = arith.mulf %381, %280 : vector<16x32xf32>
    %383 = arith.addf %382, %281 : vector<16x32xf32>
    %cst_172 = arith.constant dense<0.000000e+00> : vector<16xf32>
    %384 = vector.multi_reduction <add>, %383, %cst_172 [1] : vector<16x32xf32> to vector<16xf32>
    %385 = vector.shape_cast %384 : vector<16xf32> to vector<16x1xf32>
    %cst_173 = arith.constant 3.200000e+01 : f32
    %386 = vector.broadcast %cst_173 : f32 to vector<16x1xf32>
    %387 = arith.divf %385, %386 : vector<16x1xf32>
    %388 = vector.broadcast %387 : vector<16x1xf32> to vector<16x128xf32>
    %389 = arith.mulf %388, %282 : vector<16x128xf32>
    %cst_174 = arith.constant dense<0.000000e+00> : vector<128xf32>
    %390 = vector.multi_reduction <add>, %389, %cst_174 [0] : vector<16x128xf32> to vector<128xf32>
    %391 = vector.shape_cast %390 : vector<128xf32> to vector<1x128xf32>
    %392 = arith.addf %391, %283 : vector<1x128xf32>
    %393 = arith.negf %392 : vector<1x128xf32>
    %394 = math.exp %393 : vector<1x128xf32>
    %cst_175 = arith.constant 1.000000e+00 : f32
    %395 = vector.broadcast %cst_175 : f32 to vector<1x128xf32>
    %396 = arith.addf %395, %394 : vector<1x128xf32>
    %397 = arith.divf %395, %396 : vector<1x128xf32>
    %c0_176 = arith.constant 0 : index
    %c2 = arith.constant 2 : index
    %c0_177 = arith.constant 0 : index
    %398 = vector.load %arg17[%c0_176, %c2, %c0_177] : memref<1x8x128xf32, #tpu.memory_space<vmem>>, vector<1x1x128xf32>
    %399 = vector.shape_cast %398 : vector<1x1x128xf32> to vector<1x128xf32>
    %400 = vector.shape_cast %397 : vector<1x128xf32> to vector<1x1x128xf32>
    tpu.vector_store %arg17[%c0_176, %c2, %c0_177], %400 {strides = array<i32>} : memref<1x8x128xf32, #tpu.memory_space<vmem>>, vector<1x1x128xf32>,
    %401 = vector.extract_strided_slice %279 {offsets = [0, 96], sizes = [16, 32], strides = [1, 1]} : vector<16x256xf32> to vector<16x32xf32>
    %402 = vector.shape_cast %401 : vector<16x32xf32> to vector<1x16x32xf32>
    %cst_178 = arith.constant dense<0.000000e+00> : vector<1xf32>
    %403 = vector.multi_reduction <add>, %402, %cst_178 [1, 2] : vector<1x16x32xf32> to vector<1xf32>
    %404 = vector.shape_cast %403 : vector<1xf32> to vector<1x1x1xf32>
    %405 = vector.extract %404[0, 0, 0] : f32 from vector<1x1x1xf32>
    %cst_179 = arith.constant 5.120000e+02 : f32
    %406 = arith.divf %405, %cst_179 : f32
    %407 = arith.mulf %401, %401 : vector<16x32xf32>
    %408 = vector.shape_cast %407 : vector<16x32xf32> to vector<1x16x32xf32>
    %cst_180 = arith.constant dense<0.000000e+00> : vector<1xf32>
    %409 = vector.multi_reduction <add>, %408, %cst_180 [1, 2] : vector<1x16x32xf32> to vector<1xf32>
    %410 = vector.shape_cast %409 : vector<1xf32> to vector<1x1x1xf32>
    %411 = vector.extract %410[0, 0, 0] : f32 from vector<1x1x1xf32>
    %cst_181 = arith.constant 5.120000e+02 : f32
    %412 = arith.divf %411, %cst_181 : f32
    %413 = arith.mulf %406, %406 : f32
    %414 = arith.subf %412, %413 : f32
    %415 = vector.broadcast %406 : f32 to vector<16x32xf32>
    %416 = arith.subf %401, %415 : vector<16x32xf32>
    %cst_182 = arith.constant 9.99999974E-6 : f32
    %417 = arith.addf %414, %cst_182 : f32
    %418 = math.rsqrt %417 : f32
    %419 = vector.broadcast %418 : f32 to vector<16x32xf32>
    %420 = arith.mulf %416, %419 : vector<16x32xf32>
    %421 = arith.mulf %420, %280 : vector<16x32xf32>
    %422 = arith.addf %421, %281 : vector<16x32xf32>
    %cst_183 = arith.constant dense<0.000000e+00> : vector<16xf32>
    %423 = vector.multi_reduction <add>, %422, %cst_183 [1] : vector<16x32xf32> to vector<16xf32>
    %424 = vector.shape_cast %423 : vector<16xf32> to vector<16x1xf32>
    %cst_184 = arith.constant 3.200000e+01 : f32
    %425 = vector.broadcast %cst_184 : f32 to vector<16x1xf32>
    %426 = arith.divf %424, %425 : vector<16x1xf32>
    %427 = vector.broadcast %426 : vector<16x1xf32> to vector<16x128xf32>
    %428 = arith.mulf %427, %282 : vector<16x128xf32>
    %cst_185 = arith.constant dense<0.000000e+00> : vector<128xf32>
    %429 = vector.multi_reduction <add>, %428, %cst_185 [0] : vector<16x128xf32> to vector<128xf32>
    %430 = vector.shape_cast %429 : vector<128xf32> to vector<1x128xf32>
    %431 = arith.addf %430, %283 : vector<1x128xf32>
    %432 = arith.negf %431 : vector<1x128xf32>
    %433 = math.exp %432 : vector<1x128xf32>
    %cst_186 = arith.constant 1.000000e+00 : f32
    %434 = vector.broadcast %cst_186 : f32 to vector<1x128xf32>
    %435 = arith.addf %434, %433 : vector<1x128xf32>
    %436 = arith.divf %434, %435 : vector<1x128xf32>
    %c0_187 = arith.constant 0 : index
    %c3 = arith.constant 3 : index
    %c0_188 = arith.constant 0 : index
    %437 = vector.load %arg17[%c0_187, %c3, %c0_188] : memref<1x8x128xf32, #tpu.memory_space<vmem>>, vector<1x1x128xf32>
    %438 = vector.shape_cast %437 : vector<1x1x128xf32> to vector<1x128xf32>
    %439 = vector.shape_cast %436 : vector<1x128xf32> to vector<1x1x128xf32>
    tpu.vector_store %arg17[%c0_187, %c3, %c0_188], %439 {strides = array<i32>} : memref<1x8x128xf32, #tpu.memory_space<vmem>>, vector<1x1x128xf32>,
    %440 = vector.extract_strided_slice %279 {offsets = [0, 128], sizes = [16, 32], strides = [1, 1]} : vector<16x256xf32> to vector<16x32xf32>
    %441 = vector.shape_cast %440 : vector<16x32xf32> to vector<1x16x32xf32>
    %cst_189 = arith.constant dense<0.000000e+00> : vector<1xf32>
    %442 = vector.multi_reduction <add>, %441, %cst_189 [1, 2] : vector<1x16x32xf32> to vector<1xf32>
    %443 = vector.shape_cast %442 : vector<1xf32> to vector<1x1x1xf32>
    %444 = vector.extract %443[0, 0, 0] : f32 from vector<1x1x1xf32>
    %cst_190 = arith.constant 5.120000e+02 : f32
    %445 = arith.divf %444, %cst_190 : f32
    %446 = arith.mulf %440, %440 : vector<16x32xf32>
    %447 = vector.shape_cast %446 : vector<16x32xf32> to vector<1x16x32xf32>
    %cst_191 = arith.constant dense<0.000000e+00> : vector<1xf32>
    %448 = vector.multi_reduction <add>, %447, %cst_191 [1, 2] : vector<1x16x32xf32> to vector<1xf32>
    %449 = vector.shape_cast %448 : vector<1xf32> to vector<1x1x1xf32>
    %450 = vector.extract %449[0, 0, 0] : f32 from vector<1x1x1xf32>
    %cst_192 = arith.constant 5.120000e+02 : f32
    %451 = arith.divf %450, %cst_192 : f32
    %452 = arith.mulf %445, %445 : f32
    %453 = arith.subf %451, %452 : f32
    %454 = vector.broadcast %445 : f32 to vector<16x32xf32>
    %455 = arith.subf %440, %454 : vector<16x32xf32>
    %cst_193 = arith.constant 9.99999974E-6 : f32
    %456 = arith.addf %453, %cst_193 : f32
    %457 = math.rsqrt %456 : f32
    %458 = vector.broadcast %457 : f32 to vector<16x32xf32>
    %459 = arith.mulf %455, %458 : vector<16x32xf32>
    %460 = arith.mulf %459, %280 : vector<16x32xf32>
    %461 = arith.addf %460, %281 : vector<16x32xf32>
    %cst_194 = arith.constant dense<0.000000e+00> : vector<16xf32>
    %462 = vector.multi_reduction <add>, %461, %cst_194 [1] : vector<16x32xf32> to vector<16xf32>
    %463 = vector.shape_cast %462 : vector<16xf32> to vector<16x1xf32>
    %cst_195 = arith.constant 3.200000e+01 : f32
    %464 = vector.broadcast %cst_195 : f32 to vector<16x1xf32>
    %465 = arith.divf %463, %464 : vector<16x1xf32>
    %466 = vector.broadcast %465 : vector<16x1xf32> to vector<16x128xf32>
    %467 = arith.mulf %466, %282 : vector<16x128xf32>
    %cst_196 = arith.constant dense<0.000000e+00> : vector<128xf32>
    %468 = vector.multi_reduction <add>, %467, %cst_196 [0] : vector<16x128xf32> to vector<128xf32>
    %469 = vector.shape_cast %468 : vector<128xf32> to vector<1x128xf32>
    %470 = arith.addf %469, %283 : vector<1x128xf32>
    %471 = arith.negf %470 : vector<1x128xf32>
    %472 = math.exp %471 : vector<1x128xf32>
    %cst_197 = arith.constant 1.000000e+00 : f32
    %473 = vector.broadcast %cst_197 : f32 to vector<1x128xf32>
    %474 = arith.addf %473, %472 : vector<1x128xf32>
    %475 = arith.divf %473, %474 : vector<1x128xf32>
    %c0_198 = arith.constant 0 : index
    %c4 = arith.constant 4 : index
    %c0_199 = arith.constant 0 : index
    %476 = vector.load %arg17[%c0_198, %c4, %c0_199] : memref<1x8x128xf32, #tpu.memory_space<vmem>>, vector<1x1x128xf32>
    %477 = vector.shape_cast %476 : vector<1x1x128xf32> to vector<1x128xf32>
    %478 = vector.shape_cast %475 : vector<1x128xf32> to vector<1x1x128xf32>
    tpu.vector_store %arg17[%c0_198, %c4, %c0_199], %478 {strides = array<i32>} : memref<1x8x128xf32, #tpu.memory_space<vmem>>, vector<1x1x128xf32>,
    %479 = vector.extract_strided_slice %279 {offsets = [0, 160], sizes = [16, 32], strides = [1, 1]} : vector<16x256xf32> to vector<16x32xf32>
    %480 = vector.shape_cast %479 : vector<16x32xf32> to vector<1x16x32xf32>
    %cst_200 = arith.constant dense<0.000000e+00> : vector<1xf32>
    %481 = vector.multi_reduction <add>, %480, %cst_200 [1, 2] : vector<1x16x32xf32> to vector<1xf32>
    %482 = vector.shape_cast %481 : vector<1xf32> to vector<1x1x1xf32>
    %483 = vector.extract %482[0, 0, 0] : f32 from vector<1x1x1xf32>
    %cst_201 = arith.constant 5.120000e+02 : f32
    %484 = arith.divf %483, %cst_201 : f32
    %485 = arith.mulf %479, %479 : vector<16x32xf32>
    %486 = vector.shape_cast %485 : vector<16x32xf32> to vector<1x16x32xf32>
    %cst_202 = arith.constant dense<0.000000e+00> : vector<1xf32>
    %487 = vector.multi_reduction <add>, %486, %cst_202 [1, 2] : vector<1x16x32xf32> to vector<1xf32>
    %488 = vector.shape_cast %487 : vector<1xf32> to vector<1x1x1xf32>
    %489 = vector.extract %488[0, 0, 0] : f32 from vector<1x1x1xf32>
    %cst_203 = arith.constant 5.120000e+02 : f32
    %490 = arith.divf %489, %cst_203 : f32
    %491 = arith.mulf %484, %484 : f32
    %492 = arith.subf %490, %491 : f32
    %493 = vector.broadcast %484 : f32 to vector<16x32xf32>
    %494 = arith.subf %479, %493 : vector<16x32xf32>
    %cst_204 = arith.constant 9.99999974E-6 : f32
    %495 = arith.addf %492, %cst_204 : f32
    %496 = math.rsqrt %495 : f32
    %497 = vector.broadcast %496 : f32 to vector<16x32xf32>
    %498 = arith.mulf %494, %497 : vector<16x32xf32>
    %499 = arith.mulf %498, %280 : vector<16x32xf32>
    %500 = arith.addf %499, %281 : vector<16x32xf32>
    %cst_205 = arith.constant dense<0.000000e+00> : vector<16xf32>
    %501 = vector.multi_reduction <add>, %500, %cst_205 [1] : vector<16x32xf32> to vector<16xf32>
    %502 = vector.shape_cast %501 : vector<16xf32> to vector<16x1xf32>
    %cst_206 = arith.constant 3.200000e+01 : f32
    %503 = vector.broadcast %cst_206 : f32 to vector<16x1xf32>
    %504 = arith.divf %502, %503 : vector<16x1xf32>
    %505 = vector.broadcast %504 : vector<16x1xf32> to vector<16x128xf32>
    %506 = arith.mulf %505, %282 : vector<16x128xf32>
    %cst_207 = arith.constant dense<0.000000e+00> : vector<128xf32>
    %507 = vector.multi_reduction <add>, %506, %cst_207 [0] : vector<16x128xf32> to vector<128xf32>
    %508 = vector.shape_cast %507 : vector<128xf32> to vector<1x128xf32>
    %509 = arith.addf %508, %283 : vector<1x128xf32>
    %510 = arith.negf %509 : vector<1x128xf32>
    %511 = math.exp %510 : vector<1x128xf32>
    %cst_208 = arith.constant 1.000000e+00 : f32
    %512 = vector.broadcast %cst_208 : f32 to vector<1x128xf32>
    %513 = arith.addf %512, %511 : vector<1x128xf32>
    %514 = arith.divf %512, %513 : vector<1x128xf32>
    %c0_209 = arith.constant 0 : index
    %c5 = arith.constant 5 : index
    %c0_210 = arith.constant 0 : index
    %515 = vector.load %arg17[%c0_209, %c5, %c0_210] : memref<1x8x128xf32, #tpu.memory_space<vmem>>, vector<1x1x128xf32>
    %516 = vector.shape_cast %515 : vector<1x1x128xf32> to vector<1x128xf32>
    %517 = vector.shape_cast %514 : vector<1x128xf32> to vector<1x1x128xf32>
    tpu.vector_store %arg17[%c0_209, %c5, %c0_210], %517 {strides = array<i32>} : memref<1x8x128xf32, #tpu.memory_space<vmem>>, vector<1x1x128xf32>,
    %518 = vector.extract_strided_slice %279 {offsets = [0, 192], sizes = [16, 32], strides = [1, 1]} : vector<16x256xf32> to vector<16x32xf32>
    %519 = vector.shape_cast %518 : vector<16x32xf32> to vector<1x16x32xf32>
    %cst_211 = arith.constant dense<0.000000e+00> : vector<1xf32>
    %520 = vector.multi_reduction <add>, %519, %cst_211 [1, 2] : vector<1x16x32xf32> to vector<1xf32>
    %521 = vector.shape_cast %520 : vector<1xf32> to vector<1x1x1xf32>
    %522 = vector.extract %521[0, 0, 0] : f32 from vector<1x1x1xf32>
    %cst_212 = arith.constant 5.120000e+02 : f32
    %523 = arith.divf %522, %cst_212 : f32
    %524 = arith.mulf %518, %518 : vector<16x32xf32>
    %525 = vector.shape_cast %524 : vector<16x32xf32> to vector<1x16x32xf32>
    %cst_213 = arith.constant dense<0.000000e+00> : vector<1xf32>
    %526 = vector.multi_reduction <add>, %525, %cst_213 [1, 2] : vector<1x16x32xf32> to vector<1xf32>
    %527 = vector.shape_cast %526 : vector<1xf32> to vector<1x1x1xf32>
    %528 = vector.extract %527[0, 0, 0] : f32 from vector<1x1x1xf32>
    %cst_214 = arith.constant 5.120000e+02 : f32
    %529 = arith.divf %528, %cst_214 : f32
    %530 = arith.mulf %523, %523 : f32
    %531 = arith.subf %529, %530 : f32
    %532 = vector.broadcast %523 : f32 to vector<16x32xf32>
    %533 = arith.subf %518, %532 : vector<16x32xf32>
    %cst_215 = arith.constant 9.99999974E-6 : f32
    %534 = arith.addf %531, %cst_215 : f32
    %535 = math.rsqrt %534 : f32
    %536 = vector.broadcast %535 : f32 to vector<16x32xf32>
    %537 = arith.mulf %533, %536 : vector<16x32xf32>
    %538 = arith.mulf %537, %280 : vector<16x32xf32>
    %539 = arith.addf %538, %281 : vector<16x32xf32>
    %cst_216 = arith.constant dense<0.000000e+00> : vector<16xf32>
    %540 = vector.multi_reduction <add>, %539, %cst_216 [1] : vector<16x32xf32> to vector<16xf32>
    %541 = vector.shape_cast %540 : vector<16xf32> to vector<16x1xf32>
    %cst_217 = arith.constant 3.200000e+01 : f32
    %542 = vector.broadcast %cst_217 : f32 to vector<16x1xf32>
    %543 = arith.divf %541, %542 : vector<16x1xf32>
    %544 = vector.broadcast %543 : vector<16x1xf32> to vector<16x128xf32>
    %545 = arith.mulf %544, %282 : vector<16x128xf32>
    %cst_218 = arith.constant dense<0.000000e+00> : vector<128xf32>
    %546 = vector.multi_reduction <add>, %545, %cst_218 [0] : vector<16x128xf32> to vector<128xf32>
    %547 = vector.shape_cast %546 : vector<128xf32> to vector<1x128xf32>
    %548 = arith.addf %547, %283 : vector<1x128xf32>
    %549 = arith.negf %548 : vector<1x128xf32>
    %550 = math.exp %549 : vector<1x128xf32>
    %cst_219 = arith.constant 1.000000e+00 : f32
    %551 = vector.broadcast %cst_219 : f32 to vector<1x128xf32>
    %552 = arith.addf %551, %550 : vector<1x128xf32>
    %553 = arith.divf %551, %552 : vector<1x128xf32>
    %c0_220 = arith.constant 0 : index
    %c6 = arith.constant 6 : index
    %c0_221 = arith.constant 0 : index
    %554 = vector.load %arg17[%c0_220, %c6, %c0_221] : memref<1x8x128xf32, #tpu.memory_space<vmem>>, vector<1x1x128xf32>
    %555 = vector.shape_cast %554 : vector<1x1x128xf32> to vector<1x128xf32>
    %556 = vector.shape_cast %553 : vector<1x128xf32> to vector<1x1x128xf32>
    tpu.vector_store %arg17[%c0_220, %c6, %c0_221], %556 {strides = array<i32>} : memref<1x8x128xf32, #tpu.memory_space<vmem>>, vector<1x1x128xf32>,
    %557 = vector.extract_strided_slice %279 {offsets = [0, 224], sizes = [16, 32], strides = [1, 1]} : vector<16x256xf32> to vector<16x32xf32>
    %558 = vector.shape_cast %557 : vector<16x32xf32> to vector<1x16x32xf32>
    %cst_222 = arith.constant dense<0.000000e+00> : vector<1xf32>
    %559 = vector.multi_reduction <add>, %558, %cst_222 [1, 2] : vector<1x16x32xf32> to vector<1xf32>
    %560 = vector.shape_cast %559 : vector<1xf32> to vector<1x1x1xf32>
    %561 = vector.extract %560[0, 0, 0] : f32 from vector<1x1x1xf32>
    %cst_223 = arith.constant 5.120000e+02 : f32
    %562 = arith.divf %561, %cst_223 : f32
    %563 = arith.mulf %557, %557 : vector<16x32xf32>
    %564 = vector.shape_cast %563 : vector<16x32xf32> to vector<1x16x32xf32>
    %cst_224 = arith.constant dense<0.000000e+00> : vector<1xf32>
    %565 = vector.multi_reduction <add>, %564, %cst_224 [1, 2] : vector<1x16x32xf32> to vector<1xf32>
    %566 = vector.shape_cast %565 : vector<1xf32> to vector<1x1x1xf32>
    %567 = vector.extract %566[0, 0, 0] : f32 from vector<1x1x1xf32>
    %cst_225 = arith.constant 5.120000e+02 : f32
    %568 = arith.divf %567, %cst_225 : f32
    %569 = arith.mulf %562, %562 : f32
    %570 = arith.subf %568, %569 : f32
    %571 = vector.broadcast %562 : f32 to vector<16x32xf32>
    %572 = arith.subf %557, %571 : vector<16x32xf32>
    %cst_226 = arith.constant 9.99999974E-6 : f32
    %573 = arith.addf %570, %cst_226 : f32
    %574 = math.rsqrt %573 : f32
    %575 = vector.broadcast %574 : f32 to vector<16x32xf32>
    %576 = arith.mulf %572, %575 : vector<16x32xf32>
    %577 = arith.mulf %576, %280 : vector<16x32xf32>
    %578 = arith.addf %577, %281 : vector<16x32xf32>
    %cst_227 = arith.constant dense<0.000000e+00> : vector<16xf32>
    %579 = vector.multi_reduction <add>, %578, %cst_227 [1] : vector<16x32xf32> to vector<16xf32>
    %580 = vector.shape_cast %579 : vector<16xf32> to vector<16x1xf32>
    %cst_228 = arith.constant 3.200000e+01 : f32
    %581 = vector.broadcast %cst_228 : f32 to vector<16x1xf32>
    %582 = arith.divf %580, %581 : vector<16x1xf32>
    %583 = vector.broadcast %582 : vector<16x1xf32> to vector<16x128xf32>
    %584 = arith.mulf %583, %282 : vector<16x128xf32>
    %cst_229 = arith.constant dense<0.000000e+00> : vector<128xf32>
    %585 = vector.multi_reduction <add>, %584, %cst_229 [0] : vector<16x128xf32> to vector<128xf32>
    %586 = vector.shape_cast %585 : vector<128xf32> to vector<1x128xf32>
    %587 = arith.addf %586, %283 : vector<1x128xf32>
    %588 = arith.negf %587 : vector<1x128xf32>
    %589 = math.exp %588 : vector<1x128xf32>
    %cst_230 = arith.constant 1.000000e+00 : f32
    %590 = vector.broadcast %cst_230 : f32 to vector<1x128xf32>
    %591 = arith.addf %590, %589 : vector<1x128xf32>
    %592 = arith.divf %590, %591 : vector<1x128xf32>
    %c0_231 = arith.constant 0 : index
    %c7 = arith.constant 7 : index
    %c0_232 = arith.constant 0 : index
    %593 = vector.load %arg17[%c0_231, %c7, %c0_232] : memref<1x8x128xf32, #tpu.memory_space<vmem>>, vector<1x1x128xf32>
    %594 = vector.shape_cast %593 : vector<1x1x128xf32> to vector<1x128xf32>
    %595 = vector.shape_cast %592 : vector<1x128xf32> to vector<1x1x128xf32>
    tpu.vector_store %arg17[%c0_231, %c7, %c0_232], %595 {strides = array<i32>} : memref<1x8x128xf32, #tpu.memory_space<vmem>>, vector<1x1x128xf32>,
    return
  }
  func.func @transform_0(%arg0: i32) -> (i32, i32, i32) {
    %c0_i32 = arith.constant 0 : i32
    %c0_i32_0 = arith.constant 0 : i32
    %c0_i32_1 = arith.constant 0 : i32
    return %arg0, %c0_i32, %c0_i32_0 : i32, i32, i32
  }
  func.func @transform_1(%arg0: i32) -> (i32, i32) {
    %c0_i32 = arith.constant 0 : i32
    %c0_i32_0 = arith.constant 0 : i32
    %c0_i32_1 = arith.constant 0 : i32
    return %c0_i32, %c0_i32_0 : i32, i32
  }
  func.func @transform_2(%arg0: i32) -> (i32, i32) {
    %c0_i32 = arith.constant 0 : i32
    %c0_i32_0 = arith.constant 0 : i32
    %c0_i32_1 = arith.constant 0 : i32
    return %c0_i32, %c0_i32_0 : i32, i32
  }
  func.func @transform_3(%arg0: i32) -> (i32, i32, i32) {
    %c0_i32 = arith.constant 0 : i32
    %c0_i32_0 = arith.constant 0 : i32
    %c0_i32_1 = arith.constant 0 : i32
    %c0_i32_2 = arith.constant 0 : i32
    return %c0_i32, %c0_i32_0, %c0_i32_1 : i32, i32, i32
  }
  func.func @transform_4(%arg0: i32) -> (i32, i32, i32) {
    %c0_i32 = arith.constant 0 : i32
    %c0_i32_0 = arith.constant 0 : i32
    %c0_i32_1 = arith.constant 0 : i32
    %c0_i32_2 = arith.constant 0 : i32
    return %c0_i32, %c0_i32_0, %c0_i32_1 : i32, i32, i32
  }
  func.func @transform_5(%arg0: i32) -> (i32, i32, i32) {
    %c0_i32 = arith.constant 0 : i32
    %c0_i32_0 = arith.constant 0 : i32
    %c0_i32_1 = arith.constant 0 : i32
    %c0_i32_2 = arith.constant 0 : i32
    return %c0_i32, %c0_i32_0, %c0_i32_1 : i32, i32, i32
  }
  func.func @transform_6(%arg0: i32) -> (i32, i32, i32) {
    %c0_i32 = arith.constant 0 : i32
    %c0_i32_0 = arith.constant 0 : i32
    %c0_i32_1 = arith.constant 0 : i32
    %c0_i32_2 = arith.constant 0 : i32
    return %c0_i32, %c0_i32_0, %c0_i32_1 : i32, i32, i32
  }
  func.func @transform_7(%arg0: i32) -> (i32, i32, i32) {
    %c0_i32 = arith.constant 0 : i32
    %c0_i32_0 = arith.constant 0 : i32
    %c0_i32_1 = arith.constant 0 : i32
    %c0_i32_2 = arith.constant 0 : i32
    return %c0_i32, %c0_i32_0, %c0_i32_1 : i32, i32, i32
  }
  func.func @transform_8(%arg0: i32) -> (i32, i32, i32) {
    %c0_i32 = arith.constant 0 : i32
    %c0_i32_0 = arith.constant 0 : i32
    %c0_i32_1 = arith.constant 0 : i32
    %c0_i32_2 = arith.constant 0 : i32
    return %c0_i32, %c0_i32_0, %c0_i32_1 : i32, i32, i32
  }
  func.func @transform_9(%arg0: i32) -> (i32, i32, i32) {
    %c0_i32 = arith.constant 0 : i32
    %c0_i32_0 = arith.constant 0 : i32
    %c0_i32_1 = arith.constant 0 : i32
    %c0_i32_2 = arith.constant 0 : i32
    return %c0_i32, %c0_i32_0, %c0_i32_1 : i32, i32, i32
  }
  func.func @transform_10(%arg0: i32) -> (i32, i32, i32) {
    %c0_i32 = arith.constant 0 : i32
    %c0_i32_0 = arith.constant 0 : i32
    %c0_i32_1 = arith.constant 0 : i32
    %c0_i32_2 = arith.constant 0 : i32
    return %c0_i32, %c0_i32_0, %c0_i32_1 : i32, i32, i32
  }
  func.func @transform_11(%arg0: i32) -> (i32, i32) {
    %c0_i32 = arith.constant 0 : i32
    %c0_i32_0 = arith.constant 0 : i32
    %c0_i32_1 = arith.constant 0 : i32
    return %c0_i32, %c0_i32_0 : i32, i32
  }
  func.func @transform_12(%arg0: i32) -> (i32, i32) {
    %c0_i32 = arith.constant 0 : i32
    %c0_i32_0 = arith.constant 0 : i32
    %c0_i32_1 = arith.constant 0 : i32
    return %c0_i32, %c0_i32_0 : i32, i32
  }
  func.func @transform_13(%arg0: i32) -> (i32, i32) {
    %c0_i32 = arith.constant 0 : i32
    %c0_i32_0 = arith.constant 0 : i32
    %c0_i32_1 = arith.constant 0 : i32
    return %c0_i32, %c0_i32_0 : i32, i32
  }
  func.func @transform_14(%arg0: i32) -> (i32, i32) {
    %c0_i32 = arith.constant 0 : i32
    %c0_i32_0 = arith.constant 0 : i32
    %c0_i32_1 = arith.constant 0 : i32
    return %c0_i32, %c0_i32_0 : i32, i32
  }
  func.func @transform_15(%arg0: i32) -> (i32, i32) {
    %c0_i32 = arith.constant 0 : i32
    %c0_i32_0 = arith.constant 0 : i32
    %c0_i32_1 = arith.constant 0 : i32
    return %c0_i32, %c0_i32_0 : i32, i32
  }
  func.func @transform_16(%arg0: i32) -> (i32, i32, i32) {
    %c0_i32 = arith.constant 0 : i32
    %c0_i32_0 = arith.constant 0 : i32
    %c0_i32_1 = arith.constant 0 : i32
    return %arg0, %c0_i32, %c0_i32_0 : i32, i32, i32
  }
}

</mosaic_0001>

<bundles_post_ra>
// kernel: mlp_mixer_forward.1
= control target key start
LH: loop header
LB: loop body
LE: loop exit
PB: predicated region body
PF: predicated region fallthrough
CT: control target
= control target key end

     0   :  { %s5494_s0 = inlined_call_operand.vmem [shape: f32[1,16,512], index: 0, kind: input, shape index: {}]   ;;  %s5495_s1 = inlined_call_operand.vmem [shape: f32[512,256], index: 1, kind: input, shape index: {}]   ;;  %s5496_s2 = inlined_call_operand.vmem [shape: f32[1,256], index: 2, kind: input, shape index: {}]   ;;  %s5497_s3 = inlined_call_operand.vmem [shape: f32[2,16,16], index: 3, kind: input, shape index: {}]   ;;  %s5498_s4 = inlined_call_operand.vmem [shape: f32[2,16,1], index: 4, kind: input, shape index: {}]   ;;  %s5499_s5 = inlined_call_operand.vmem [shape: f32[2,16,16], index: 5, kind: input, shape index: {}]   ;;  %s5500_s6 = inlined_call_operand.vmem [shape: f32[2,16,1], index: 6, kind: input, shape index: {}]   ;;  %s5501_s7 = inlined_call_operand.hbm [shape: f32[2,256,256], index: 7, kind: input, shape index: {}]   ;;  %s5502_s8 = inlined_call_operand.vmem [shape: f32[2,1,256], index: 8, kind: input, shape index: {}]   ;;  %s5503_s9 = inlined_call_operand.hbm [shape: f32[2,256,256], index: 9, kind: input, shape index: {}]   ;;  %s5504_s10 = inlined_call_operand.vmem [shape: f32[2,1,256], index: 10, kind: input, shape index: {}]   ;;  %s5505_s11 = inlined_call_operand.hbm [shape: f32[256,256], index: 11, kind: input, shape index: {}]   ;;  %s5506_s12 = inlined_call_operand.vmem [shape: f32[16,32], index: 12, kind: input, shape index: {}]   ;;  %s5507_s13 = inlined_call_operand.vmem [shape: f32[16,32], index: 13, kind: input, shape index: {}]   ;;  %s5508_s14 = inlined_call_operand.vmem [shape: f32[16,128], index: 14, kind: input, shape index: {}]   ;;  %s5509_s15 = inlined_call_operand.vmem [shape: f32[1,128], index: 15, kind: input, shape index: {}]   ;;  %s5510_s16 = inlined_call_operand.hbm [shape: f32[1,8,128], index: 16, kind: output, shape index: {}]  }
   0x1   :  { %5512 = sst [smem:[#allocation12_spill]] %s5494_s0 }
   0x2   :  { %21 = vsyncpa [#allocation3], 0 }
   0x3   :  { %22 = vsyncpa [#allocation6], 0 }
   0x4   :  { %23 = vsyncpa [#allocation4], 0  ;;  %s57_s23 = sshll.u32 %s5503_s9, 4  ;;  %s3940_s24 = smov [#allocation5]   ;;  %s58_s23 = int_to_ptr.hbm [resolvable:$true] %s57_s23 }
   0x5   :  { %s59_s25 = sshll.u32 %s3940_s24, 4  ;;  %s42_s28 = sshll.u32 %s5501_s7, 4  ;;  %s60_s25 = int_to_ptr.vmem [resolvable:$true] %s59_s25  ;;  %s43_s28 = int_to_ptr.hbm [resolvable:$true] %s42_s28 }
   0x6   :  { %s3941_s29 = smov 256   ;;  %s3942_s30 = smov 16  }
   0x7   :  { %65 = dma.hbm_to_vmem [thread:$0]  %s58_s23, 16384, %s60_s25, [#allocation6], %s3941_s29, %s3941_s29, %s3942_s30  }
   0x8   :  { %s3943_s0 = smov [#allocation2]   ;;  %s72_s20 = sshll.u32 %s5505_s11, 4  ;;  %s73_s20 = int_to_ptr.hbm [resolvable:$true] %s72_s20 }
   0x9   :  { %s44_s17 = sshll.u32 %s3943_s0, 4  ;;  %s3944_s9 = smov [#allocation7]   ;;  %s45_s17 = int_to_ptr.vmem [resolvable:$true] %s44_s17 }
   0xa   :  { %50 = dma.hbm_to_vmem [thread:$0]  %s43_s28, 16384, %s45_s17, [#allocation3], %s3941_s29, %s3941_s29, %s3942_s30  }
   0xb   :  { %s74_s21 = sshll.u32 %s3944_s9, 4  ;;  %s75_s21 = int_to_ptr.vmem [resolvable:$true] %s74_s21 }
   0xc   :  { %80 = dma.hbm_to_vmem [thread:$0]  %s73_s20, 8192, %s75_s21, [#allocation6], %s3941_s29, %s3941_s29, %s3942_s30  }
   0xd   :  { %3934 = dma.done.wait [#allocation3], 16384  }
   0xe   :  { %3935 = vsyncadd [#allocation3], 4294950912 }
   0xf   :  { %3936 = dma.done.wait [#allocation6], 24576  }
  0x10   :  { %3937 = vsyncadd [#allocation6], 4294942720  ;;  %v203_v0 = vld [vmem:[%s5495_s1 + $0x2f0] sm:$0xff]  ;;  %v201_v2 = vld [vmem:[%s5495_s1 + $0x2e0] sm:$0xff]  ;;  %s5513_s7 = sld [smem:[#allocation12_spill]]  ;;  %vm582_vm4 = vcmask 130048  }
  0x11   :  { %v139_v1 = vld [vmem:[%s5495_s1 + $0xf0] sm:$0xff]  ;;  %289 = vmatpush.msra.mxu2 %v203_v0  ;;  %v137_v4 = vld [vmem:[%s5495_s1 + $0xe0] sm:$0xff]  ;;  %v204_v0 = vld [vmem:[%s5495_s1 + $0x2f8] sm:$0xff]  ;;  %s3947_s24 = smov 96   ;;  %s3950_s11 = smov 32  }
  0x12   :  { %243 = vmatpush.msra.mxu0 %v139_v1  ;;  %v235_v3 = vld [vmem:[%s5495_s1 + $0x3f0] sm:$0xff]  ;;  %v233_v7 = vld [vmem:[%s5495_s1 + $0x3e0] sm:$0xff] }
  0x13   :  { %v171_v5 = vld [vmem:[%s5495_s1 + $0x1f0] sm:$0xff]  ;;  %312 = vmatpush.msra.mxu3 %v235_v3  ;;  %290 = vmatpush.msra.mxu2 %v201_v2  ;;  %v169_v9 = vld [vmem:[%s5495_s1 + $0x1e0] sm:$0xff]  ;;  %v140_v3 = vld [vmem:[%s5495_s1 + $0xf8] sm:$0xff] }
  0x14   :  { %266 = vmatpush.msra.mxu1 %v171_v5  ;;  %v199_v6 = vld [vmem:[%s5495_s1 + $0x2d0] sm:$0xff]  ;;  %244 = vmatpush.msra.mxu0 %v137_v4  ;;  %v197_v11 = vld [vmem:[%s5495_s1 + $0x2c0] sm:$0xff]  ;;  %v202_v4 = vld [vmem:[%s5495_s1 + $0x2e8] sm:$0xff] }
  0x15   :  { %v135_v8 = vld [vmem:[%s5495_s1 + $0xd0] sm:$0xff]  ;;  %313 = vmatpush.msra.mxu3 %v233_v7  ;;  %v133_v12 = vld [vmem:[%s5495_s1 + $0xc0] sm:$0xff]  ;;  %291 = vmatpush.msra.mxu2 %v199_v6  ;;  %v236_v5 = vld [vmem:[%s5495_s1 + $0x3f8] sm:$0xff] }
  0x16   :  { %v231_v10 = vld [vmem:[%s5495_s1 + $0x3d0] sm:$0xff]  ;;  %267 = vmatpush.msra.mxu1 %v169_v9  ;;  %245 = vmatpush.msra.mxu0 %v135_v8  ;;  %v229_v14 = vld [vmem:[%s5495_s1 + $0x3c0] sm:$0xff]  ;;  %v4252_v2 = vld [vmem:[%s5513_s7 + $0x18] sm:$0xff] }
  0x17   :  { %v167_v13 = vld [vmem:[%s5495_s1 + $0x1d0] sm:$0xff]  ;;  %v165_v15 = vld [vmem:[%s5495_s1 + $0x1c0] sm:$0xff]  ;;  %314 = vmatpush.msra.mxu3 %v231_v10  ;;  %292 = vmatpush.msra.mxu2 %v197_v11  ;;  %v138_v7 = vld [vmem:[%s5495_s1 + $0xe8] sm:$0xff] }
  0x18   :  { %268 = vmatpush.msra.mxu1 %v167_v13  ;;  %v195_v16 = vld [vmem:[%s5495_s1 + $0x2b0] sm:$0xff]  ;;  %246 = vmatpush.msra.mxu0 %v133_v12  ;;  %v193_v20 = vld [vmem:[%s5495_s1 + $0x2a0] sm:$0xff]  ;;  %v4275_v8 = vld [vmem:[%s5513_s7 + $0x8] sm:$0xff] }
  0x19   :  { %v131_v17 = vld [vmem:[%s5495_s1 + $0xb0] sm:$0xff]  ;;  %315 = vmatpush.msra.mxu3 %v229_v14  ;;  %v129_v21 = vld [vmem:[%s5495_s1 + $0xa0] sm:$0xff]  ;;  %293 = vmatpush.msra.mxu2 %v195_v16  ;;  %v200_v9 = vld [vmem:[%s5495_s1 + $0x2d8] sm:$0xff] }
  0x1a   :  { %v227_v18 = vld [vmem:[%s5495_s1 + $0x3b0] sm:$0xff]  ;;  %269 = vmatpush.msra.mxu1 %v165_v15  ;;  %247 = vmatpush.msra.mxu0 %v131_v17  ;;  %v225_v22 = vld [vmem:[%s5495_s1 + $0x3a0] sm:$0xff]  ;;  %v172_v10 = vld [vmem:[%s5495_s1 + $0x1f8] sm:$0xff] }
  0x1b   :  { %v163_v19 = vld [vmem:[%s5495_s1 + $0x1b0] sm:$0xff]  ;;  %v161_v23 = vld [vmem:[%s5495_s1 + $0x1a0] sm:$0xff]  ;;  %316 = vmatpush.msra.mxu3 %v227_v18  ;;  %294 = vmatpush.msra.mxu2 %v193_v20  ;;  %v234_v11 = vld [vmem:[%s5495_s1 + $0x3e8] sm:$0xff] }
  0x1c   :  { %270 = vmatpush.msra.mxu1 %v163_v19  ;;  %v191_v24 = vld [vmem:[%s5495_s1 + $0x290] sm:$0xff]  ;;  %248 = vmatpush.msra.mxu0 %v129_v21  ;;  %v189_v28 = vld [vmem:[%s5495_s1 + $0x280] sm:$0xff]  ;;  %v136_v12 = vld [vmem:[%s5495_s1 + $0xd8] sm:$0xff] }
  0x1d   :  { %v127_v25 = vld [vmem:[%s5495_s1 + $0x90] sm:$0xff]  ;;  %317 = vmatpush.msra.mxu3 %v225_v22  ;;  %v125_v29 = vld [vmem:[%s5495_s1 + $0x80] sm:$0xff]  ;;  %295 = vmatpush.msra.mxu2 %v191_v24  ;;  %v198_v13 = vld [vmem:[%s5495_s1 + $0x2c8] sm:$0xff] }
  0x1e   :  { %v223_v26 = vld [vmem:[%s5495_s1 + $0x390] sm:$0xff]  ;;  %271 = vmatpush.msra.mxu1 %v161_v23  ;;  %249 = vmatpush.msra.mxu0 %v127_v25  ;;  %v221_v30 = vld [vmem:[%s5495_s1 + $0x380] sm:$0xff]  ;;  %v170_v14 = vld [vmem:[%s5495_s1 + $0x1e8] sm:$0xff] }
  0x1f   :  { %v159_v27 = vld [vmem:[%s5495_s1 + $0x190] sm:$0xff]  ;;  %v157_v31 = vld [vmem:[%s5495_s1 + $0x180] sm:$0xff]  ;;  %318 = vmatpush.msra.mxu3 %v223_v26  ;;  %296 = vmatpush.msra.mxu2 %v189_v28  ;;  %v232_v15 = vld [vmem:[%s5495_s1 + $0x3d8] sm:$0xff] }
  0x20   :  { %272 = vmatpush.msra.mxu1 %v159_v27  ;;  %v187_v32 = vld [vmem:[%s5495_s1 + $0x270] sm:$0xff]  ;;  %250 = vmatpush.msra.mxu0 %v125_v29  ;;  %v185_v36 = vld [vmem:[%s5495_s1 + $0x260] sm:$0xff]  ;;  %v134_v17 = vld [vmem:[%s5495_s1 + $0xc8] sm:$0xff] }
  0x21   :  { %v123_v33 = vld [vmem:[%s5495_s1 + $0x70] sm:$0xff]  ;;  %319 = vmatpush.msra.mxu3 %v221_v30  ;;  %v121_v37 = vld [vmem:[%s5495_s1 + $0x60] sm:$0xff]  ;;  %297 = vmatpush.msra.mxu2 %v187_v32  ;;  %v168_v18 = vld [vmem:[%s5495_s1 + $0x1d8] sm:$0xff] }
  0x22   :  { %v219_v34 = vld [vmem:[%s5495_s1 + $0x370] sm:$0xff]  ;;  %273 = vmatpush.msra.mxu1 %v157_v31  ;;  %251 = vmatpush.msra.mxu0 %v123_v33  ;;  %v217_v38 = vld [vmem:[%s5495_s1 + $0x360] sm:$0xff]  ;;  %v196_v19 = vld [vmem:[%s5495_s1 + $0x2b8] sm:$0xff] }
  0x23   :  { %v155_v35 = vld [vmem:[%s5495_s1 + $0x170] sm:$0xff]  ;;  %v153_v39 = vld [vmem:[%s5495_s1 + $0x160] sm:$0xff]  ;;  %320 = vmatpush.msra.mxu3 %v219_v34  ;;  %298 = vmatpush.msra.mxu2 %v185_v36  ;;  %v230_v20 = vld [vmem:[%s5495_s1 + $0x3c8] sm:$0xff] }
  0x24   :  { %274 = vmatpush.msra.mxu1 %v155_v35  ;;  %v183_v40 = vld [vmem:[%s5495_s1 + $0x250] sm:$0xff]  ;;  %252 = vmatpush.msra.mxu0 %v121_v37  ;;  %v181_v44 = vld [vmem:[%s5495_s1 + $0x240] sm:$0xff]  ;;  %v4325_v22 = vld [vmem:[%s5513_s7 + $0x38] sm:$0xff] }
  0x25   :  { %v119_v41 = vld [vmem:[%s5495_s1 + $0x50] sm:$0xff]  ;;  %321 = vmatpush.msra.mxu3 %v217_v38  ;;  %v117_v45 = vld [vmem:[%s5495_s1 + $0x40] sm:$0xff]  ;;  %299 = vmatpush.msra.mxu2 %v183_v40  ;;  %v132_v23 = vld [vmem:[%s5495_s1 + $0xb8] sm:$0xff] }
  0x26   :  { %v215_v42 = vld [vmem:[%s5495_s1 + $0x350] sm:$0xff]  ;;  %275 = vmatpush.msra.mxu1 %v153_v39  ;;  %253 = vmatpush.msra.mxu0 %v119_v41  ;;  %v213_v46 = vld [vmem:[%s5495_s1 + $0x340] sm:$0xff]  ;;  %v166_v24 = vld [vmem:[%s5495_s1 + $0x1c8] sm:$0xff] }
  0x27   :  { %v151_v43 = vld [vmem:[%s5495_s1 + $0x150] sm:$0xff]  ;;  %v149_v47 = vld [vmem:[%s5495_s1 + $0x140] sm:$0xff]  ;;  %322 = vmatpush.msra.mxu3 %v215_v42  ;;  %300 = vmatpush.msra.mxu2 %v181_v44  ;;  %v194_v25 = vld [vmem:[%s5495_s1 + $0x2a8] sm:$0xff] }
  0x28   :  { %276 = vmatpush.msra.mxu1 %v151_v43  ;;  %v179_v48 = vld [vmem:[%s5495_s1 + $0x230] sm:$0xff]  ;;  %254 = vmatpush.msra.mxu0 %v117_v45  ;;  %v177_v52 = vld [vmem:[%s5495_s1 + $0x220] sm:$0xff]  ;;  %v228_v26 = vld [vmem:[%s5495_s1 + $0x3b8] sm:$0xff] }
  0x29   :  { %v115_v49 = vld [vmem:[%s5495_s1 + $0x30] sm:$0xff]  ;;  %323 = vmatpush.msra.mxu3 %v213_v46  ;;  %v113_v53 = vld [vmem:[%s5495_s1 + $0x20] sm:$0xff]  ;;  %301 = vmatpush.msra.mxu2 %v179_v48  ;;  %v4343_v27 = vld [vmem:[%s5513_s7 + $0x28] sm:$0xff] }
  0x2a   :  { %v211_v50 = vld [vmem:[%s5495_s1 + $0x330] sm:$0xff]  ;;  %277 = vmatpush.msra.mxu1 %v149_v47  ;;  %255 = vmatpush.msra.mxu0 %v115_v49  ;;  %v209_v54 = vld [vmem:[%s5495_s1 + $0x320] sm:$0xff]  ;;  %v130_v28 = vld [vmem:[%s5495_s1 + $0xa8] sm:$0xff] }
  0x2b   :  { %v147_v51 = vld [vmem:[%s5495_s1 + $0x130] sm:$0xff]  ;;  %v145_v55 = vld [vmem:[%s5495_s1 + $0x120] sm:$0xff]  ;;  %324 = vmatpush.msra.mxu3 %v211_v50  ;;  %302 = vmatpush.msra.mxu2 %v177_v52  ;;  %v164_v29 = vld [vmem:[%s5495_s1 + $0x1b8] sm:$0xff] }
  0x2c   :  { %278 = vmatpush.msra.mxu1 %v147_v51  ;;  %v175_v56 = vld [vmem:[%s5495_s1 + $0x210] sm:$0xff]  ;;  %256 = vmatpush.msra.mxu0 %v113_v53  ;;  %v173_v60 = vld [vmem:[%s5495_s1 + $0x200] sm:$0xff]  ;;  %v192_v30 = vld [vmem:[%s5495_s1 + $0x298] sm:$0xff] }
  0x2d   :  { %v111_v57 = vld [vmem:[%s5495_s1 + $0x10] sm:$0xff]  ;;  %325 = vmatpush.msra.mxu3 %v209_v54  ;;  %v109_v61 = vld [vmem:[%s5495_s1] sm:$0xff]  ;;  %303 = vmatpush.msra.mxu2 %v175_v56  ;;  %v226_v31 = vld [vmem:[%s5495_s1 + $0x3a8] sm:$0xff] }
  0x2e   :  { %v207_v58 = vld [vmem:[%s5495_s1 + $0x310] sm:$0xff]  ;;  %279 = vmatpush.msra.mxu1 %v145_v55  ;;  %257 = vmatpush.msra.mxu0 %v111_v57  ;;  %v205_v63 = vld [vmem:[%s5495_s1 + $0x300] sm:$0xff]  ;;  %v128_v32 = vld [vmem:[%s5495_s1 + $0x98] sm:$0xff] }
  0x2f   :  { %v143_v59 = vld [vmem:[%s5495_s1 + $0x110] sm:$0xff]  ;;  %326 = vmatpush.msra.mxu3 %v207_v58  ;;  %v4247_v1 = vld [vmem:[%s5513_s7] sm:$0xff]  ;;  %304 = vmatpush.msra.mxu2 %v173_v60  ;;  %v162_v33 = vld [vmem:[%s5495_s1 + $0x1a8] sm:$0xff] }
  0x30   :  { %v4236_v62 = vld [vmem:[%s5513_s7 + $0x10] sm:$0xff]  ;;  %280 = vmatpush.msra.mxu1 %v143_v59  ;;  %258 = vmatpush.msra.mxu0 %v109_v61  ;;  %v141_v6 = vld [vmem:[%s5495_s1 + $0x100] sm:$0xff]  ;;  %v190_v34 = vld [vmem:[%s5495_s1 + $0x288] sm:$0xff] }
  0x31   :  { %305 = vmatmul.f32.vlgmr.msra.gmra.mxu2 %v4236_v62  ;;  %327 = vmatpush.msra.mxu3 %v205_v63  ;;  %v4302_v16 = vld [vmem:[%s5513_s7 + $0x30] sm:$0xff]  ;;  %v4319_v21 = vld [vmem:[%s5513_s7 + $0x20] sm:$0xff]  ;;  %v224_v35 = vld [vmem:[%s5495_s1 + $0x398] sm:$0xff] }
  0x32   :  { %381 = vmatpush.msrb.mxu2 %v204_v0  ;;  %259 = vmatmul.f32.vlgmr.msra.gmra.mxu0 %v4247_v1  ;;  %v126_v36 = vld [vmem:[%s5495_s1 + $0x88] sm:$0xff]  ;;  %v160_v37 = vld [vmem:[%s5495_s1 + $0x198] sm:$0xff] }
  0x33   :  { %328 = vmatmul.f32.vlgmr.msra.gmra.mxu3 %v4252_v2  ;;  %335 = vmatpush.msrb.mxu0 %v140_v3  ;;  %v188_v38 = vld [vmem:[%s5495_s1 + $0x278] sm:$0xff]  ;;  %v222_v39 = vld [vmem:[%s5495_s1 + $0x388] sm:$0xff] }
  0x34   :  { %382 = vmatpush.msrb.mxu2 %v202_v4  ;;  %404 = vmatpush.msrb.mxu3 %v236_v5  ;;  %v124_v40 = vld [vmem:[%s5495_s1 + $0x78] sm:$0xff]  ;;  %v158_v41 = vld [vmem:[%s5495_s1 + $0x188] sm:$0xff] }
  0x35   :  { %281 = vmatpush.msra.mxu1 %v141_v6  ;;  %336 = vmatpush.msrb.mxu0 %v138_v7  ;;  %v186_v42 = vld [vmem:[%s5495_s1 + $0x268] sm:$0xff]  ;;  %v220_v43 = vld [vmem:[%s5495_s1 + $0x378] sm:$0xff] }
  0x36   :  { %282 = vmatmul.f32.vlgmr.msra.gmra.mxu1 %v4275_v8  ;;  %383 = vmatpush.msrb.mxu2 %v200_v9  ;;  %v122_v44 = vld [vmem:[%s5495_s1 + $0x68] sm:$0xff]  ;;  %v156_v45 = vld [vmem:[%s5495_s1 + $0x178] sm:$0xff] }
  0x37   :  { %358 = vmatpush.msrb.mxu1 %v172_v10  ;;  %405 = vmatpush.msrb.mxu3 %v234_v11  ;;  %v184_v46 = vld [vmem:[%s5495_s1 + $0x258] sm:$0xff]  ;;  %v218_v47 = vld [vmem:[%s5495_s1 + $0x368] sm:$0xff] }
  0x38   :  { %337 = vmatpush.msrb.mxu0 %v136_v12  ;;  %384 = vmatpush.msrb.mxu2 %v198_v13  ;;  %v120_v48 = vld [vmem:[%s5495_s1 + $0x58] sm:$0xff]  ;;  %v154_v49 = vld [vmem:[%s5495_s1 + $0x168] sm:$0xff] }
  0x39   :  { %359 = vmatpush.msrb.mxu1 %v170_v14  ;;  %406 = vmatpush.msrb.mxu3 %v232_v15  ;;  %v182_v50 = vld [vmem:[%s5495_s1 + $0x248] sm:$0xff]  ;;  %v216_v51 = vld [vmem:[%s5495_s1 + $0x358] sm:$0xff]  ;;  %v3945_v15 = vmov 16.0  }
  0x3a   :  { %308 = vmatmul.f32.gmra.mxu2 %v4302_v16  ;;  %338 = vmatpush.msrb.mxu0 %v134_v17  ;;  %v118_v52 = vld [vmem:[%s5495_s1 + $0x48] sm:$0xff]  ;;  %v152_v53 = vld [vmem:[%s5495_s1 + $0x158] sm:$0xff]  ;;  %3632 = vrcp.f32 %v3945_v15 }
  0x3b   :  { %360 = vmatpush.msrb.mxu1 %v168_v18  ;;  %385 = vmatpush.msrb.mxu2 %v196_v19  ;;  %v180_v54 = vld [vmem:[%s5495_s1 + $0x238] sm:$0xff]  ;;  %v214_v55 = vld [vmem:[%s5495_s1 + $0x348] sm:$0xff] }
  0x3c   :  { %407 = vmatpush.msrb.mxu3 %v230_v20  ;;  %262 = vmatmul.f32.gmra.mxu0 %v4319_v21  ;;  %v116_v56 = vld [vmem:[%s5495_s1 + $0x38] sm:$0xff]  ;;  %v150_v57 = vld [vmem:[%s5495_s1 + $0x148] sm:$0xff] }
  0x3d   :  { %331 = vmatmul.f32.gmra.mxu3 %v4325_v22  ;;  %339 = vmatpush.msrb.mxu0 %v132_v23  ;;  %v178_v58 = vld [vmem:[%s5495_s1 + $0x228] sm:$0xff]  ;;  %v212_v59 = vld [vmem:[%s5495_s1 + $0x338] sm:$0xff] }
  0x3e   :  { %361 = vmatpush.msrb.mxu1 %v166_v24  ;;  %386 = vmatpush.msrb.mxu2 %v194_v25  ;;  %v114_v60 = vld [vmem:[%s5495_s1 + $0x28] sm:$0xff]  ;;  %v148_v61 = vld [vmem:[%s5495_s1 + $0x138] sm:$0xff] }
  0x3f   :  { %408 = vmatpush.msrb.mxu3 %v228_v26  ;;  %285 = vmatmul.f32.gmra.mxu1 %v4343_v27  ;;  %v176_v63 = vld [vmem:[%s5495_s1 + $0x218] sm:$0xff]  ;;  %v210_v0 = vld [vmem:[%s5495_s1 + $0x328] sm:$0xff] }
  0x40   :  { %340 = vmatpush.msrb.mxu0 %v130_v28  ;;  %362 = vmatpush.msrb.mxu1 %v164_v29  ;;  %v112_v3 = vld [vmem:[%s5495_s1 + $0x18] sm:$0xff]  ;;  %v146_v4 = vld [vmem:[%s5495_s1 + $0x128] sm:$0xff]  ;;  %v3633_v20 = vpop.eup %3632 }
  0x41   :  { %387 = vmatpush.msrb.mxu2 %v192_v30  ;;  %409 = vmatpush.msrb.mxu3 %v226_v31  ;;  %v174_v5 = vld [vmem:[%s5495_s1 + $0x208] sm:$0xff]  ;;  %v208_v6 = vld [vmem:[%s5495_s1 + $0x318] sm:$0xff]  ;;  %v506_v25 = vmul.f32 16.0, %v3633_v20  ;;  %vm510_vm0 = vweird.f32 %v3633_v20 }
  0x42   :  { %341 = vmatpush.msrb.mxu0 %v128_v32  ;;  %363 = vmatpush.msrb.mxu1 %v162_v33  ;;  %v110_v7 = vld [vmem:[%s5495_s1 + $0x8] sm:$0xff]  ;;  %v144_v9 = vld [vmem:[%s5495_s1 + $0x118] sm:$0xff] }
  0x43   :  { %388 = vmatpush.msrb.mxu2 %v190_v34  ;;  %410 = vmatpush.msrb.mxu3 %v224_v35  ;;  %v206_v10 = vld [vmem:[%s5495_s1 + $0x308] sm:$0xff]  ;;  %v507_v30 = vsub.f32 1.0, %v506_v25 }
  0x44   :  { %342 = vmatpush.msrb.mxu0 %v126_v36  ;;  %364 = vmatpush.msrb.mxu1 %v160_v37  ;;  %v142_v11 = vld [vmem:[%s5495_s1 + $0x108] sm:$0xff] }
  0x45   :  { %389 = vmatpush.msrb.mxu2 %v188_v38  ;;  %411 = vmatpush.msrb.mxu3 %v222_v39  ;;  %v508_v35 = vmul.f32 %v3633_v20, %v507_v30 }
  0x46   :  { %343 = vmatpush.msrb.mxu0 %v124_v40  ;;  %365 = vmatpush.msrb.mxu1 %v158_v41 }
  0x47   :  { %390 = vmatpush.msrb.mxu2 %v186_v42  ;;  %412 = vmatpush.msrb.mxu3 %v220_v43  ;;  %v509_v40 = vadd.f32 %v3633_v20, %v508_v35 }
  0x48   :  { %344 = vmatpush.msrb.mxu0 %v122_v44  ;;  %366 = vmatpush.msrb.mxu1 %v156_v45 }
  0x49   :  { %391 = vmatpush.msrb.mxu2 %v184_v46  ;;  %413 = vmatpush.msrb.mxu3 %v218_v47  ;;  %v4503_v45 = vsel %vm510_vm0, %v3633_v20, %v509_v40 }
  0x4a   :  { %345 = vmatpush.msrb.mxu0 %v120_v48  ;;  %367 = vmatpush.msrb.mxu1 %v154_v49 }
  0x4b   :  { %392 = vmatpush.msrb.mxu2 %v182_v50  ;;  %414 = vmatpush.msrb.mxu3 %v216_v51 }
  0x4c   :  { %346 = vmatpush.msrb.mxu0 %v118_v52  ;;  %368 = vmatpush.msrb.mxu1 %v152_v53 }
  0x4d   :  { %393 = vmatpush.msrb.mxu2 %v180_v54  ;;  %415 = vmatpush.msrb.mxu3 %v214_v55  ;;  %v571_v55 = vld [vmem:[%s5498_s4 + $0x8] sm:$0xff] }
  0x4e   :  { %347 = vmatpush.msrb.mxu0 %v116_v56  ;;  %369 = vmatpush.msrb.mxu1 %v150_v57 }
  0x4f   :  { %394 = vmatpush.msrb.mxu2 %v178_v58  ;;  %416 = vmatpush.msrb.mxu3 %v212_v59  ;;  %v3946_v58 = vmov 0  }
  0x50   :  { %348 = vmatpush.msrb.mxu0 %v114_v60  ;;  %370 = vmatpush.msrb.mxu1 %v148_v61 }
  0x51   :  { %395 = vmatpush.msrb.mxu2 %v176_v63  ;;  %417 = vmatpush.msrb.mxu3 %v210_v0 }
  0x52   :  { %349 = vmatpush.msrb.mxu0 %v112_v3  ;;  %371 = vmatpush.msrb.mxu1 %v146_v4  ;;  %v570_v3 = vld [vmem:[%s5498_s4] sm:$0xff] }
  0x53   :  { %396 = vmatpush.msrb.mxu2 %v174_v5  ;;  %418 = vmatpush.msrb.mxu3 %v208_v6 }
  0x54   :  { %397 = vmatmul.f32.vlgmr.msrb.gmra.mxu2 %v4236_v62  ;;  %350 = vmatpush.msrb.mxu0 %v110_v7  ;;  %v4490_v62 = vld [vmem:[%s5496_s2] sm:$0x3] }
  0x55   :  { %372 = vmatpush.msrb.mxu1 %v144_v9  ;;  %419 = vmatpush.msrb.mxu3 %v206_v10  ;;  %v240_v48 = vperm.slane %v4490_v62, 1 }
  0x56   :  { %351 = vmatmul.f32.vlgmr.msrb.gmra.mxu0 %v4247_v1  ;;  %420 = vmatmul.f32.vlgmr.msrb.gmra.mxu3 %v4252_v2  ;;  %v239_v1 = vperm.slane %v4490_v62, 0 }
  0x57   :  { %373 = vmatpush.msrb.mxu1 %v142_v11  ;;  %3629 = vset.pattern.permute.xlu0 %v3946_v58 }
  0x58   :  { %374 = vmatmul.f32.vlgmr.msrb.gmra.mxu1 %v4275_v8  ;;  %3630 = vset.pattern.permute.xlu1 %v3946_v58 }
  0x59   :  { %579 = vperm.xlu0 %3629, %v571_v55   ;;  %3631 = vset.pattern.permute.xlu2 %v3946_v58 }
  0x5c   :  { %400 = vmatmul.f32.gmra.mxu2 %v4302_v16 }
  0x5e   :  { %354 = vmatmul.f32.gmra.mxu0 %v4319_v21  ;;  %423 = vmatmul.f32.gmra.mxu3 %v4325_v22 }
  0x60   :  { %377 = vmatmul.f32.gmra.mxu1 %v4343_v27 }
  0x61   :  { %574 = vperm.xlu0 %3629, %v570_v3  }
  0xaf   :  { %v260_v12 = vpop.f32.mrf.mxu0 }
  0xb0   :  { %v261_v2 = vadd.f32 %v260_v12, %v239_v1 }
  0xb3   :  { %v283_v13 = vpop.f32.mrf.mxu1 }
  0xb4   :  { %v306_v14 = vpop.f32.mrf.mxu2  ;;  %v284_v8 = vadd.f32 %v283_v13, %v261_v2 }
  0xb6   :  { %v329_v16 = vpop.f32.mrf.mxu3  ;;  %v307_v17 = vadd.f32 %v306_v14, %v284_v8 }
  0xb8   :  { %v4493_v22 = vadd.f32 %v329_v16, %v307_v17 }
  0xb9   :  { %v263_v18 = vpop.f32.mrf.mxu0 }
  0xba   :  { %v264_v19 = vadd.f32 %v263_v18, %v239_v1  ;;  %v514_v28 = vmul.f32 %v4493_v22, %v4493_v22 }
  0xbc   :  { %v286_v21 = vpop.f32.mrf.mxu1 }
  0xbd   :  { %v287_v23 = vadd.f32 %v286_v21, %v264_v19  ;;  %v309_v24 = vpop.f32.mrf.mxu2 }
  0xbf   :  { %v310_v26 = vadd.f32 %v309_v24, %v287_v23 }
  0xc0   :  { %v332_v27 = vpop.f32.mrf.mxu3 }
  0xc1   :  { %v4497_v29 = vadd.f32 %v332_v27, %v310_v26 }
  0xc3   :  { %v491_v31 = vadd.f32 %v4497_v29, %v4493_v22  ;;  %v516_v32 = vmul.f32 %v4497_v29, %v4497_v29 }
  0xc5   :  { %v492_v33 = vrot.slane %v491_v31, 4  ;;  %v518_v34 = vadd.f32 %v516_v32, %v514_v28 }
  0xc7   :  { %v493_v36 = vadd.f32 %v492_v33, %v491_v31  ;;  %v519_v37 = vrot.slane %v518_v34, 4 }
  0xc9   :  { %v494_v38 = vrot.slane %v493_v36, 2  ;;  %v520_v39 = vadd.f32 %v519_v37, %v518_v34  ;;  %v568_v34 = vld [vmem:[%s5497_s3] sm:$0xff] }
  0xcb   :  { %v495_v41 = vadd.f32 %v494_v38, %v493_v36  ;;  %v521_v42 = vrot.slane %v520_v39, 2 }
  0xcd   :  { %v496_v43 = vrot.slane %v495_v41, 1  ;;  %v522_v44 = vadd.f32 %v521_v42, %v520_v39 }
  0xcf   :  { %v497_v46 = vadd.f32 %v496_v43, %v495_v41  ;;  %v523_v47 = vrot.slane %v522_v44, 1  ;;  %v569_v43 = vld [vmem:[%s5497_s3 + $0x8] sm:$0xff] }
  0xd1   :  { %v512_v49 = vmul.f32 %v4503_v45, %v497_v46  ;;  %v524_v50 = vadd.f32 %v523_v47, %v522_v44  ;;  %v3550_v47 = vld [vmem:[%s5500_s6 + $0x10] sm:$0xff] }
  0xd2   :  { %1739 = vperm.xlu0 %3629, %v3550_v47  }
  0xd3   :  { %v532_v51 = vmul.f32 %v524_v50, %v4503_v45  ;;  %v534_v52 = vmul.f32 %v512_v49, %v512_v49  ;;  %v352_v53 = vpop.f32.mrf.mxu0  ;;  %v540_v24 = vsub.f32 %v4497_v29, %v512_v49  ;;  %v538_v30 = vsub.f32 %v4493_v22, %v512_v49 }
  0xd4   :  { %v353_v54 = vadd.f32 %v352_v53, %v240_v48 }
  0xd5   :  { %v375_v56 = vpop.f32.mrf.mxu1  ;;  %v536_v57 = vsub.f32 %v532_v51, %v534_v52 }
  0xd6   :  { %v376_v61 = vadd.f32 %v375_v56, %v353_v54 }
  0xd7   :  { %v398_v59 = vpop.f32.mrf.mxu2  ;;  %v542_v60 = vadd.f32 1e-05, %v536_v57 }
  0xd8   :  { %v399_v4 = vadd.f32 %v398_v59, %v376_v61  ;;  %v580_v59 = vpop.permute.xlu0 %579 }
  0xd9   :  { %v421_v63 = vpop.f32.mrf.mxu3  ;;  %3634 = vrsqrt.f32 %v542_v60  ;;  %vm550_vm2 = vweird.f32 %v542_v60 }
  0xda   :  { %v4514_v11 = vadd.f32 %v421_v63, %v399_v4 }
  0xdb   :  { %v355_v0 = vpop.f32.mrf.mxu0 }
  0xdc   :  { %v356_v5 = vadd.f32 %v355_v0, %v240_v48  ;;  %v515_v14 = vmul.f32 %v4514_v11, %v4514_v11 }
  0xdd   :  { %v378_v6 = vpop.f32.mrf.mxu1 }
  0xde   :  { %v379_v7 = vadd.f32 %v378_v6, %v356_v5 }
  0xdf   :  { %v3635_v9 = vpop.eup %3634  ;;  %v401_v10 = vpop.f32.mrf.mxu2 }
  0xe0   :  { %v402_v62 = vadd.f32 %v401_v10, %v379_v7  ;;  %v545_v1 = vmul.f32 %v3635_v9, %v542_v60  ;;  %vm551_vm1 = vweird.f32 %v3635_v9  ;;  %v575_v60 = vpop.permute.xlu0 %574 }
  0xe1   :  { %v424_v12 = vpop.f32.mrf.mxu3  ;;  %vm552_vm3 = vmor %vm550_vm2, %vm551_vm1 }
  0xe2   :  { %v4516_v2 = vadd.f32 %v424_v12, %v402_v62  ;;  %v546_v13 = vmul.f32 %v3635_v9, %v545_v1 }
  0xe4   :  { %v498_v8 = vadd.f32 %v4516_v2, %v4514_v11  ;;  %v517_v15 = vmul.f32 %v4516_v2, %v4516_v2  ;;  %v547_v16 = vmul.f32 0.5, %v546_v13 }
  0xe6   :  { %v499_v17 = vrot.slane %v498_v8, 4  ;;  %v525_v18 = vadd.f32 %v517_v15, %v515_v14  ;;  %v548_v19 = vsub.f32 1.5, %v547_v16 }
  0xe8   :  { %v500_v20 = vadd.f32 %v499_v17, %v498_v8  ;;  %v526_v21 = vrot.slane %v525_v18, 4  ;;  %v549_v23 = vmul.f32 %v3635_v9, %v548_v19 }
  0xea   :  { %v501_v25 = vrot.slane %v500_v20, 2  ;;  %v527_v26 = vadd.f32 %v526_v21, %v525_v18  ;;  %v553_v27 = vsel %vm552_vm3, %v3635_v9, %v549_v23 }
  0xeb   :  { %v566_v28 = vmul.f32 %v553_v27, %v540_v24  ;;  %v564_v33 = vmul.f32 %v553_v27, %v538_v30 }
  0xec   :  { %v502_v31 = vadd.f32 %v501_v25, %v500_v20  ;;  %v528_v32 = vrot.slane %v527_v26, 2 }
  0xed   :  { %603 = vmatpush.msra.mxu0 %v566_v28 }
  0xee   :  { %v503_v35 = vrot.slane %v502_v31, 1  ;;  %v529_v36 = vadd.f32 %v528_v32, %v527_v26 }
  0xef   :  { %604 = vmatpush.msra.mxu0 %v564_v33 }
  0xf0   :  { %v504_v37 = vadd.f32 %v503_v35, %v502_v31  ;;  %v530_v38 = vrot.slane %v529_v36, 1  ;;  %3532 = vmatmul.msk.f32.vlgmr.msra.gmra.mxu0 %vm582_vm4, %v568_v34 }
  0xf2   :  { %v513_v39 = vmul.f32 %v4503_v45, %v504_v37  ;;  %v531_v40 = vadd.f32 %v530_v38, %v529_v36 }
  0xf4   :  { %v533_v41 = vmul.f32 %v531_v40, %v4503_v45  ;;  %v535_v42 = vmul.f32 %v513_v39, %v513_v39  ;;  %v541_v54 = vsub.f32 %v4516_v2, %v513_v39  ;;  %v539_v57 = vsub.f32 %v4514_v11, %v513_v39 }
  0xf6   :  { %v537_v44 = vsub.f32 %v533_v41, %v535_v42 }
  0xf8   :  { %3533 = vmatmul.msk.f32.gmra.mxu0 %vm582_vm4, %v569_v43  ;;  %v543_v46 = vadd.f32 1e-05, %v537_v44 }
  0xfa   :  { %3636 = vrsqrt.f32 %v543_v46  ;;  %vm560_vm6 = vweird.f32 %v543_v46 }
 0x100   :  { %v3637_v48 = vpop.eup %3636 }
 0x101   :  { %v555_v49 = vmul.f32 %v3637_v48, %v543_v46  ;;  %vm561_vm5 = vweird.f32 %v3637_v48 }
 0x102   :  { %vm562_vm7 = vmor %vm560_vm6, %vm561_vm5 }
 0x103   :  { %v556_v50 = vmul.f32 %v3637_v48, %v555_v49 }
 0x105   :  { %v557_v51 = vmul.f32 0.5, %v556_v50 }
 0x107   :  { %v558_v52 = vsub.f32 1.5, %v557_v51 }
 0x109   :  { %v559_v53 = vmul.f32 %v3637_v48, %v558_v52 }
 0x10b   :  { %v563_v55 = vsel %vm562_vm7, %v3637_v48, %v559_v53 }
 0x10c   :  { %v567_v56 = vmul.f32 %v563_v55, %v541_v54  ;;  %v565_v58 = vmul.f32 %v563_v55, %v539_v57  ;;  %v741_v55 = vld [vmem:[%s5500_s6] sm:$0xff] }
 0x10d   :  { %745 = vperm.xlu1 %3630, %v741_v55   ;;  %v4611_v55 = vld [vmem:[#allocation7 + $0xb8] sm:$0xff] }
 0x10e   :  { %626 = vmatpush.msra.mxu1 %v567_v56 }
 0x110   :  { %627 = vmatpush.msra.mxu1 %v565_v58 }
 0x111   :  { %3534 = vmatmul.msk.f32.vlgmr.msra.gmra.mxu1 %vm582_vm4, %v568_v34 }
 0x119   :  { %3535 = vmatmul.msk.f32.gmra.mxu1 %vm582_vm4, %v569_v43 }
 0x16d   :  { %v606_v61 = vpop.f32.mrf.mxu0 }
 0x16e   :  { %v4543_v63 = vadd.f32 %v606_v61, %v575_v60 }
 0x170   :  { %v4546_v0 = vmul.f32 0.70710677, %v4543_v63 }
 0x172   :  { %v643_v3 = vand.u32 2147483647, %v4546_v0  ;;  %vm719_vm8 = vcmp.ge.f32.partialorder %v4546_v0, 0.0  ;;  %v742_v0 = vld [vmem:[%s5500_s6 + $0x8] sm:$0xff] }
 0x173   :  { %750 = vperm.xlu1 %3630, %v742_v0  }
 0x174   :  { %v647_v4 = vmul.f32 0.3275911, %v643_v3  ;;  %v695_v62 = vsub.f32 0.0, %v643_v3 }
 0x175   :  { %v609_v5 = vpop.f32.mrf.mxu0 }
 0x176   :  { %v651_v6 = vadd.f32 1.0, %v647_v4  ;;  %v610_v7 = vadd.f32 %v609_v5, %v580_v59  ;;  %v699_v8 = vmul.f32 %v695_v62, %v643_v3 }
 0x178   :  { %3638 = vrcp.f32 %v651_v6  ;;  %v641_v9 = vmul.f32 0.70710677, %v610_v7  ;;  %v703_v17 = vmul.f32 1.442695, %v699_v8  ;;  %v637_v3 = vmul.f32 0.5, %v610_v7  ;;  %v4572_v7 = vld [vmem:[%s5499_s5] sm:$0xff] }
 0x17a   :  { %v645_v10 = vand.u32 2147483647, %v641_v9  ;;  %vm721_vm9 = vcmp.ge.f32.partialorder %v641_v9, 0.0 }
 0x17c   :  { %v649_v1 = vmul.f32 0.3275911, %v645_v10  ;;  %v697_v18 = vsub.f32 0.0, %v645_v10 }
 0x17e   :  { %v3639_v12 = vpop.eup %3638  ;;  %v653_v13 = vadd.f32 1.0, %v649_v1  ;;  %v701_v24 = vmul.f32 %v697_v18, %v645_v10 }
 0x17f   :  { %v659_v14 = vmul.f32 1.0614054, %v3639_v12 }
 0x180   :  { %3640 = vrcp.f32 %v653_v13  ;;  %v707_v30 = vmul.f32 1.442695, %v701_v24 }
 0x181   :  { %v663_v15 = vadd.f32 -1.4531521, %v659_v14  ;;  %3642 = vpow2.f32 %v703_v17 }
 0x182   :  { %3644 = vpow2.f32 %v707_v30 }
 0x183   :  { %v667_v16 = vmul.f32 %v3639_v12, %v663_v15 }
 0x185   :  { %v671_v19 = vadd.f32 1.4214138, %v667_v16 }
 0x186   :  { %v3641_v20 = vpop.eup %3640 }
 0x187   :  { %v661_v21 = vmul.f32 1.0614054, %v3641_v20  ;;  %v675_v23 = vmul.f32 %v3639_v12, %v671_v19  ;;  %v3643_v33 = vpop.eup %3642 }
 0x188   :  { %v3645_v47 = vpop.eup %3644 }
 0x189   :  { %v665_v25 = vadd.f32 -1.4531521, %v661_v21  ;;  %v679_v26 = vadd.f32 -0.28449672, %v675_v23 }
 0x18b   :  { %v669_v27 = vmul.f32 %v3641_v20, %v665_v25  ;;  %v683_v28 = vmul.f32 %v3639_v12, %v679_v26  ;;  %v4579_v25 = vld [vmem:[%s5499_s5 + $0x8] sm:$0xff] }
 0x18d   :  { %v673_v31 = vadd.f32 1.4214138, %v669_v27  ;;  %v687_v32 = vadd.f32 0.2548296, %v683_v28 }
 0x18e   :  { %v629_v34 = vpop.f32.mrf.mxu1 }
 0x18f   :  { %v677_v35 = vmul.f32 %v3641_v20, %v673_v31  ;;  %v4549_v36 = vadd.f32 %v629_v34, %v575_v60  ;;  %v691_v37 = vmul.f32 %v3639_v12, %v687_v32  ;;  %v635_v12 = vmul.f32 0.5, %v4543_v63  ;;  %v3551_v34 = vld [vmem:[%s5500_s6 + $0x18] sm:$0xff] }
 0x190   :  { %1744 = vperm.xlu1 %3630, %v3551_v34   ;;  %v4675_v34 = vld [vmem:[#allocation7 + $0x1d8] sm:$0xff] }
 0x191   :  { %v681_v38 = vadd.f32 -0.28449672, %v677_v35  ;;  %v4552_v39 = vmul.f32 0.70710677, %v4549_v36  ;;  %v711_v40 = vmul.f32 %v3643_v33, %v691_v37  ;;  %v4586_v35 = vld [vmem:[#allocation7 + $0xf0] sm:$0xff]  ;;  %v4588_v37 = vld [vmem:[#allocation7 + $0xf8] sm:$0xff] }
 0x192   :  { %809 = vmatpush.msrb.mxu0 %v4586_v35 }
 0x193   :  { %v685_v41 = vmul.f32 %v3641_v20, %v681_v38  ;;  %v644_v42 = vand.u32 2147483647, %v4552_v39  ;;  %v715_v46 = vsub.f32 1.0, %v711_v40  ;;  %v4591_v40 = vld [vmem:[#allocation7 + $0xe0] sm:$0xff]  ;;  %vm720_vm10 = vcmp.ge.f32.partialorder %v4552_v39, 0.0 }
 0x194   :  { %810 = vmatpush.msrb.mxu0 %v4591_v40  ;;  %v4647_v39 = vld [vmem:[#allocation7 + $0x1c0] sm:$0xff] }
 0x195   :  { %v689_v43 = vadd.f32 0.2548296, %v685_v41  ;;  %v648_v44 = vmul.f32 0.3275911, %v644_v42  ;;  %v723_v53 = vsub.f32 0.0, %v715_v46  ;;  %v696_v5 = vsub.f32 0.0, %v644_v42 }
 0x196   :  { %v632_v48 = vpop.f32.mrf.mxu1  ;;  %v4593_v41 = vld [vmem:[#allocation7 + $0xe8] sm:$0xff] }
 0x197   :  { %v693_v49 = vmul.f32 %v3641_v20, %v689_v43  ;;  %v652_v50 = vadd.f32 1.0, %v648_v44  ;;  %v4555_v51 = vadd.f32 %v632_v48, %v580_v59  ;;  %v727_v60 = vsel %vm719_vm8, %v715_v46, %v723_v53  ;;  %v4596_v44 = vld [vmem:[#allocation7 + $0xd0] sm:$0xff]  ;;  %v4599_v46 = vld [vmem:[#allocation7 + $0xd8] sm:$0xff]  ;;  %v4602_v48 = vld [vmem:[#allocation7 + $0xc0] sm:$0xff] }
 0x198   :  { %v731_v62 = vadd.f32 1.0, %v727_v60  ;;  %v700_v9 = vmul.f32 %v696_v5, %v644_v42  ;;  %811 = vmatpush.msrb.mxu0 %v4596_v44  ;;  %v4608_v53 = vld [vmem:[#allocation7 + $0xb0] sm:$0xff]  ;;  %v4617_v60 = vld [vmem:[#allocation7 + $0xa8] sm:$0xff] }
 0x199   :  { %v713_v52 = vmul.f32 %v3645_v47, %v693_v49  ;;  %3646 = vrcp.f32 %v652_v50  ;;  %v4558_v54 = vmul.f32 0.70710677, %v4555_v51  ;;  %v4605_v49 = vld [vmem:[#allocation7 + $0xc8] sm:$0xff]  ;;  %v4625_v5 = vld [vmem:[#allocation7 + $0x1f0] sm:$0xff] }
 0x19a   :  { %v735_v8 = vmul.f32 %v731_v62, %v635_v12  ;;  %v705_v17 = vmul.f32 1.442695, %v700_v9  ;;  %812 = vmatpush.msrb.mxu0 %v4602_v48  ;;  %v4630_v62 = vld [vmem:[#allocation7 + $0x80] sm:$0xff]  ;;  %832 = vmatpush.msrb.mxu1 %v4625_v5  ;;  %v4637_v12 = vld [vmem:[#allocation7 + $0x1d0] sm:$0xff]  ;;  %v4645_v9 = vld [vmem:[#allocation7 + $0x78] sm:$0xff] }
 0x19b   :  { %v717_v56 = vsub.f32 1.0, %v713_v52  ;;  %v646_v57 = vand.u32 2147483647, %v4558_v54  ;;  %vm722_vm11 = vcmp.ge.f32.partialorder %v4558_v54, 0.0  ;;  %v4655_v54 = vld [vmem:[#allocation7 + $0x68] sm:$0xff] }
 0x19c   :  { %813 = vmatpush.msrb.mxu0 %v4608_v53 }
 0x19d   :  { %v725_v58 = vsub.f32 0.0, %v717_v56  ;;  %v650_v59 = vmul.f32 0.3275911, %v646_v57  ;;  %v698_v18 = vsub.f32 0.0, %v646_v57 }
 0x19f   :  { %v3647_v61 = vpop.eup %3646  ;;  %v729_v4 = vsel %vm721_vm9, %v717_v56, %v725_v58  ;;  %v654_v10 = vadd.f32 1.0, %v650_v59  ;;  %v702_v24 = vmul.f32 %v698_v18, %v646_v57  ;;  %v4614_v57 = vld [vmem:[#allocation7 + $0xa0] sm:$0xff]  ;;  %v4657_v18 = vld [vmem:[#allocation7 + $0x1b0] sm:$0xff] }
 0x1a0   :  { %v733_v6 = vadd.f32 1.0, %v729_v4  ;;  %v660_v1 = vmul.f32 1.0614054, %v3647_v61  ;;  %814 = vmatpush.msrb.mxu0 %v4614_v57  ;;  %v4623_v4 = vld [vmem:[#allocation7 + $0x98] sm:$0xff] }
 0x1a1   :  { %3648 = vrcp.f32 %v654_v10  ;;  %v709_v31 = vmul.f32 1.442695, %v702_v24 }
 0x1a2   :  { %v737_v13 = vmul.f32 %v733_v6, %v637_v3  ;;  %v664_v14 = vadd.f32 -1.4531521, %v660_v1  ;;  %3650 = vpow2.f32 %v705_v17  ;;  %v4620_v3 = vld [vmem:[#allocation7 + $0x90] sm:$0xff]  ;;  %v4627_v6 = vld [vmem:[#allocation7 + $0x1e0] sm:$0xff]  ;;  %v4635_v1 = vld [vmem:[#allocation7 + $0x88] sm:$0xff] }
 0x1a3   :  { %3652 = vpow2.f32 %v709_v31  ;;  %815 = vmatpush.msrb.mxu0 %v4620_v3  ;;  %833 = vmatpush.msrb.mxu1 %v4627_v6  ;;  %v4672_v31 = vld [vmem:[#allocation7 + $0x1e8] sm:$0xff] }
 0x1a4   :  { %773 = vmatpush.msra.mxu2 %v737_v13  ;;  %v668_v15 = vmul.f32 %v3647_v61, %v664_v14  ;;  %v4640_v14 = vld [vmem:[#allocation7 + $0x70] sm:$0xff] }
 0x1a5   :  { %816 = vmatpush.msrb.mxu0 %v4630_v62  ;;  %834 = vmatpush.msrb.mxu1 %v4637_v12 }
 0x1a6   :  { %774 = vmatpush.msra.mxu2 %v735_v8  ;;  %v672_v16 = vadd.f32 1.4214138, %v668_v15  ;;  %v4650_v15 = vld [vmem:[#allocation7 + $0x60] sm:$0xff] }
 0x1a7   :  { %3536 = vmatmul.msk.f32.vlgmr.msra.gmra.mxu2 %vm582_vm4, %v4572_v7  ;;  %v3649_v63 = vpop.eup %3648  ;;  %817 = vmatpush.msrb.mxu0 %v4640_v14 }
 0x1a8   :  { %v676_v19 = vmul.f32 %v3647_v61, %v672_v16  ;;  %v662_v20 = vmul.f32 1.0614054, %v3649_v63  ;;  %v3651_v38 = vpop.eup %3650  ;;  %855 = vmatpush.msrb.mxu2 %v4588_v37  ;;  %v638_v16 = vmul.f32 0.5, %v4555_v51  ;;  %835 = vmatpush.msrb.mxu1 %v4647_v39  ;;  %v438_v51 = vld [vmem:[#allocation7 + $0x58] sm:$0xff] }
 0x1a9   :  { %v3653_v58 = vpop.eup %3652  ;;  %818 = vmatpush.msrb.mxu0 %v4650_v15 }
 0x1aa   :  { %v680_v21 = vadd.f32 -0.28449672, %v676_v19  ;;  %v666_v23 = vadd.f32 -1.4531521, %v662_v20  ;;  %856 = vmatpush.msrb.mxu2 %v4593_v41  ;;  %v4660_v19 = vld [vmem:[#allocation7 + $0x50] sm:$0xff]  ;;  %v636_v20 = vmul.f32 0.5, %v4549_v36  ;;  %836 = vmatpush.msrb.mxu1 %v4657_v18 }
 0x1ab   :  { %819 = vmatpush.msrb.mxu0 %v4660_v19  ;;  %v434_v36 = vld [vmem:[#allocation7 + $0x38] sm:$0xff] }
 0x1ac   :  { %v684_v26 = vmul.f32 %v3647_v61, %v680_v21  ;;  %v670_v27 = vmul.f32 %v3649_v63, %v666_v23  ;;  %857 = vmatpush.msrb.mxu2 %v4599_v46  ;;  %v435_v23 = vld [vmem:[#allocation7 + $0x40] sm:$0xff] }
 0x1ad   :  { %820 = vmatpush.msrb.mxu0 %v435_v23 }
 0x1ae   :  { %v688_v28 = vadd.f32 0.2548296, %v684_v26  ;;  %v674_v30 = vadd.f32 1.4214138, %v670_v27  ;;  %858 = vmatpush.msrb.mxu2 %v4605_v49  ;;  %v436_v26 = vld [vmem:[#allocation7 + $0x48] sm:$0xff]  ;;  %v433_v27 = vld [vmem:[#allocation7 + $0x30] sm:$0xff] }
 0x1af   :  { %3537 = vmatmul.msk.f32.gmra.mxu2 %vm582_vm4, %v4579_v25  ;;  %821 = vmatpush.msrb.mxu0 %v433_v27 }
 0x1b0   :  { %v692_v32 = vmul.f32 %v3647_v61, %v688_v28  ;;  %v678_v33 = vmul.f32 %v3649_v63, %v674_v30  ;;  %859 = vmatpush.msrb.mxu2 %v4611_v55  ;;  %v4668_v28 = vld [vmem:[#allocation7 + $0x1f8] sm:$0xff]  ;;  %v431_v30 = vld [vmem:[#allocation7 + $0x20] sm:$0xff] }
 0x1b1   :  { %822 = vmatpush.msrb.mxu0 %v431_v30 }
 0x1b2   :  { %v682_v42 = vadd.f32 -0.28449672, %v678_v33  ;;  %v712_v43 = vmul.f32 %v3651_v38, %v692_v32  ;;  %860 = vmatpush.msrb.mxu2 %v4617_v60  ;;  %v432_v32 = vld [vmem:[#allocation7 + $0x28] sm:$0xff]  ;;  %v429_v33 = vld [vmem:[#allocation7 + $0x10] sm:$0xff]  ;;  %v430_v38 = vld [vmem:[#allocation7 + $0x18] sm:$0xff] }
 0x1b3   :  { %823 = vmatpush.msrb.mxu0 %v429_v33 }
 0x1b4   :  { %v686_v47 = vmul.f32 %v3649_v63, %v682_v42  ;;  %v716_v52 = vsub.f32 1.0, %v712_v43  ;;  %861 = vmatpush.msrb.mxu2 %v4623_v4  ;;  %v427_v42 = vld [vmem:[#allocation7] sm:$0xff]  ;;  %v4678_v43 = vld [vmem:[#allocation7 + $0x1c8] sm:$0xff] }
 0x1b5   :  { %824 = vmatpush.msrb.mxu0 %v427_v42 }
 0x1b6   :  { %v690_v50 = vadd.f32 0.2548296, %v686_v47  ;;  %v724_v61 = vsub.f32 0.0, %v716_v52  ;;  %862 = vmatpush.msrb.mxu2 %v4635_v1  ;;  %v4682_v47 = vld [vmem:[#allocation7 + $0x1b8] sm:$0xff] }
 0x1b7   :  { %905 = vmatpush.msra.mxu0 %v4586_v35  ;;  %v480_v35 = vld [vmem:[#allocation7 + $0x1a8] sm:$0xff] }
 0x1b8   :  { %v694_v56 = vmul.f32 %v3649_v63, %v690_v50  ;;  %v728_v0 = vsel %vm720_vm10, %v716_v52, %v724_v61  ;;  %863 = vmatpush.msrb.mxu2 %v4645_v9  ;;  %v472_v50 = vld [vmem:[#allocation7 + $0x168] sm:$0xff]  ;;  %v469_v52 = vld [vmem:[#allocation7 + $0x150] sm:$0xff] }
 0x1b9   :  { %v732_v17 = vadd.f32 1.0, %v728_v0  ;;  %906 = vmatpush.msra.mxu0 %v4591_v40  ;;  %v478_v40 = vld [vmem:[#allocation7 + $0x198] sm:$0xff]  ;;  %v461_v61 = vld [vmem:[#allocation7 + $0x110] sm:$0xff] }
 0x1ba   :  { %v714_v59 = vmul.f32 %v3653_v58, %v694_v56  ;;  %864 = vmatpush.msrb.mxu2 %v4655_v54  ;;  %v468_v56 = vld [vmem:[#allocation7 + $0x148] sm:$0xff]  ;;  %v466_v58 = vld [vmem:[#allocation7 + $0x138] sm:$0xff] }
 0x1bb   :  { %v736_v24 = vmul.f32 %v732_v17, %v636_v20  ;;  %907 = vmatpush.msra.mxu0 %v4596_v44  ;;  %v476_v44 = vld [vmem:[#allocation7 + $0x188] sm:$0xff]  ;;  %v1083_v20 = vld [vmem:[#allocation2 + $0xd0] sm:$0xff] }
 0x1bc   :  { %v718_v10 = vsub.f32 1.0, %v714_v59  ;;  %865 = vmatpush.msrb.mxu2 %v438_v51  ;;  %v464_v59 = vld [vmem:[#allocation7 + $0x128] sm:$0xff] }
 0x1bd   :  { %908 = vmatpush.msra.mxu0 %v4602_v48  ;;  %v474_v48 = vld [vmem:[#allocation7 + $0x178] sm:$0xff] }
 0x1be   :  { %v726_v13 = vsub.f32 0.0, %v718_v10  ;;  %866 = vmatpush.msrb.mxu2 %v436_v26 }
 0x1bf   :  { %909 = vmatpush.msra.mxu0 %v4608_v53  ;;  %v470_v53 = vld [vmem:[#allocation7 + $0x158] sm:$0xff] }
 0x1c0   :  { %v730_v8 = vsel %vm722_vm11, %v718_v10, %v726_v13  ;;  %867 = vmatpush.msrb.mxu2 %v434_v36  ;;  %v460_v10 = vld [vmem:[#allocation7 + $0x108] sm:$0xff] }
 0x1c1   :  { %v734_v63 = vadd.f32 1.0, %v730_v8  ;;  %910 = vmatpush.msra.mxu0 %v4614_v57  ;;  %v465_v57 = vld [vmem:[#allocation7 + $0x130] sm:$0xff] }
 0x1c2   :  { %868 = vmatpush.msrb.mxu2 %v432_v32 }
 0x1c3   :  { %v738_v21 = vmul.f32 %v734_v63, %v638_v16  ;;  %911 = vmatpush.msra.mxu0 %v4620_v3  ;;  %v462_v3 = vld [vmem:[#allocation7 + $0x118] sm:$0xff] }
 0x1c4   :  { %869 = vmatpush.msrb.mxu2 %v430_v38 }
 0x1c5   :  { %796 = vmatpush.msra.mxu3 %v738_v21  ;;  %912 = vmatpush.msra.mxu0 %v4630_v62  ;;  %v746_v62 = vpop.permute.xlu1 %745  ;;  %v1084_v21 = vld [vmem:[#allocation2 + $0xd8] sm:$0xff] }
 0x1c7   :  { %797 = vmatpush.msra.mxu3 %v736_v24  ;;  %913 = vmatpush.msra.mxu0 %v4640_v14  ;;  %v1082_v24 = vld [vmem:[#allocation2 + $0xc8] sm:$0xff] }
 0x1c8   :  { %3538 = vmatmul.msk.f32.vlgmr.msra.gmra.mxu3 %vm582_vm4, %v4572_v7  ;;  %v428_v7 = vld [vmem:[#allocation7 + $0x8] sm:$0xff] }
 0x1c9   :  { %878 = vmatpush.msrb.mxu3 %v4668_v28  ;;  %870 = vmatpush.msrb.mxu2 %v428_v7 }
 0x1ca   :  { %914 = vmatpush.msra.mxu0 %v4650_v15 }
 0x1cb   :  { %879 = vmatpush.msrb.mxu3 %v4672_v31  ;;  %951 = vmatpush.msra.mxu2 %v4588_v37  ;;  %v477_v37 = vld [vmem:[#allocation7 + $0x190] sm:$0xff] }
 0x1cc   :  { %915 = vmatpush.msra.mxu0 %v4660_v19  ;;  %v1086_v19 = vld [vmem:[#allocation2 + $0xe8] sm:$0xff] }
 0x1cd   :  { %880 = vmatpush.msrb.mxu3 %v4675_v34  ;;  %952 = vmatpush.msra.mxu2 %v4593_v41  ;;  %v475_v41 = vld [vmem:[#allocation7 + $0x180] sm:$0xff] }
 0x1ce   :  { %916 = vmatpush.msra.mxu0 %v435_v23  ;;  %v1119_v23 = vld [vmem:[#allocation2 + $0x1f0] sm:$0xff] }
 0x1cf   :  { %881 = vmatpush.msrb.mxu3 %v4678_v43  ;;  %953 = vmatpush.msra.mxu2 %v4599_v46  ;;  %v473_v46 = vld [vmem:[#allocation7 + $0x170] sm:$0xff] }
 0x1d0   :  { %3539 = vmatmul.msk.f32.gmra.mxu3 %vm582_vm4, %v4579_v25  ;;  %917 = vmatpush.msra.mxu0 %v433_v27  ;;  %v479_v25 = vld [vmem:[#allocation7 + $0x1a0] sm:$0xff]  ;;  %v1079_v27 = vld [vmem:[#allocation2 + $0xb0] sm:$0xff] }
 0x1d1   :  { %882 = vmatpush.msrb.mxu3 %v4682_v47  ;;  %954 = vmatpush.msra.mxu2 %v4605_v49  ;;  %v471_v49 = vld [vmem:[#allocation7 + $0x160] sm:$0xff] }
 0x1d2   :  { %918 = vmatpush.msra.mxu0 %v431_v30  ;;  %837 = vmatpush.msrb.mxu1 %v479_v25  ;;  %v1118_v30 = vld [vmem:[#allocation2 + $0x1e8] sm:$0xff] }
 0x1d3   :  { %955 = vmatpush.msra.mxu2 %v4611_v55  ;;  %883 = vmatpush.msrb.mxu3 %v480_v35  ;;  %v467_v55 = vld [vmem:[#allocation7 + $0x140] sm:$0xff] }
 0x1d4   :  { %919 = vmatpush.msra.mxu0 %v429_v33  ;;  %838 = vmatpush.msrb.mxu1 %v477_v37  ;;  %v1078_v33 = vld [vmem:[#allocation2 + $0xa8] sm:$0xff] }
 0x1d5   :  { %956 = vmatpush.msra.mxu2 %v4617_v60  ;;  %884 = vmatpush.msrb.mxu3 %v478_v40  ;;  %v463_v60 = vld [vmem:[#allocation7 + $0x120] sm:$0xff] }
 0x1d6   :  { %920 = vmatpush.msra.mxu0 %v427_v42  ;;  %839 = vmatpush.msrb.mxu1 %v475_v41  ;;  %v1113_v42 = vld [vmem:[#allocation2 + $0x1c0] sm:$0xff] }
 0x1d7   :  { %957 = vmatpush.msra.mxu2 %v4623_v4  ;;  %885 = vmatpush.msrb.mxu3 %v476_v44  ;;  %v459_v4 = vld [vmem:[#allocation7 + $0x100] sm:$0xff] }
 0x1d8   :  { %840 = vmatpush.msrb.mxu1 %v473_v46 }
 0x1d9   :  { %958 = vmatpush.msra.mxu2 %v4635_v1  ;;  %886 = vmatpush.msrb.mxu3 %v474_v48 }
 0x1da   :  { %841 = vmatpush.msrb.mxu1 %v471_v49 }
 0x1db   :  { %959 = vmatpush.msra.mxu2 %v4645_v9  ;;  %887 = vmatpush.msrb.mxu3 %v472_v50 }
 0x1dc   :  { %842 = vmatpush.msrb.mxu1 %v469_v52 }
 0x1dd   :  { %960 = vmatpush.msra.mxu2 %v4655_v54  ;;  %888 = vmatpush.msrb.mxu3 %v470_v53  ;;  %v1087_v54 = vld [vmem:[#allocation2 + $0xf0] sm:$0xff] }
 0x1de   :  { %843 = vmatpush.msrb.mxu1 %v467_v55 }
 0x1df   :  { %961 = vmatpush.msra.mxu2 %v438_v51  ;;  %889 = vmatpush.msrb.mxu3 %v468_v56  ;;  %v1081_v51 = vld [vmem:[#allocation2 + $0xc0] sm:$0xff] }
 0x1e0   :  { %844 = vmatpush.msrb.mxu1 %v465_v57 }
 0x1e1   :  { %962 = vmatpush.msra.mxu2 %v436_v26  ;;  %890 = vmatpush.msrb.mxu3 %v466_v58  ;;  %v1120_v26 = vld [vmem:[#allocation2 + $0x1f8] sm:$0xff] }
 0x1e2   :  { %845 = vmatpush.msrb.mxu1 %v463_v60 }
 0x1e3   :  { %963 = vmatpush.msra.mxu2 %v434_v36  ;;  %891 = vmatpush.msrb.mxu3 %v464_v59  ;;  %v1080_v36 = vld [vmem:[#allocation2 + $0xb8] sm:$0xff] }
 0x1e4   :  { %846 = vmatpush.msrb.mxu1 %v461_v61 }
 0x1e5   :  { %964 = vmatpush.msra.mxu2 %v432_v32  ;;  %892 = vmatpush.msrb.mxu3 %v462_v3  ;;  %v1115_v32 = vld [vmem:[#allocation2 + $0x1d0] sm:$0xff] }
 0x1e6   :  { %847 = vmatpush.msrb.mxu1 %v459_v4 }
 0x1e7   :  { %965 = vmatpush.msra.mxu2 %v430_v38  ;;  %893 = vmatpush.msrb.mxu3 %v460_v10  ;;  %v1075_v38 = vld [vmem:[#allocation2 + $0x90] sm:$0xff] }
 0x1e8   :  { %928 = vmatpush.msra.mxu1 %v4625_v5 }
 0x1e9   :  { %966 = vmatpush.msra.mxu2 %v428_v7  ;;  %974 = vmatpush.msra.mxu3 %v4668_v28  ;;  %v1117_v28 = vld [vmem:[#allocation2 + $0x1e0] sm:$0xff]  ;;  %v1114_v7 = vld [vmem:[#allocation2 + $0x1c8] sm:$0xff] }
 0x1ea   :  { %929 = vmatpush.msra.mxu1 %v4627_v6 }
 0x1eb   :  { %975 = vmatpush.msra.mxu3 %v4672_v31  ;;  %v1077_v31 = vld [vmem:[#allocation2 + $0xa0] sm:$0xff] }
 0x1ec   :  { %930 = vmatpush.msra.mxu1 %v4637_v12  ;;  %v751_v12 = vpop.permute.xlu1 %750 }
 0x1ed   :  { %976 = vmatpush.msra.mxu3 %v4675_v34  ;;  %v1116_v34 = vld [vmem:[#allocation2 + $0x1d8] sm:$0xff] }
 0x1ee   :  { %931 = vmatpush.msra.mxu1 %v4647_v39 }
 0x1ef   :  { %977 = vmatpush.msra.mxu3 %v4678_v43  ;;  %v1076_v43 = vld [vmem:[#allocation2 + $0x98] sm:$0xff] }
 0x1f0   :  { %932 = vmatpush.msra.mxu1 %v4657_v18  ;;  %v1088_v18 = vld [vmem:[#allocation2 + $0xf8] sm:$0xff] }
 0x1f1   :  { %978 = vmatpush.msra.mxu3 %v4682_v47  ;;  %v1073_v47 = vld [vmem:[#allocation2 + $0x80] sm:$0xff] }
 0x1f2   :  { %933 = vmatpush.msra.mxu1 %v479_v25  ;;  %v1111_v25 = vld [vmem:[#allocation2 + $0x1b0] sm:$0xff] }
 0x1f3   :  { %979 = vmatpush.msra.mxu3 %v480_v35  ;;  %v1074_v35 = vld [vmem:[#allocation2 + $0x88] sm:$0xff] }
 0x1f4   :  { %934 = vmatpush.msra.mxu1 %v477_v37 }
 0x1f5   :  { %980 = vmatpush.msra.mxu3 %v478_v40  ;;  %v1112_v40 = vld [vmem:[#allocation2 + $0x1b8] sm:$0xff] }
 0x1f6   :  { %935 = vmatpush.msra.mxu1 %v475_v41  ;;  %v1071_v41 = vld [vmem:[#allocation2 + $0x70] sm:$0xff] }
 0x1f7   :  { %981 = vmatpush.msra.mxu3 %v476_v44  ;;  %v1109_v44 = vld [vmem:[#allocation2 + $0x1a0] sm:$0xff] }
 0x1f8   :  { %936 = vmatpush.msra.mxu1 %v473_v46  ;;  %v1072_v46 = vld [vmem:[#allocation2 + $0x78] sm:$0xff] }
 0x1f9   :  { %982 = vmatpush.msra.mxu3 %v474_v48  ;;  %v1110_v48 = vld [vmem:[#allocation2 + $0x1a8] sm:$0xff] }
 0x1fa   :  { %937 = vmatpush.msra.mxu1 %v471_v49  ;;  %v1069_v49 = vld [vmem:[#allocation2 + $0x60] sm:$0xff] }
 0x1fb   :  { %983 = vmatpush.msra.mxu3 %v472_v50  ;;  %v1107_v50 = vld [vmem:[#allocation2 + $0x190] sm:$0xff] }
 0x1fc   :  { %938 = vmatpush.msra.mxu1 %v469_v52  ;;  %v1070_v52 = vld [vmem:[#allocation2 + $0x68] sm:$0xff] }
 0x1fd   :  { %984 = vmatpush.msra.mxu3 %v470_v53  ;;  %v1108_v53 = vld [vmem:[#allocation2 + $0x198] sm:$0xff] }
 0x1fe   :  { %939 = vmatpush.msra.mxu1 %v467_v55  ;;  %v1067_v55 = vld [vmem:[#allocation2 + $0x50] sm:$0xff] }
 0x1ff   :  { %985 = vmatpush.msra.mxu3 %v468_v56  ;;  %v1105_v56 = vld [vmem:[#allocation2 + $0x180] sm:$0xff] }
 0x200   :  { %940 = vmatpush.msra.mxu1 %v465_v57  ;;  %v1068_v57 = vld [vmem:[#allocation2 + $0x58] sm:$0xff] }
 0x201   :  { %986 = vmatpush.msra.mxu3 %v466_v58 }
 0x202   :  { %941 = vmatpush.msra.mxu1 %v463_v60 }
 0x203   :  { %987 = vmatpush.msra.mxu3 %v464_v59  ;;  %v1106_v59 = vld [vmem:[#allocation2 + $0x188] sm:$0xff] }
 0x204   :  { %942 = vmatpush.msra.mxu1 %v461_v61  ;;  %v1065_v61 = vld [vmem:[#allocation2 + $0x40] sm:$0xff] }
 0x205   :  { %988 = vmatpush.msra.mxu3 %v462_v3  ;;  %v1103_v3 = vld [vmem:[#allocation2 + $0x170] sm:$0xff] }
 0x206   :  { %943 = vmatpush.msra.mxu1 %v459_v4  ;;  %v1066_v4 = vld [vmem:[#allocation2 + $0x48] sm:$0xff] }
 0x207   :  { %989 = vmatpush.msra.mxu3 %v460_v10  ;;  %v1104_v10 = vld [vmem:[#allocation2 + $0x178] sm:$0xff] }
 0x22a   :  { %v776_v1 = vpop.f32.mrf.mxu2 }
 0x22b   :  { %v777_v5 = vadd.f32 %v776_v1, %v746_v62  ;;  %v1101_v1 = vld [vmem:[#allocation2 + $0x160] sm:$0xff] }
 0x22d   :  { %v4719_v6 = vadd.f32 %v777_v5, %v4493_v22  ;;  %v1064_v5 = vld [vmem:[#allocation2 + $0x38] sm:$0xff] }
 0x22f   :  { %825 = vmatmul.f32.vlgmr.msrb.gmra.mxu0 %v4719_v6  ;;  %871 = vmatmul.f32.vlgmr.msrb.gmra.mxu2 %v4719_v6  ;;  %v901_v22 = vmul.f32 %v4719_v6, %v4719_v6 }
 0x230   :  { %1127 = vmatpush.msrb.mxu0 %v1087_v54  ;;  %1173 = vmatpush.msrb.mxu2 %v1088_v18  ;;  %v1098_v54 = vld [vmem:[#allocation2 + $0x148] sm:$0xff]  ;;  %v1057_v18 = vld [vmem:[#allocation2] sm:$0xff] }
 0x232   :  { %v779_v13 = vpop.f32.mrf.mxu2  ;;  %1174 = vmatpush.msrb.mxu2 %v1086_v19  ;;  %v1058_v19 = vld [vmem:[#allocation2 + $0x8] sm:$0xff] }
 0x233   :  { %v780_v0 = vadd.f32 %v779_v13, %v751_v12  ;;  %v1102_v13 = vld [vmem:[#allocation2 + $0x168] sm:$0xff] }
 0x234   :  { %1175 = vmatpush.msrb.mxu2 %v1084_v21  ;;  %v1096_v21 = vld [vmem:[#allocation2 + $0x138] sm:$0xff] }
 0x235   :  { %v4724_v14 = vadd.f32 %v780_v0, %v4497_v29  ;;  %v1061_v0 = vld [vmem:[#allocation2 + $0x20] sm:$0xff] }
 0x236   :  { %1176 = vmatpush.msrb.mxu2 %v1082_v24 }
 0x237   :  { %828 = vmatmul.f32.gmra.mxu0 %v4724_v14  ;;  %874 = vmatmul.f32.gmra.mxu2 %v4724_v14  ;;  %v903_v29 = vmul.f32 %v4724_v14, %v4724_v14 }
 0x238   :  { %1177 = vmatpush.msrb.mxu2 %v1080_v36 }
 0x23a   :  { %1178 = vmatpush.msrb.mxu2 %v1078_v33 }
 0x23c   :  { %1179 = vmatpush.msrb.mxu2 %v1076_v43 }
 0x23e   :  { %1180 = vmatpush.msrb.mxu2 %v1074_v35 }
 0x23f   :  { %921 = vmatmul.f32.vlgmr.msra.gmra.mxu0 %v901_v22  ;;  %967 = vmatmul.f32.vlgmr.msra.gmra.mxu2 %v901_v22  ;;  %v1099_v22 = vld [vmem:[#allocation2 + $0x150] sm:$0xff] }
 0x240   :  { %1181 = vmatpush.msrb.mxu2 %v1072_v46 }
 0x242   :  { %1182 = vmatpush.msrb.mxu2 %v1070_v52 }
 0x244   :  { %1183 = vmatpush.msrb.mxu2 %v1068_v57 }
 0x246   :  { %1184 = vmatpush.msrb.mxu2 %v1066_v4 }
 0x247   :  { %924 = vmatmul.f32.gmra.mxu0 %v903_v29  ;;  %970 = vmatmul.f32.gmra.mxu2 %v903_v29  ;;  %v1062_v29 = vld [vmem:[#allocation2 + $0x28] sm:$0xff] }
 0x248   :  { %1185 = vmatpush.msrb.mxu2 %v1064_v5 }
 0x24a   :  { %1186 = vmatpush.msrb.mxu2 %v1062_v29 }
 0x24b   :  { %v799_v9 = vpop.f32.mrf.mxu3 }
 0x24c   :  { %v800_v39 = vadd.f32 %v799_v9, %v746_v62  ;;  %v1063_v62 = vld [vmem:[#allocation2 + $0x30] sm:$0xff] }
 0x24e   :  { %v4733_v8 = vadd.f32 %v800_v39, %v4514_v11  ;;  %v1100_v39 = vld [vmem:[#allocation2 + $0x158] sm:$0xff] }
 0x250   :  { %848 = vmatmul.f32.vlgmr.msrb.gmra.mxu1 %v4733_v8  ;;  %894 = vmatmul.f32.vlgmr.msrb.gmra.mxu3 %v4733_v8  ;;  %v902_v17 = vmul.f32 %v4733_v8, %v4733_v8 }
 0x251   :  { %1150 = vmatpush.msrb.mxu1 %v1119_v23  ;;  %1196 = vmatpush.msrb.mxu3 %v1120_v26  ;;  %v1094_v23 = vld [vmem:[#allocation2 + $0x128] sm:$0xff]  ;;  %v1091_v26 = vld [vmem:[#allocation2 + $0x110] sm:$0xff] }
 0x253   :  { %v802_v15 = vpop.f32.mrf.mxu3  ;;  %1151 = vmatpush.msrb.mxu1 %v1117_v28  ;;  %1197 = vmatpush.msrb.mxu3 %v1118_v30  ;;  %v1089_v30 = vld [vmem:[#allocation2 + $0x100] sm:$0xff] }
 0x254   :  { %v803_v16 = vadd.f32 %v802_v15, %v751_v12  ;;  %v1059_v15 = vld [vmem:[#allocation2 + $0x10] sm:$0xff] }
 0x255   :  { %1152 = vmatpush.msrb.mxu1 %v1115_v32  ;;  %1198 = vmatpush.msrb.mxu3 %v1116_v34 }
 0x256   :  { %v4738_v63 = vadd.f32 %v803_v16, %v4516_v2  ;;  %v1085_v2 = vld [vmem:[#allocation2 + $0xe0] sm:$0xff] }
 0x257   :  { %1128 = vmatpush.msrb.mxu0 %v1085_v2  ;;  %1153 = vmatpush.msrb.mxu1 %v1113_v42  ;;  %v1097_v16 = vld [vmem:[#allocation2 + $0x140] sm:$0xff]  ;;  %v1095_v2 = vld [vmem:[#allocation2 + $0x130] sm:$0xff] }
 0x258   :  { %851 = vmatmul.f32.gmra.mxu1 %v4738_v63  ;;  %897 = vmatmul.f32.gmra.mxu3 %v4738_v63  ;;  %v904_v11 = vmul.f32 %v4738_v63, %v4738_v63 }
 0x259   :  { %1129 = vmatpush.msrb.mxu0 %v1083_v20  ;;  %1199 = vmatpush.msrb.mxu3 %v1114_v7 }
 0x25a   :  { %1154 = vmatpush.msrb.mxu1 %v1111_v25 }
 0x25b   :  { %1130 = vmatpush.msrb.mxu0 %v1081_v51  ;;  %1200 = vmatpush.msrb.mxu3 %v1112_v40  ;;  %v1093_v51 = vld [vmem:[#allocation2 + $0x120] sm:$0xff] }
 0x25c   :  { %1155 = vmatpush.msrb.mxu1 %v1109_v44 }
 0x25d   :  { %1131 = vmatpush.msrb.mxu0 %v1079_v27  ;;  %1201 = vmatpush.msrb.mxu3 %v1110_v48  ;;  %v1092_v27 = vld [vmem:[#allocation2 + $0x118] sm:$0xff] }
 0x25e   :  { %1156 = vmatpush.msrb.mxu1 %v1107_v50 }
 0x25f   :  { %1132 = vmatpush.msrb.mxu0 %v1077_v31  ;;  %1202 = vmatpush.msrb.mxu3 %v1108_v53  ;;  %v1090_v31 = vld [vmem:[#allocation2 + $0x108] sm:$0xff] }
 0x260   :  { %944 = vmatmul.f32.vlgmr.msra.gmra.mxu1 %v902_v17  ;;  %990 = vmatmul.f32.vlgmr.msra.gmra.mxu3 %v902_v17  ;;  %v1060_v17 = vld [vmem:[#allocation2 + $0x18] sm:$0xff] }
 0x261   :  { %1133 = vmatpush.msrb.mxu0 %v1075_v38  ;;  %1157 = vmatpush.msrb.mxu1 %v1105_v56 }
 0x262   :  { %1203 = vmatpush.msrb.mxu3 %v1106_v59  ;;  %1187 = vmatpush.msrb.mxu2 %v1060_v17 }
 0x263   :  { %1134 = vmatpush.msrb.mxu0 %v1073_v47  ;;  %1158 = vmatpush.msrb.mxu1 %v1103_v3 }
 0x264   :  { %1204 = vmatpush.msrb.mxu3 %v1104_v10  ;;  %1188 = vmatpush.msrb.mxu2 %v1058_v19 }
 0x265   :  { %1135 = vmatpush.msrb.mxu0 %v1071_v41  ;;  %1159 = vmatpush.msrb.mxu1 %v1101_v1 }
 0x266   :  { %1205 = vmatpush.msrb.mxu3 %v1102_v13 }
 0x267   :  { %1136 = vmatpush.msrb.mxu0 %v1069_v49  ;;  %1160 = vmatpush.msrb.mxu1 %v1099_v22 }
 0x268   :  { %947 = vmatmul.f32.gmra.mxu1 %v904_v11  ;;  %993 = vmatmul.f32.gmra.mxu3 %v904_v11 }
 0x269   :  { %1137 = vmatpush.msrb.mxu0 %v1067_v55  ;;  %1206 = vmatpush.msrb.mxu3 %v1100_v39 }
 0x26a   :  { %1161 = vmatpush.msrb.mxu1 %v1097_v16 }
 0x26b   :  { %1138 = vmatpush.msrb.mxu0 %v1065_v61  ;;  %1207 = vmatpush.msrb.mxu3 %v1098_v54 }
 0x26c   :  { %1162 = vmatpush.msrb.mxu1 %v1095_v2 }
 0x26d   :  { %1139 = vmatpush.msrb.mxu0 %v1063_v62  ;;  %1208 = vmatpush.msrb.mxu3 %v1096_v21 }
 0x26e   :  { %1163 = vmatpush.msrb.mxu1 %v1093_v51 }
 0x26f   :  { %1140 = vmatpush.msrb.mxu0 %v1061_v0  ;;  %1209 = vmatpush.msrb.mxu3 %v1094_v23 }
 0x270   :  { %1164 = vmatpush.msrb.mxu1 %v1091_v26 }
 0x271   :  { %1141 = vmatpush.msrb.mxu0 %v1059_v15  ;;  %1210 = vmatpush.msrb.mxu3 %v1092_v27 }
 0x272   :  { %1165 = vmatpush.msrb.mxu1 %v1089_v30 }
 0x273   :  { %1142 = vmatpush.msrb.mxu0 %v1057_v18  ;;  %1211 = vmatpush.msrb.mxu3 %v1090_v31 }
 0x2ac   :  { %v4746_v37 = vpop.f32.mrf.mxu0 }
 0x2b2   :  { %v4748_v58 = vpop.f32.mrf.mxu2 }
 0x2b4   :  { %v829_v12 = vpop.f32.mrf.mxu0 }
 0x2ba   :  { %v875_v20 = vpop.f32.mrf.mxu2 }
 0x2bc   :  { %v922_v28 = vpop.f32.mrf.mxu0 }
 0x2c2   :  { %v968_v43 = vpop.f32.mrf.mxu2 }
 0x2c4   :  { %v925_v40 = vpop.f32.mrf.mxu0 }
 0x2ca   :  { %v971_v56 = vpop.f32.mrf.mxu2 }
 0x2cd   :  { %v849_v60 = vpop.f32.mrf.mxu1 }
 0x2ce   :  { %v850_v24 = vadd.f32 %v849_v60, %v4746_v37 }
 0x2d0   :  { %v997_v33 = vmul.f32 %v850_v24, %v850_v24  ;;  %v1005_v29 = vsub.f32 %v4719_v6, %v850_v24 }
 0x2d3   :  { %v895_v9 = vpop.f32.mrf.mxu3 }
 0x2d4   :  { %v4752_v38 = vadd.f32 %v895_v9, %v4748_v58 }
 0x2d5   :  { %v852_v11 = vpop.f32.mrf.mxu1 }
 0x2d6   :  { %v4754_v7 = vadd.f32 %v852_v11, %v829_v12  ;;  %v998_v35 = vmul.f32 %v4752_v38, %v4752_v38 }
 0x2d8   :  { %v999_v44 = vmul.f32 %v4754_v7, %v4754_v7  ;;  %v1007_v24 = vsub.f32 %v4724_v14, %v4754_v7  ;;  %v1352_v7 = vld [vmem:[#allocation5 + $0xe8] sm:$0xff] }
 0x2db   :  { %v898_v36 = vpop.f32.mrf.mxu3 }
 0x2dc   :  { %v4760_v49 = vadd.f32 %v898_v36, %v875_v20  ;;  %v1006_v20 = vsub.f32 %v4733_v8, %v4752_v38  ;;  %v1353_v38 = vld [vmem:[#allocation5 + $0xf0] sm:$0xff] }
 0x2dd   :  { %v945_v32 = vpop.f32.mrf.mxu1  ;;  %1393 = vmatpush.msra.mxu0 %v1353_v38  ;;  %v1329_v38 = vld [vmem:[#allocation5 + $0x30] sm:$0xff] }
 0x2de   :  { %v946_v34 = vadd.f32 %v945_v32, %v922_v28  ;;  %v1000_v60 = vmul.f32 %v4760_v49, %v4760_v49  ;;  %v1008_v32 = vsub.f32 %v4738_v63, %v4760_v49  ;;  %v1346_v49 = vld [vmem:[#allocation5 + $0xb8] sm:$0xff] }
 0x2e0   :  { %v1001_v42 = vsub.f32 %v946_v34, %v997_v33 }
 0x2e2   :  { %v1009_v47 = vadd.f32 1e-05, %v1001_v42  ;;  %v1354_v42 = vld [vmem:[#allocation5 + $0xf8] sm:$0xff] }
 0x2e3   :  { %v991_v25 = vpop.f32.mrf.mxu3  ;;  %1439 = vmatpush.msra.mxu2 %v1354_v42  ;;  %v1367_v42 = vld [vmem:[#allocation5 + $0x160] sm:$0xff] }
 0x2e4   :  { %3654 = vrsqrt.f32 %v1009_v47  ;;  %v992_v37 = vadd.f32 %v991_v25, %v968_v43  ;;  %vm1019_vm13 = vweird.f32 %v1009_v47  ;;  %v1351_v43 = vld [vmem:[#allocation5 + $0xe0] sm:$0xff]  ;;  %v1350_v25 = vld [vmem:[#allocation5 + $0xd8] sm:$0xff] }
 0x2e5   :  { %v948_v41 = vpop.f32.mrf.mxu1  ;;  %1394 = vmatpush.msra.mxu0 %v1351_v43  ;;  %1440 = vmatpush.msra.mxu2 %v1352_v7  ;;  %v1330_v43 = vld [vmem:[#allocation5 + $0x38] sm:$0xff] }
 0x2e6   :  { %v1002_v46 = vsub.f32 %v992_v37, %v998_v35  ;;  %v949_v48 = vadd.f32 %v948_v41, %v925_v40  ;;  %v1347_v35 = vld [vmem:[#allocation5 + $0xc0] sm:$0xff]  ;;  %v1385_v37 = vld [vmem:[#allocation5 + $0x1f0] sm:$0xff]  ;;  %v1348_v40 = vld [vmem:[#allocation5 + $0xc8] sm:$0xff] }
 0x2e7   :  { %1441 = vmatpush.msra.mxu2 %v1350_v25  ;;  %v4774_v41 = vld [vmem:[%s5502_s8] sm:$0x3]  ;;  %1416 = vmatpush.msra.mxu1 %v1385_v37  ;;  %v1368_v25 = vld [vmem:[#allocation5 + $0x168] sm:$0xff] }
 0x2e8   :  { %v1010_v50 = vadd.f32 1e-05, %v1002_v46  ;;  %v1003_v52 = vsub.f32 %v949_v48, %v999_v44  ;;  %v1386_v44 = vld [vmem:[#allocation5 + $0x1f8] sm:$0xff]  ;;  %v1345_v46 = vld [vmem:[#allocation5 + $0xb0] sm:$0xff]  ;;  %v1383_v48 = vld [vmem:[#allocation5 + $0x1e0] sm:$0xff] }
 0x2e9   :  { %1442 = vmatpush.msra.mxu2 %v1348_v40  ;;  %1462 = vmatpush.msra.mxu3 %v1386_v44  ;;  %v1327_v40 = vld [vmem:[#allocation5 + $0x20] sm:$0xff]  ;;  %v1365_v44 = vld [vmem:[#allocation5 + $0x150] sm:$0xff] }
 0x2ea   :  { %v3655_v53 = vpop.eup %3654  ;;  %3656 = vrsqrt.f32 %v1010_v50  ;;  %v1011_v55 = vadd.f32 1e-05, %v1003_v52  ;;  %vm1029_vm0 = vweird.f32 %v1010_v50  ;;  %1417 = vmatpush.msra.mxu1 %v1383_v48  ;;  %v1343_v52 = vld [vmem:[#allocation5 + $0xa0] sm:$0xff] }
 0x2eb   :  { %v1014_v57 = vmul.f32 %v3655_v53, %v1009_v47  ;;  %v994_v58 = vpop.f32.mrf.mxu3  ;;  %vm1020_vm12 = vweird.f32 %v3655_v53  ;;  %v1349_v47 = vld [vmem:[#allocation5 + $0xd0] sm:$0xff]  ;;  %1443 = vmatpush.msra.mxu2 %v1346_v49  ;;  %v1366_v49 = vld [vmem:[#allocation5 + $0x158] sm:$0xff] }
 0x2ec   :  { %3658 = vrsqrt.f32 %v1011_v55  ;;  %v995_v59 = vadd.f32 %v994_v58, %v971_v56  ;;  %vm1021_vm14 = vmor %vm1019_vm13, %vm1020_vm12  ;;  %vm1039_vm3 = vweird.f32 %v1011_v55  ;;  %1395 = vmatpush.msra.mxu0 %v1349_v47  ;;  %v1123_v56 = vperm.slane %v4774_v41, 0  ;;  %v1382_v58 = vld [vmem:[#allocation5 + $0x1d8] sm:$0xff] }
 0x2ed   :  { %v1015_v61 = vmul.f32 %v3655_v53, %v1014_v57 }
 0x2ee   :  { %v1004_v3 = vsub.f32 %v995_v59, %v1000_v60  ;;  %1396 = vmatpush.msra.mxu0 %v1347_v35  ;;  %v1341_v60 = vld [vmem:[#allocation5 + $0x90] sm:$0xff]  ;;  %v1379_v59 = vld [vmem:[#allocation5 + $0x1c0] sm:$0xff] }
 0x2ef   :  { %v1016_v4 = vmul.f32 0.5, %v1015_v61  ;;  %v1342_v61 = vld [vmem:[#allocation5 + $0x98] sm:$0xff] }
 0x2f0   :  { %v3657_v10 = vpop.eup %3656  ;;  %v1012_v62 = vadd.f32 1e-05, %v1004_v3  ;;  %1397 = vmatpush.msra.mxu0 %v1345_v46  ;;  %v1380_v3 = vld [vmem:[#allocation5 + $0x1c8] sm:$0xff] }
 0x2f1   :  { %v1017_v1 = vsub.f32 1.5, %v1016_v4  ;;  %v1024_v5 = vmul.f32 %v3657_v10, %v1010_v50  ;;  %vm1030_vm15 = vweird.f32 %v3657_v10  ;;  %v1384_v50 = vld [vmem:[#allocation5 + $0x1e8] sm:$0xff]  ;;  %v1339_v4 = vld [vmem:[#allocation5 + $0x80] sm:$0xff] }
 0x2f2   :  { %v3659_v12 = vpop.eup %3658  ;;  %3660 = vrsqrt.f32 %v1012_v62  ;;  %vm1031_vm2 = vmor %vm1029_vm0, %vm1030_vm15  ;;  %vm1049_vm7 = vweird.f32 %v1012_v62  ;;  %1463 = vmatpush.msra.mxu3 %v1384_v50  ;;  %1398 = vmatpush.msra.mxu0 %v1343_v52  ;;  %v1328_v46 = vld [vmem:[#allocation5 + $0x28] sm:$0xff]  ;;  %v1325_v52 = vld [vmem:[#allocation5 + $0x10] sm:$0xff] }
 0x2f3   :  { %v1018_v13 = vmul.f32 %v3655_v53, %v1017_v1  ;;  %v1025_v0 = vmul.f32 %v3657_v10, %v1024_v5  ;;  %v1034_v22 = vmul.f32 %v3659_v12, %v1011_v55  ;;  %vm1040_vm1 = vweird.f32 %v3659_v12  ;;  %v1344_v55 = vld [vmem:[#allocation5 + $0xa8] sm:$0xff]  ;;  %v1378_v5 = vld [vmem:[#allocation5 + $0x1b8] sm:$0xff] }
 0x2f4   :  { %vm1041_vm5 = vmor %vm1039_vm3, %vm1040_vm1  ;;  %1444 = vmatpush.msra.mxu2 %v1344_v55  ;;  %1464 = vmatpush.msra.mxu3 %v1382_v58  ;;  %v1326_v55 = vld [vmem:[#allocation5 + $0x18] sm:$0xff]  ;;  %v1364_v58 = vld [vmem:[#allocation5 + $0x148] sm:$0xff] }
 0x2f5   :  { %v1026_v9 = vmul.f32 0.5, %v1025_v0  ;;  %v1035_v39 = vmul.f32 %v3659_v12, %v1034_v22  ;;  %v1022_v15 = vsel %vm1021_vm14, %v3655_v53, %v1018_v13  ;;  %v1381_v53 = vld [vmem:[#allocation5 + $0x1d0] sm:$0xff]  ;;  %1399 = vmatpush.msra.mxu0 %v1341_v60  ;;  %v1375_v22 = vld [vmem:[#allocation5 + $0x1a0] sm:$0xff] }
 0x2f6   :  { %v1053_v16 = vmul.f32 %v1022_v15, %v1005_v29  ;;  %1418 = vmatpush.msra.mxu1 %v1381_v53  ;;  %1445 = vmatpush.msra.mxu2 %v1342_v61  ;;  %v1337_v0 = vld [vmem:[#allocation5 + $0x70] sm:$0xff]  ;;  %v1338_v29 = vld [vmem:[#allocation5 + $0x78] sm:$0xff]  ;;  %v1376_v15 = vld [vmem:[#allocation5 + $0x1a8] sm:$0xff] }
 0x2f7   :  { %v1027_v17 = vsub.f32 1.5, %v1026_v9  ;;  %v1036_v11 = vmul.f32 0.5, %v1035_v39  ;;  %1465 = vmatpush.msra.mxu3 %v1380_v3  ;;  %1400 = vmatpush.msra.mxu0 %v1339_v4  ;;  %v1124_v39 = vperm.slane %v4774_v41, 1  ;;  %v1363_v53 = vld [vmem:[#allocation5 + $0x140] sm:$0xff]  ;;  %v1361_v3 = vld [vmem:[#allocation5 + $0x130] sm:$0xff]  ;;  %v1324_v4 = vld [vmem:[#allocation5 + $0x8] sm:$0xff] }
 0x2f8   :  { %v3661_v54 = vpop.eup %3660  ;;  %1143 = vmatmul.f32.vlgmr.msrb.gmra.mxu0 %v1053_v16  ;;  %1189 = vmatmul.f32.vlgmr.msrb.gmra.mxu2 %v1053_v16  ;;  %v1335_v16 = vld [vmem:[#allocation5 + $0x60] sm:$0xff] }
 0x2f9   :  { %v1028_v18 = vmul.f32 %v3657_v10, %v1027_v17  ;;  %v1044_v2 = vmul.f32 %v3661_v54, %v1012_v62  ;;  %v1037_v19 = vsub.f32 1.5, %v1036_v11  ;;  %vm1050_vm6 = vweird.f32 %v3661_v54  ;;  %1419 = vmatpush.msra.mxu1 %v1379_v59  ;;  %v1340_v62 = vld [vmem:[#allocation5 + $0x88] sm:$0xff]  ;;  %1466 = vmatpush.msra.mxu3 %v1378_v5  ;;  %v1373_v17 = vld [vmem:[#allocation5 + $0x190] sm:$0xff]  ;;  %v1323_v61 = vld [vmem:[#allocation5] sm:$0xff] }
 0x2fa   :  { %vm1051_vm8 = vmor %vm1049_vm7, %vm1050_vm6  ;;  %1446 = vmatpush.msra.mxu2 %v1340_v62  ;;  %1401 = vmatpush.msra.mxu0 %v1337_v0  ;;  %v1336_v11 = vld [vmem:[#allocation5 + $0x68] sm:$0xff]  ;;  %v1359_v41 = vld [vmem:[#allocation5 + $0x120] sm:$0xff] }
 0x2fb   :  { %v1045_v21 = vmul.f32 %v3661_v54, %v1044_v2  ;;  %v1032_v51 = vsel %vm1031_vm2, %v3657_v10, %v1028_v18  ;;  %v1038_v23 = vmul.f32 %v3659_v12, %v1037_v19  ;;  %v1377_v10 = vld [vmem:[#allocation5 + $0x1b0] sm:$0xff]  ;;  %1467 = vmatpush.msra.mxu3 %v1376_v15  ;;  %v1374_v18 = vld [vmem:[#allocation5 + $0x198] sm:$0xff]  ;;  %v1371_v19 = vld [vmem:[#allocation5 + $0x180] sm:$0xff] }
 0x2fc   :  { %v1054_v26 = vmul.f32 %v1032_v51, %v1006_v20  ;;  %1420 = vmatpush.msra.mxu1 %v1377_v10  ;;  %1447 = vmatpush.msra.mxu2 %v1338_v29  ;;  %v1333_v2 = vld [vmem:[#allocation5 + $0x50] sm:$0xff]  ;;  %v1334_v20 = vld [vmem:[#allocation5 + $0x58] sm:$0xff] }
 0x2fd   :  { %v1042_v27 = vsel %vm1041_vm5, %v3659_v12, %v1038_v23  ;;  %v1046_v28 = vmul.f32 0.5, %v1045_v21  ;;  %1402 = vmatpush.msra.mxu0 %v1335_v16  ;;  %1468 = vmatpush.msra.mxu3 %v1374_v18  ;;  %v1357_v15 = vld [vmem:[#allocation5 + $0x110] sm:$0xff]  ;;  %v1358_v16 = vld [vmem:[#allocation5 + $0x118] sm:$0xff]  ;;  %v1356_v18 = vld [vmem:[#allocation5 + $0x108] sm:$0xff] }
 0x2fe   :  { %1166 = vmatmul.f32.vlgmr.msrb.gmra.mxu1 %v1054_v26  ;;  %1212 = vmatmul.f32.vlgmr.msrb.gmra.mxu3 %v1054_v26  ;;  %v1055_v36 = vmul.f32 %v1042_v27, %v1007_v24  ;;  %v1372_v24 = vld [vmem:[#allocation5 + $0x188] sm:$0xff]  ;;  %v1331_v27 = vld [vmem:[#allocation5 + $0x40] sm:$0xff] }
 0x2ff   :  { %v1047_v30 = vsub.f32 1.5, %v1046_v28  ;;  %1421 = vmatpush.msra.mxu1 %v1375_v22  ;;  %1448 = vmatpush.msra.mxu2 %v1336_v11  ;;  %v1369_v28 = vld [vmem:[#allocation5 + $0x170] sm:$0xff]  ;;  %v1355_v11 = vld [vmem:[#allocation5 + $0x100] sm:$0xff] }
 0x300   :  { %1146 = vmatmul.f32.gmra.mxu0 %v1055_v36  ;;  %1192 = vmatmul.f32.gmra.mxu2 %v1055_v36  ;;  %v1332_v36 = vld [vmem:[#allocation5 + $0x48] sm:$0xff] }
 0x301   :  { %v1048_v31 = vmul.f32 %v3661_v54, %v1047_v30  ;;  %1422 = vmatpush.msra.mxu1 %v1373_v17  ;;  %1403 = vmatpush.msra.mxu0 %v1333_v2 }
 0x302   :  { %1449 = vmatpush.msra.mxu2 %v1334_v20  ;;  %1469 = vmatpush.msra.mxu3 %v1372_v24 }
 0x303   :  { %v1052_v33 = vsel %vm1051_vm8, %v3661_v54, %v1048_v31  ;;  %1423 = vmatpush.msra.mxu1 %v1371_v19  ;;  %1404 = vmatpush.msra.mxu0 %v1331_v27 }
 0x304   :  { %v1056_v34 = vmul.f32 %v1052_v33, %v1008_v32  ;;  %v1370_v32 = vld [vmem:[#allocation5 + $0x178] sm:$0xff]  ;;  %1450 = vmatpush.msra.mxu2 %v1332_v36 }
 0x305   :  { %1424 = vmatpush.msra.mxu1 %v1369_v28  ;;  %1470 = vmatpush.msra.mxu3 %v1370_v32 }
 0x306   :  { %1169 = vmatmul.f32.gmra.mxu1 %v1056_v34  ;;  %1215 = vmatmul.f32.gmra.mxu3 %v1056_v34 }
 0x307   :  { %1405 = vmatpush.msra.mxu0 %v1329_v38  ;;  %1425 = vmatpush.msra.mxu1 %v1367_v42 }
 0x308   :  { %1451 = vmatpush.msra.mxu2 %v1330_v43  ;;  %1471 = vmatpush.msra.mxu3 %v1368_v25 }
 0x309   :  { %1406 = vmatpush.msra.mxu0 %v1327_v40  ;;  %1426 = vmatpush.msra.mxu1 %v1365_v44 }
 0x30a   :  { %1452 = vmatpush.msra.mxu2 %v1328_v46  ;;  %1472 = vmatpush.msra.mxu3 %v1366_v49 }
 0x30b   :  { %1407 = vmatpush.msra.mxu0 %v1325_v52  ;;  %1427 = vmatpush.msra.mxu1 %v1363_v53 }
 0x30c   :  { %1453 = vmatpush.msra.mxu2 %v1326_v55  ;;  %1473 = vmatpush.msra.mxu3 %v1364_v58 }
 0x30d   :  { %1408 = vmatpush.msra.mxu0 %v1323_v61  ;;  %1428 = vmatpush.msra.mxu1 %v1361_v3 }
 0x30e   :  { %1454 = vmatpush.msra.mxu2 %v1324_v4 }
 0x30f   :  { %1429 = vmatpush.msra.mxu1 %v1359_v41 }
 0x311   :  { %1430 = vmatpush.msra.mxu1 %v1357_v15 }
 0x313   :  { %1431 = vmatpush.msra.mxu1 %v1355_v11 }
 0x375   :  { %v1144_v57 = vpop.f32.mrf.mxu0 }
 0x376   :  { %v1145_v1 = vadd.f32 %v1144_v57, %v1123_v56 }
 0x37b   :  { %v1167_v12 = vpop.f32.mrf.mxu1  ;;  %v1190_v13 = vpop.f32.mrf.mxu2 }
 0x37c   :  { %v4779_v9 = vadd.f32 %v1167_v12, %v1145_v1  ;;  %v1191_v51 = vadd.f32 %v1190_v13, %v1124_v39  ;;  %v1362_v1 = vld [vmem:[#allocation5 + $0x138] sm:$0xff]  ;;  %v1360_v12 = vld [vmem:[#allocation5 + $0x128] sm:$0xff] }
 0x37d   :  { %v1147_v23 = vpop.f32.mrf.mxu0  ;;  %1474 = vmatpush.msra.mxu3 %v1362_v1 }
 0x37e   :  { %v4783_v54 = vmul.f32 0.70710677, %v4779_v9  ;;  %v1148_v33 = vadd.f32 %v1147_v23, %v1123_v56 }
 0x37f   :  { %1475 = vmatpush.msra.mxu3 %v1360_v12 }
 0x380   :  { %v4786_v21 = vand.u32 2147483647, %v4783_v54  ;;  %vm1303_vm9 = vcmp.ge.f32.partialorder %v4783_v54, 0.0 }
 0x381   :  { %v1213_v26 = vpop.f32.mrf.mxu3  ;;  %1476 = vmatpush.msra.mxu3 %v1358_v16 }
 0x382   :  { %v1231_v30 = vmul.f32 0.3275911, %v4786_v21  ;;  %v4791_v31 = vadd.f32 %v1213_v26, %v1191_v51  ;;  %v1279_v0 = vsub.f32 0.0, %v4786_v21 }
 0x383   :  { %v1170_v34 = vpop.f32.mrf.mxu1  ;;  %v1193_v37 = vpop.f32.mrf.mxu2  ;;  %1477 = vmatpush.msra.mxu3 %v1356_v18 }
 0x384   :  { %v1235_v7 = vadd.f32 1.0, %v1231_v30  ;;  %v4796_v47 = vmul.f32 0.70710677, %v4791_v31  ;;  %v4798_v35 = vadd.f32 %v1170_v34, %v1148_v33  ;;  %v1194_v57 = vadd.f32 %v1193_v37, %v1124_v39 }
 0x385   :  { %v1283_v19 = vmul.f32 %v1279_v0, %v4786_v21 }
 0x386   :  { %3662 = vrcp.f32 %v1235_v7  ;;  %v4801_v48 = vand.u32 2147483647, %v4796_v47  ;;  %v4804_v50 = vmul.f32 0.70710677, %v4798_v35  ;;  %vm1304_vm10 = vcmp.ge.f32.partialorder %v4796_v47, 0.0 }
 0x387   :  { %v1287_v36 = vmul.f32 1.442695, %v1283_v19 }
 0x388   :  { %v1232_v56 = vmul.f32 0.3275911, %v4801_v48  ;;  %v1229_v60 = vand.u32 2147483647, %v4804_v50  ;;  %v1280_v24 = vsub.f32 0.0, %v4801_v48  ;;  %vm1305_vm11 = vcmp.ge.f32.partialorder %v4804_v50, 0.0 }
 0x389   :  { %v1216_v59 = vpop.f32.mrf.mxu3 }
 0x38a   :  { %v1236_v10 = vadd.f32 1.0, %v1232_v56  ;;  %v4810_v62 = vadd.f32 %v1216_v59, %v1194_v57  ;;  %v1233_v5 = vmul.f32 0.3275911, %v1229_v60  ;;  %v1281_v34 = vsub.f32 0.0, %v1229_v60 }
 0x38b   :  { %v1284_v38 = vmul.f32 %v1280_v24, %v4801_v48 }
 0x38c   :  { %v3663_v13 = vpop.eup %3662  ;;  %3664 = vrcp.f32 %v1236_v10  ;;  %v4814_v22 = vmul.f32 0.70710677, %v4810_v62  ;;  %v1237_v39 = vadd.f32 1.0, %v1233_v5  ;;  %v1285_v40 = vmul.f32 %v1281_v34, %v1229_v60 }
 0x38d   :  { %v1243_v29 = vmul.f32 1.0614054, %v3663_v13  ;;  %v1289_v46 = vmul.f32 1.442695, %v1284_v38 }
 0x38e   :  { %v1230_v17 = vand.u32 2147483647, %v4814_v22  ;;  %3666 = vrcp.f32 %v1237_v39  ;;  %v1291_v61 = vmul.f32 1.442695, %v1285_v40  ;;  %v1221_v40 = vmul.f32 0.5, %v4798_v35 }
 0x38f   :  { %v1247_v2 = vadd.f32 -1.4531521, %v1243_v29  ;;  %vm1306_vm12 = vcmp.ge.f32.partialorder %v4814_v22, 0.0  ;;  %v1387_v35 = vld [vmem:[%s5504_s10] sm:$0x3] }
 0x390   :  { %v1234_v20 = vmul.f32 0.3275911, %v1230_v17  ;;  %v1282_v49 = vsub.f32 0.0, %v1230_v17 }
 0x391   :  { %v1251_v51 = vmul.f32 %v3663_v13, %v1247_v2 }
 0x392   :  { %v3665_v23 = vpop.eup %3664  ;;  %v1238_v26 = vadd.f32 1.0, %v1234_v20  ;;  %v1286_v4 = vmul.f32 %v1282_v49, %v1230_v17 }
 0x393   :  { %v1255_v27 = vadd.f32 1.4214138, %v1251_v51  ;;  %v1244_v28 = vmul.f32 1.0614054, %v3665_v23  ;;  %v1219_v51 = vmul.f32 0.5, %v4779_v9  ;;  %v1220_v9 = vmul.f32 0.5, %v4791_v31 }
 0x394   :  { %3668 = vrcp.f32 %v1238_v26  ;;  %v3667_v30 = vpop.eup %3666  ;;  %v1293_v39 = vmul.f32 1.442695, %v1286_v4 }
 0x395   :  { %v1259_v32 = vmul.f32 %v3663_v13, %v1255_v27  ;;  %v1248_v33 = vadd.f32 -1.4531521, %v1244_v28  ;;  %v1245_v42 = vmul.f32 1.0614054, %v3667_v30  ;;  %3670 = vpow2.f32 %v1287_v36 }
 0x396   :  { %3672 = vpow2.f32 %v1289_v46 }
 0x397   :  { %v1263_v21 = vadd.f32 -0.28449672, %v1259_v32  ;;  %v1252_v43 = vmul.f32 %v3665_v23, %v1248_v33  ;;  %v1249_v7 = vadd.f32 -1.4531521, %v1245_v42  ;;  %3674 = vpow2.f32 %v1291_v61 }
 0x398   :  { %3676 = vpow2.f32 %v1293_v39  ;;  %v1390_v61 = vperm.slane %v1387_v35, 1 }
 0x399   :  { %v1267_v25 = vmul.f32 %v3663_v13, %v1263_v21  ;;  %v1256_v37 = vadd.f32 1.4214138, %v1252_v43  ;;  %v1253_v52 = vmul.f32 %v3667_v30, %v1249_v7 }
 0x39a   :  { %v3669_v44 = vpop.eup %3668 }
 0x39b   :  { %v1271_v53 = vadd.f32 0.2548296, %v1267_v25  ;;  %v1260_v55 = vmul.f32 %v3665_v23, %v1256_v37  ;;  %v1246_v56 = vmul.f32 1.0614054, %v3669_v44  ;;  %v1257_v57 = vadd.f32 1.4214138, %v1253_v52  ;;  %v3671_v3 = vpop.eup %3670 }
 0x39c   :  { %v3673_v18 = vpop.eup %3672 }
 0x39d   :  { %v1275_v58 = vmul.f32 %v3663_v13, %v1271_v53  ;;  %v1264_v59 = vadd.f32 -0.28449672, %v1260_v55  ;;  %v1250_v48 = vadd.f32 -1.4531521, %v1246_v56  ;;  %v1261_v10 = vmul.f32 %v3667_v30, %v1257_v57  ;;  %v3675_v27 = vpop.eup %3674 }
 0x39e   :  { %v3677_v21 = vpop.eup %3676  ;;  %v1389_v56 = vperm.slane %v1387_v35, 0 }
 0x39f   :  { %v1295_v1 = vmul.f32 %v3671_v3, %v1275_v58  ;;  %v1268_v5 = vmul.f32 %v3665_v23, %v1264_v59  ;;  %v1254_v41 = vmul.f32 %v3669_v44, %v1250_v48  ;;  %v1265_v60 = vadd.f32 -0.28449672, %v1261_v10 }
 0x3a1   :  { %v1299_v12 = vsub.f32 1.0, %v1295_v1  ;;  %v1272_v0 = vadd.f32 0.2548296, %v1268_v5  ;;  %v1258_v29 = vadd.f32 1.4214138, %v1254_v41  ;;  %v1269_v15 = vmul.f32 %v3667_v30, %v1265_v60 }
 0x3a3   :  { %v1307_v16 = vsub.f32 0.0, %v1299_v12  ;;  %v1276_v11 = vmul.f32 %v3665_v23, %v1272_v0  ;;  %v1262_v13 = vmul.f32 %v3669_v44, %v1258_v29  ;;  %v1273_v2 = vadd.f32 0.2548296, %v1269_v15 }
 0x3a5   :  { %v1311_v19 = vsel %vm1303_vm9, %v1299_v12, %v1307_v16  ;;  %v1296_v17 = vmul.f32 %v3673_v18, %v1276_v11  ;;  %v1266_v20 = vadd.f32 -0.28449672, %v1262_v13  ;;  %v1277_v26 = vmul.f32 %v3667_v30, %v1273_v2 }
 0x3a6   :  { %v1315_v24 = vadd.f32 1.0, %v1311_v19 }
 0x3a7   :  { %v1300_v28 = vsub.f32 1.0, %v1296_v17  ;;  %v1270_v36 = vmul.f32 %v3669_v44, %v1266_v20  ;;  %v1297_v33 = vmul.f32 %v3675_v27, %v1277_v26 }
 0x3a8   :  { %v1319_v32 = vmul.f32 %v1315_v24, %v1219_v51 }
 0x3a9   :  { %v1308_v34 = vsub.f32 0.0, %v1300_v28  ;;  %v1274_v23 = vadd.f32 0.2548296, %v1270_v36  ;;  %v1301_v54 = vsub.f32 1.0, %v1297_v33 }
 0x3aa   :  { %1409 = vmatmul.f32.vlgmr.msra.gmra.mxu0 %v1319_v32  ;;  %1455 = vmatmul.f32.vlgmr.msra.gmra.mxu2 %v1319_v32 }
 0x3ab   :  { %v1312_v38 = vsel %vm1304_vm10, %v1300_v28, %v1308_v34  ;;  %v1278_v42 = vmul.f32 %v3669_v44, %v1274_v23  ;;  %v1309_v7 = vsub.f32 0.0, %v1301_v54  ;;  %v1222_v44 = vmul.f32 0.5, %v4810_v62 }
 0x3ac   :  { %v1316_v43 = vadd.f32 1.0, %v1312_v38 }
 0x3ad   :  { %v1298_v30 = vmul.f32 %v3677_v21, %v1278_v42  ;;  %v1313_v37 = vsel %vm1305_vm11, %v1301_v54, %v1309_v7 }
 0x3ae   :  { %v1320_v25 = vmul.f32 %v1316_v43, %v1220_v9  ;;  %v1317_v46 = vadd.f32 1.0, %v1313_v37 }
 0x3af   :  { %v1302_v49 = vsub.f32 1.0, %v1298_v30 }
 0x3b0   :  { %1432 = vmatmul.f32.vlgmr.msra.gmra.mxu1 %v1320_v25  ;;  %1478 = vmatmul.f32.vlgmr.msra.gmra.mxu3 %v1320_v25  ;;  %v1321_v47 = vmul.f32 %v1317_v46, %v1221_v40 }
 0x3b1   :  { %v1310_v52 = vsub.f32 0.0, %v1302_v49 }
 0x3b2   :  { %1412 = vmatmul.f32.gmra.mxu0 %v1321_v47  ;;  %1458 = vmatmul.f32.gmra.mxu2 %v1321_v47 }
 0x3b3   :  { %v1314_v31 = vsel %vm1306_vm12, %v1302_v49, %v1310_v52 }
 0x3b4   :  { %v1318_v53 = vadd.f32 1.0, %v1314_v31 }
 0x3b6   :  { %v1322_v50 = vmul.f32 %v1318_v53, %v1222_v44 }
 0x3b8   :  { %1435 = vmatmul.f32.gmra.mxu1 %v1322_v50  ;;  %1481 = vmatmul.f32.gmra.mxu3 %v1322_v50 }
 0x427   :  { %v1410_v55 = vpop.f32.mrf.mxu0 }
 0x428   :  { %v1411_v59 = vadd.f32 %v1410_v55, %v1389_v56 }
 0x42d   :  { %v1433_v57 = vpop.f32.mrf.mxu1  ;;  %v1456_v58 = vpop.f32.mrf.mxu2 }
 0x42e   :  { %v1434_v48 = vadd.f32 %v1433_v57, %v1411_v59  ;;  %v1457_v10 = vadd.f32 %v1456_v58, %v1390_v61 }
 0x42f   :  { %v1413_v22 = vpop.f32.mrf.mxu0 }
 0x430   :  { %v1414_v4 = vadd.f32 %v1413_v22, %v1389_v56  ;;  %v4832_v1 = vadd.f32 %v1434_v48, %v4719_v6  ;;  %v3543_v56 = vld [vmem:[%s5498_s4 + $0x18] sm:$0xff]  ;;  %v3542_v22 = vld [vmem:[%s5498_s4 + $0x10] sm:$0xff] }
 0x431   :  { %1572 = vperm.xlu2 %3631, %v3543_v56  }
 0x432   :  { %v1505_v0 = vmul.f32 %v4832_v1, %v4832_v1 }
 0x433   :  { %v1479_v3 = vpop.f32.mrf.mxu3 }
 0x434   :  { %v1480_v41 = vadd.f32 %v1479_v3, %v1457_v10 }
 0x435   :  { %v1436_v62 = vpop.f32.mrf.mxu1  ;;  %v1459_v60 = vpop.f32.mrf.mxu2 }
 0x436   :  { %v1437_v5 = vadd.f32 %v1436_v62, %v1414_v4  ;;  %v1460_v15 = vadd.f32 %v1459_v60, %v1390_v61  ;;  %v4844_v16 = vadd.f32 %v1480_v41, %v4733_v8 }
 0x438   :  { %v4835_v12 = vadd.f32 %v1437_v5, %v4724_v14  ;;  %v1506_v17 = vmul.f32 %v4844_v16, %v4844_v16 }
 0x439   :  { %1567 = vperm.xlu2 %3631, %v3542_v22  }
 0x43a   :  { %v1489_v29 = vadd.f32 %v4835_v12, %v4832_v1  ;;  %v1507_v39 = vmul.f32 %v4835_v12, %v4835_v12 }
 0x43b   :  { %v1482_v6 = vpop.f32.mrf.mxu3 }
 0x43c   :  { %v1490_v11 = vrot.slane %v1489_v29, 4  ;;  %v1509_v13 = vadd.f32 %v1507_v39, %v1505_v0  ;;  %v1483_v18 = vadd.f32 %v1482_v6, %v1460_v15  ;;  %v3540_v15 = vld [vmem:[%s5497_s3 + $0x10] sm:$0xff] }
 0x43e   :  { %v1491_v2 = vadd.f32 %v1490_v11, %v1489_v29  ;;  %v1510_v14 = vrot.slane %v1509_v13, 4  ;;  %v4847_v19 = vadd.f32 %v1483_v18, %v4738_v63 }
 0x440   :  { %v1492_v20 = vrot.slane %v1491_v2, 2  ;;  %v1511_v51 = vadd.f32 %v1510_v14, %v1509_v13  ;;  %v1496_v24 = vadd.f32 %v4847_v19, %v4844_v16  ;;  %v1508_v8 = vmul.f32 %v4847_v19, %v4847_v19  ;;  %v4873_v14 = vld [vmem:[#allocation7 + $0xf0] sm:$0xff] }
 0x442   :  { %v1493_v26 = vadd.f32 %v1492_v20, %v1491_v2  ;;  %v1512_v27 = vrot.slane %v1511_v51, 2  ;;  %v1497_v28 = vrot.slane %v1496_v24, 4  ;;  %v1516_v36 = vadd.f32 %v1508_v8, %v1506_v17  ;;  %v4876_v20 = vld [vmem:[#allocation7 + $0xe0] sm:$0xff] }
 0x443   :  { %v3777_v8 = vld [vmem:[#allocation7 + $0xc0] sm:$0xff] }
 0x444   :  { %v1494_v32 = vrot.slane %v1493_v26, 1  ;;  %v1513_v33 = vadd.f32 %v1512_v27, %v1511_v51  ;;  %v1498_v34 = vadd.f32 %v1497_v28, %v1496_v24  ;;  %v1517_v63 = vrot.slane %v1516_v36, 4  ;;  %v3541_v51 = vld [vmem:[%s5497_s3 + $0x18] sm:$0xff]  ;;  %v3776_v24 = vld [vmem:[#allocation7 + $0xd0] sm:$0xff]  ;;  %v3780_v28 = vld [vmem:[#allocation7 + $0x1e0] sm:$0xff] }
 0x445   :  { %v3779_v27 = vld [vmem:[#allocation7 + $0xb0] sm:$0xff] }
 0x446   :  { %v1514_v23 = vrot.slane %v1513_v33, 1  ;;  %v1499_v54 = vrot.slane %v1498_v34, 2  ;;  %v1518_v38 = vadd.f32 %v1517_v63, %v1516_v36  ;;  %v1495_v42 = vadd.f32 %v1494_v32, %v1493_v26  ;;  %v3778_v26 = vld [vmem:[#allocation7 + $0x1f0] sm:$0xff]  ;;  %v3781_v36 = vld [vmem:[#allocation7 + $0xa0] sm:$0xff] }
 0x447   :  { %v3782_v32 = vld [vmem:[#allocation7 + $0x1d0] sm:$0xff]  ;;  %v3785_v63 = vld [vmem:[#allocation7 + $0x80] sm:$0xff] }
 0x448   :  { %v1515_v21 = vadd.f32 %v1514_v23, %v1513_v33  ;;  %v1500_v9 = vadd.f32 %v1499_v54, %v1498_v34  ;;  %v1519_v43 = vrot.slane %v1518_v38, 2  ;;  %v1503_v7 = vmul.f32 %v1495_v42, %v4503_v45  ;;  %v3783_v33 = vld [vmem:[#allocation7 + $0x90] sm:$0xff]  ;;  %v3784_v34 = vld [vmem:[#allocation7 + $0x1c0] sm:$0xff] }
 0x449   :  { %v3786_v23 = vld [vmem:[#allocation7 + $0x1b0] sm:$0xff]  ;;  %v3789_v42 = vld [vmem:[#allocation7 + $0x60] sm:$0xff] }
 0x44a   :  { %v1501_v30 = vrot.slane %v1500_v9, 1  ;;  %v1520_v25 = vadd.f32 %v1519_v43, %v1518_v38  ;;  %v1523_v37 = vmul.f32 %v1515_v21, %v4503_v45  ;;  %v1525_v40 = vmul.f32 %v1503_v7, %v1503_v7  ;;  %v3787_v54 = vld [vmem:[#allocation7 + $0x70] sm:$0xff]  ;;  %v3788_v38 = vld [vmem:[#allocation7 + $0x1a0] sm:$0xff] }
 0x44b   :  { %v1531_v62 = vsub.f32 %v4835_v12, %v1503_v7  ;;  %v1529_v0 = vsub.f32 %v4832_v1, %v1503_v7  ;;  %v3790_v21 = vld [vmem:[#allocation7 + $0x190] sm:$0xff]  ;;  %v3792_v43 = vld [vmem:[#allocation7 + $0x180] sm:$0xff] }
 0x44c   :  { %v1521_v46 = vrot.slane %v1520_v25, 1  ;;  %v1527_v49 = vsub.f32 %v1523_v37, %v1525_v40  ;;  %v1502_v47 = vadd.f32 %v1501_v30, %v1500_v9  ;;  %v3791_v9 = vld [vmem:[#allocation7 + $0x50] sm:$0xff]  ;;  %v3793_v7 = vld [vmem:[#allocation7 + $0x40] sm:$0xff] }
 0x44d   :  { %v3794_v30 = vld [vmem:[#allocation7 + $0x170] sm:$0xff]  ;;  %v3796_v37 = vld [vmem:[#allocation7 + $0x160] sm:$0xff] }
 0x44e   :  { %v1522_v52 = vadd.f32 %v1521_v46, %v1520_v25  ;;  %v1533_v31 = vadd.f32 1e-05, %v1527_v49  ;;  %v1504_v44 = vmul.f32 %v1502_v47, %v4503_v45  ;;  %v3795_v25 = vld [vmem:[#allocation7 + $0x30] sm:$0xff]  ;;  %v3797_v40 = vld [vmem:[#allocation7 + $0x20] sm:$0xff] }
 0x44f   :  { %v3798_v46 = vld [vmem:[#allocation7 + $0x150] sm:$0xff]  ;;  %v3800_v47 = vld [vmem:[#allocation7 + $0x140] sm:$0xff] }
 0x450   :  { %3678 = vrsqrt.f32 %v1533_v31  ;;  %v1524_v53 = vmul.f32 %v1522_v52, %v4503_v45  ;;  %v1526_v50 = vmul.f32 %v1504_v44, %v1504_v44  ;;  %vm1541_vm14 = vweird.f32 %v1533_v31  ;;  %v3799_v49 = vld [vmem:[#allocation7 + $0x10] sm:$0xff]  ;;  %v3801_v52 = vld [vmem:[#allocation7] sm:$0xff] }
 0x451   :  { %v1532_v11 = vsub.f32 %v4847_v19, %v1504_v44  ;;  %v1530_v2 = vsub.f32 %v4844_v16, %v1504_v44  ;;  %v3803_v44 = vld [vmem:[#allocation7 + $0x120] sm:$0xff] }
 0x452   :  { %v1528_v55 = vsub.f32 %v1524_v53, %v1526_v50  ;;  %v3804_v53 = vld [vmem:[#allocation7 + $0x110] sm:$0xff]  ;;  %v3805_v50 = vld [vmem:[#allocation7 + $0x100] sm:$0xff] }
 0x454   :  { %v1534_v35 = vadd.f32 1e-05, %v1528_v55 }
 0x456   :  { %v3679_v57 = vpop.eup %3678  ;;  %3680 = vrsqrt.f32 %v1534_v35  ;;  %vm1551_vm1 = vweird.f32 %v1534_v35 }
 0x457   :  { %v1536_v58 = vmul.f32 %v3679_v57, %v1533_v31  ;;  %vm1542_vm13 = vweird.f32 %v3679_v57  ;;  %v3802_v31 = vld [vmem:[#allocation7 + $0x130] sm:$0xff] }
 0x458   :  { %vm1543_vm15 = vmor %vm1541_vm14, %vm1542_vm13 }
 0x459   :  { %v1537_v59 = vmul.f32 %v3679_v57, %v1536_v58 }
 0x45b   :  { %v1538_v61 = vmul.f32 0.5, %v1537_v59 }
 0x45c   :  { %v3681_v48 = vpop.eup %3680 }
 0x45d   :  { %v1539_v3 = vsub.f32 1.5, %v1538_v61  ;;  %v1546_v45 = vmul.f32 %v3681_v48, %v1534_v35  ;;  %vm1552_vm0 = vweird.f32 %v3681_v48 }
 0x45e   :  { %vm1553_vm2 = vmor %vm1551_vm1, %vm1552_vm0 }
 0x45f   :  { %v1540_v4 = vmul.f32 %v3679_v57, %v1539_v3  ;;  %v1547_v10 = vmul.f32 %v3681_v48, %v1546_v45 }
 0x461   :  { %v1544_v5 = vsel %vm1543_vm15, %v3679_v57, %v1540_v4  ;;  %v1548_v41 = vmul.f32 0.5, %v1547_v10 }
 0x462   :  { %v1557_v60 = vmul.f32 %v1544_v5, %v1531_v62  ;;  %v1555_v39 = vmul.f32 %v1544_v5, %v1529_v0 }
 0x463   :  { %v1549_v29 = vsub.f32 1.5, %v1548_v41 }
 0x464   :  { %1595 = vmatpush.msrb.mxu0 %v1557_v60 }
 0x465   :  { %v1550_v6 = vmul.f32 %v3681_v48, %v1549_v29 }
 0x466   :  { %1596 = vmatpush.msrb.mxu0 %v1555_v39 }
 0x467   :  { %3544 = vmatmul.msk.f32.vlgmr.msrb.gmra.mxu0 %vm582_vm4, %v3540_v15  ;;  %v1554_v13 = vsel %vm1553_vm2, %v3681_v48, %v1550_v6 }
 0x468   :  { %v1558_v18 = vmul.f32 %v1554_v13, %v1532_v11  ;;  %1803 = vmatpush.msra.mxu0 %v4873_v14  ;;  %v1556_v17 = vmul.f32 %v1554_v13, %v1530_v2 }
 0x46a   :  { %1618 = vmatpush.msrb.mxu1 %v1558_v18  ;;  %1804 = vmatpush.msra.mxu0 %v4876_v20 }
 0x46c   :  { %1619 = vmatpush.msrb.mxu1 %v1556_v17  ;;  %1805 = vmatpush.msra.mxu0 %v3776_v24 }
 0x46d   :  { %3546 = vmatmul.msk.f32.vlgmr.msrb.gmra.mxu1 %vm582_vm4, %v3540_v15 }
 0x46e   :  { %1806 = vmatpush.msra.mxu0 %v3777_v8  ;;  %1826 = vmatpush.msra.mxu1 %v3778_v26 }
 0x46f   :  { %3545 = vmatmul.msk.f32.gmra.mxu0 %vm582_vm4, %v3541_v51 }
 0x470   :  { %1807 = vmatpush.msra.mxu0 %v3779_v27  ;;  %1827 = vmatpush.msra.mxu1 %v3780_v28 }
 0x472   :  { %1808 = vmatpush.msra.mxu0 %v3781_v36  ;;  %1828 = vmatpush.msra.mxu1 %v3782_v32 }
 0x474   :  { %1809 = vmatpush.msra.mxu0 %v3783_v33  ;;  %1829 = vmatpush.msra.mxu1 %v3784_v34 }
 0x475   :  { %3547 = vmatmul.msk.f32.gmra.mxu1 %vm582_vm4, %v3541_v51 }
 0x476   :  { %1810 = vmatpush.msra.mxu0 %v3785_v63  ;;  %1830 = vmatpush.msra.mxu1 %v3786_v23 }
 0x478   :  { %1811 = vmatpush.msra.mxu0 %v3787_v54  ;;  %1831 = vmatpush.msra.mxu1 %v3788_v38 }
 0x47a   :  { %1812 = vmatpush.msra.mxu0 %v3789_v42  ;;  %1832 = vmatpush.msra.mxu1 %v3790_v21 }
 0x47c   :  { %1813 = vmatpush.msra.mxu0 %v3791_v9  ;;  %1833 = vmatpush.msra.mxu1 %v3792_v43 }
 0x47e   :  { %1814 = vmatpush.msra.mxu0 %v3793_v7  ;;  %1834 = vmatpush.msra.mxu1 %v3794_v30 }
 0x480   :  { %1815 = vmatpush.msra.mxu0 %v3795_v25  ;;  %1835 = vmatpush.msra.mxu1 %v3796_v37 }
 0x482   :  { %1816 = vmatpush.msra.mxu0 %v3797_v40  ;;  %1836 = vmatpush.msra.mxu1 %v3798_v46 }
 0x484   :  { %1817 = vmatpush.msra.mxu0 %v3799_v49  ;;  %1837 = vmatpush.msra.mxu1 %v3800_v47 }
 0x486   :  { %1818 = vmatpush.msra.mxu0 %v3801_v52  ;;  %1838 = vmatpush.msra.mxu1 %v3802_v31 }
 0x488   :  { %1899 = vmatpush.msrb.mxu0 %v4873_v14  ;;  %1839 = vmatpush.msra.mxu1 %v3803_v44 }
 0x48a   :  { %1900 = vmatpush.msrb.mxu0 %v4876_v20  ;;  %1840 = vmatpush.msra.mxu1 %v3804_v53 }
 0x48b   :  { %v1573_v55 = vpop.permute.xlu2 %1572 }
 0x48c   :  { %1901 = vmatpush.msrb.mxu0 %v3776_v24  ;;  %1841 = vmatpush.msra.mxu1 %v3805_v50 }
 0x48e   :  { %1902 = vmatpush.msrb.mxu0 %v3777_v8  ;;  %1922 = vmatpush.msrb.mxu1 %v3778_v26 }
 0x490   :  { %1903 = vmatpush.msrb.mxu0 %v3779_v27  ;;  %1923 = vmatpush.msrb.mxu1 %v3780_v28 }
 0x492   :  { %1904 = vmatpush.msrb.mxu0 %v3781_v36  ;;  %1924 = vmatpush.msrb.mxu1 %v3782_v32 }
 0x493   :  { %v1568_v35 = vpop.permute.xlu2 %1567 }
 0x494   :  { %1905 = vmatpush.msrb.mxu0 %v3783_v33  ;;  %1925 = vmatpush.msrb.mxu1 %v3784_v34 }
 0x496   :  { %1906 = vmatpush.msrb.mxu0 %v3785_v63  ;;  %1926 = vmatpush.msrb.mxu1 %v3786_v23 }
 0x498   :  { %1907 = vmatpush.msrb.mxu0 %v3787_v54  ;;  %1927 = vmatpush.msrb.mxu1 %v3788_v38 }
 0x49a   :  { %1908 = vmatpush.msrb.mxu0 %v3789_v42  ;;  %1928 = vmatpush.msrb.mxu1 %v3790_v21 }
 0x49c   :  { %1909 = vmatpush.msrb.mxu0 %v3791_v9  ;;  %1929 = vmatpush.msrb.mxu1 %v3792_v43 }
 0x49e   :  { %1910 = vmatpush.msrb.mxu0 %v3793_v7  ;;  %1930 = vmatpush.msrb.mxu1 %v3794_v30 }
 0x4a0   :  { %1911 = vmatpush.msrb.mxu0 %v3795_v25  ;;  %1931 = vmatpush.msrb.mxu1 %v3796_v37 }
 0x4a2   :  { %1912 = vmatpush.msrb.mxu0 %v3797_v40  ;;  %1932 = vmatpush.msrb.mxu1 %v3798_v46 }
 0x4a4   :  { %1913 = vmatpush.msrb.mxu0 %v3799_v49  ;;  %1933 = vmatpush.msrb.mxu1 %v3800_v47 }
 0x4a6   :  { %1914 = vmatpush.msrb.mxu0 %v3801_v52  ;;  %1934 = vmatpush.msrb.mxu1 %v3802_v31 }
 0x4a8   :  { %1935 = vmatpush.msrb.mxu1 %v3803_v44 }
 0x4aa   :  { %1936 = vmatpush.msrb.mxu1 %v3804_v53 }
 0x4ac   :  { %1937 = vmatpush.msrb.mxu1 %v3805_v50 }
 0x4e4   :  { %v1598_v56 = vpop.f32.mrf.mxu0 }
 0x4e5   :  { %v4887_v57 = vadd.f32 %v1598_v56, %v1568_v35 }
 0x4e7   :  { %v4890_v58 = vmul.f32 0.70710677, %v4887_v57 }
 0x4e9   :  { %v1635_v59 = vand.u32 2147483647, %v4890_v58  ;;  %vm1711_vm3 = vcmp.ge.f32.partialorder %v4890_v58, 0.0 }
 0x4ea   :  { %v1621_v61 = vpop.f32.mrf.mxu1 }
 0x4eb   :  { %v1639_v22 = vmul.f32 0.3275911, %v1635_v59  ;;  %v4893_v48 = vadd.f32 %v1621_v61, %v1568_v35  ;;  %v1687_v13 = vsub.f32 0.0, %v1635_v59 }
 0x4ec   :  { %v1601_v3 = vpop.f32.mrf.mxu0 }
 0x4ed   :  { %v1643_v45 = vadd.f32 1.0, %v1639_v22  ;;  %v4896_v4 = vmul.f32 0.70710677, %v4893_v48  ;;  %v4898_v10 = vadd.f32 %v1601_v3, %v1573_v55  ;;  %v1691_v51 = vmul.f32 %v1687_v13, %v1635_v59 }
 0x4ef   :  { %3682 = vrcp.f32 %v1643_v45  ;;  %v1636_v62 = vand.u32 2147483647, %v4896_v4  ;;  %v4902_v5 = vmul.f32 0.70710677, %v4898_v10  ;;  %v1695_v33 = vmul.f32 1.442695, %v1691_v51 }
 0x4f0   :  { %vm1712_vm6 = vcmp.ge.f32.partialorder %v4896_v4, 0.0  ;;  %v1628_v4 = vmul.f32 0.5, %v4893_v48  ;;  %v3549_v48 = vld [vmem:[%s5499_s5 + $0x18] sm:$0xff] }
 0x4f1   :  { %v1640_v41 = vmul.f32 0.3275911, %v1636_v62  ;;  %v1637_v60 = vand.u32 2147483647, %v4902_v5  ;;  %v1688_v26 = vsub.f32 0.0, %v1636_v62  ;;  %vm1713_vm5 = vcmp.ge.f32.partialorder %v4902_v5, 0.0 }
 0x4f2   :  { %v1624_v0 = vpop.f32.mrf.mxu1 }
 0x4f3   :  { %v1644_v29 = vadd.f32 1.0, %v1640_v41  ;;  %v4905_v39 = vadd.f32 %v1624_v0, %v1573_v55  ;;  %v1641_v15 = vmul.f32 0.3275911, %v1637_v60  ;;  %v1689_v34 = vsub.f32 0.0, %v1637_v60 }
 0x4f4   :  { %v1692_v54 = vmul.f32 %v1688_v26, %v1636_v62 }
 0x4f5   :  { %v3683_v6 = vpop.eup %3682  ;;  %3684 = vrcp.f32 %v1644_v29  ;;  %v4908_v11 = vmul.f32 0.70710677, %v4905_v39  ;;  %v1645_v18 = vadd.f32 1.0, %v1641_v15  ;;  %v1693_v43 = vmul.f32 %v1689_v34, %v1637_v60 }
 0x4f6   :  { %v1651_v2 = vmul.f32 1.0614054, %v3683_v6  ;;  %v1697_v37 = vmul.f32 1.442695, %v1692_v54 }
 0x4f7   :  { %v1638_v14 = vand.u32 2147483647, %v4908_v11  ;;  %3686 = vrcp.f32 %v1645_v18  ;;  %v1699_v44 = vmul.f32 1.442695, %v1693_v43  ;;  %v1627_v43 = vmul.f32 0.5, %v4887_v57 }
 0x4f8   :  { %v1655_v17 = vadd.f32 -1.4531521, %v1651_v2  ;;  %vm1714_vm7 = vcmp.ge.f32.partialorder %v4908_v11, 0.0 }
 0x4f9   :  { %v1642_v20 = vmul.f32 0.3275911, %v1638_v14  ;;  %v1690_v46 = vsub.f32 0.0, %v1638_v14 }
 0x4fa   :  { %v1659_v24 = vmul.f32 %v3683_v6, %v1655_v17 }
 0x4fb   :  { %v3685_v8 = vpop.eup %3684  ;;  %v1646_v27 = vadd.f32 1.0, %v1642_v20  ;;  %v1694_v56 = vmul.f32 %v1690_v46, %v1638_v14 }
 0x4fc   :  { %v1663_v28 = vadd.f32 1.4214138, %v1659_v24  ;;  %v1652_v36 = vmul.f32 1.0614054, %v3685_v8 }
 0x4fd   :  { %3688 = vrcp.f32 %v1646_v27  ;;  %v3687_v32 = vpop.eup %3686  ;;  %v1701_v0 = vmul.f32 1.442695, %v1694_v56  ;;  %v3816_v56 = vld [vmem:[#allocation7 + $0x98] sm:$0xff] }
 0x4fe   :  { %v1667_v63 = vmul.f32 %v3683_v6, %v1663_v28  ;;  %v1656_v23 = vadd.f32 -1.4531521, %v1652_v36  ;;  %v1653_v38 = vmul.f32 1.0614054, %v3687_v32  ;;  %3690 = vpow2.f32 %v1695_v33 }
 0x4ff   :  { %3692 = vpow2.f32 %v1697_v37  ;;  %v3548_v37 = vld [vmem:[%s5499_s5 + $0x10] sm:$0xff] }
 0x500   :  { %v1671_v42 = vadd.f32 -0.28449672, %v1667_v63  ;;  %v1660_v21 = vmul.f32 %v3685_v8, %v1656_v23  ;;  %v1657_v9 = vadd.f32 -1.4531521, %v1653_v38  ;;  %3694 = vpow2.f32 %v1699_v44  ;;  %v3811_v44 = vld [vmem:[#allocation7 + $0x1e8] sm:$0xff] }
 0x501   :  { %3696 = vpow2.f32 %v1701_v0  ;;  %v3825_v0 = vld [vmem:[#allocation7 + $0x178] sm:$0xff] }
 0x502   :  { %v1675_v7 = vmul.f32 %v3683_v6, %v1671_v42  ;;  %v1664_v30 = vadd.f32 1.4214138, %v1660_v21  ;;  %v1661_v40 = vmul.f32 %v3687_v32, %v1657_v9 }
 0x503   :  { %v3689_v25 = vpop.eup %3688 }
 0x504   :  { %v1654_v49 = vmul.f32 1.0614054, %v3689_v25  ;;  %v1679_v47 = vadd.f32 0.2548296, %v1675_v7  ;;  %v1668_v52 = vmul.f32 %v3685_v8, %v1664_v30  ;;  %v1665_v31 = vadd.f32 1.4214138, %v1661_v40  ;;  %v3691_v59 = vpop.eup %3690 }
 0x505   :  { %v3693_v13 = vpop.eup %3692 }
 0x506   :  { %v1658_v53 = vadd.f32 -1.4531521, %v1654_v49  ;;  %v1683_v50 = vmul.f32 %v3683_v6, %v1679_v47  ;;  %v1672_v55 = vadd.f32 -0.28449672, %v1668_v52  ;;  %v1669_v35 = vmul.f32 %v3687_v32, %v1665_v31  ;;  %v3695_v14 = vpop.eup %3694  ;;  %v4923_v49 = vld [vmem:[#allocation7 + $0xf8] sm:$0xff]  ;;  %v4926_v47 = vld [vmem:[#allocation7 + $0xe8] sm:$0xff] }
 0x507   :  { %v3697_v34 = vpop.eup %3696  ;;  %v3809_v52 = vld [vmem:[#allocation7 + $0x1f8] sm:$0xff]  ;;  %v3810_v31 = vld [vmem:[#allocation7 + $0xc8] sm:$0xff] }
 0x508   :  { %v1662_v61 = vmul.f32 %v3689_v25, %v1658_v53  ;;  %v1676_v22 = vmul.f32 %v3685_v8, %v1672_v55  ;;  %v1673_v3 = vadd.f32 -0.28449672, %v1669_v35  ;;  %v1703_v45 = vmul.f32 %v3691_v59, %v1683_v50  ;;  %v3812_v53 = vld [vmem:[#allocation7 + $0xb8] sm:$0xff]  ;;  %v3814_v55 = vld [vmem:[#allocation7 + $0xa8] sm:$0xff] }
 0x509   :  { %v3813_v50 = vld [vmem:[#allocation7 + $0x1d8] sm:$0xff]  ;;  %v3815_v35 = vld [vmem:[#allocation7 + $0x1c8] sm:$0xff] }
 0x50a   :  { %v1666_v62 = vadd.f32 1.4214138, %v1662_v61  ;;  %v1680_v41 = vadd.f32 0.2548296, %v1676_v22  ;;  %v1677_v60 = vmul.f32 %v3687_v32, %v1673_v3  ;;  %v1707_v2 = vsub.f32 1.0, %v1703_v45  ;;  %v3817_v59 = vld [vmem:[#allocation7 + $0x1b8] sm:$0xff] }
 0x50b   :  { %v3818_v61 = vld [vmem:[#allocation7 + $0x88] sm:$0xff]  ;;  %v3820_v3 = vld [vmem:[#allocation7 + $0x78] sm:$0xff] }
 0x50c   :  { %v1670_v29 = vmul.f32 %v3689_v25, %v1666_v62  ;;  %v1684_v15 = vmul.f32 %v3685_v8, %v1680_v41  ;;  %v1681_v18 = vadd.f32 0.2548296, %v1677_v60  ;;  %v1715_v26 = vsub.f32 0.0, %v1707_v2  ;;  %v3819_v22 = vld [vmem:[#allocation7 + $0x1a8] sm:$0xff]  ;;  %v3821_v45 = vld [vmem:[#allocation7 + $0x198] sm:$0xff] }
 0x50d   :  { %v3822_v62 = vld [vmem:[#allocation7 + $0x68] sm:$0xff]  ;;  %v3824_v60 = vld [vmem:[#allocation7 + $0x58] sm:$0xff] }
 0x50e   :  { %v1674_v6 = vadd.f32 -0.28449672, %v1670_v29  ;;  %v1704_v17 = vmul.f32 %v3693_v13, %v1684_v15  ;;  %v1685_v20 = vmul.f32 %v3687_v32, %v1681_v18  ;;  %v1719_v8 = vsel %vm1711_vm3, %v1707_v2, %v1715_v26  ;;  %v3823_v41 = vld [vmem:[#allocation7 + $0x188] sm:$0xff]  ;;  %v3828_v13 = vld [vmem:[#allocation7 + $0x38] sm:$0xff] }
 0x50f   :  { %v1629_v32 = vmul.f32 0.5, %v4898_v10  ;;  %v1723_v9 = vadd.f32 1.0, %v1719_v8  ;;  %v1630_v10 = vmul.f32 0.5, %v4905_v39  ;;  %v3808_v39 = vld [vmem:[#allocation7 + $0xd8] sm:$0xff]  ;;  %v3826_v29 = vld [vmem:[#allocation7 + $0x48] sm:$0xff]  ;;  %v1745_v8 = vpop.permute.xlu1 %1744 }
 0x510   :  { %v1678_v51 = vmul.f32 %v3689_v25, %v1674_v6  ;;  %v1705_v24 = vmul.f32 %v3695_v14, %v1685_v20  ;;  %v1708_v28 = vsub.f32 1.0, %v1704_v17  ;;  %v3827_v15 = vld [vmem:[#allocation7 + $0x168] sm:$0xff]  ;;  %v3829_v18 = vld [vmem:[#allocation7 + $0x158] sm:$0xff] }
 0x511   :  { %v1727_v5 = vmul.f32 %v1723_v9, %v1627_v43  ;;  %v3830_v2 = vld [vmem:[#allocation7 + $0x28] sm:$0xff]  ;;  %v3832_v17 = vld [vmem:[#allocation7 + $0x18] sm:$0xff]  ;;  %v2082_v43 = vld [vmem:[#allocation2 + $0x2f0] sm:$0xff] }
 0x512   :  { %v1682_v27 = vadd.f32 0.2548296, %v1678_v51  ;;  %v1709_v36 = vsub.f32 1.0, %v1705_v24  ;;  %v1716_v54 = vsub.f32 0.0, %v1708_v28  ;;  %v3831_v6 = vld [vmem:[#allocation7 + $0x148] sm:$0xff]  ;;  %v3833_v20 = vld [vmem:[#allocation7 + $0x138] sm:$0xff] }
 0x513   :  { %v3834_v14 = vld [vmem:[#allocation7 + $0x8] sm:$0xff]  ;;  %v3836_v24 = vld [vmem:[#allocation7 + $0x118] sm:$0xff] }
 0x514   :  { %v1686_v33 = vmul.f32 %v3689_v25, %v1682_v27  ;;  %v1717_v63 = vsub.f32 0.0, %v1709_v36  ;;  %v1720_v30 = vsel %vm1712_vm6, %v1708_v28, %v1716_v54  ;;  %v3835_v51 = vld [vmem:[#allocation7 + $0x128] sm:$0xff]  ;;  %v1740_v27 = vpop.permute.xlu0 %1739 }
 0x515   :  { %v1724_v46 = vadd.f32 1.0, %v1720_v30  ;;  %v3837_v26 = vld [vmem:[#allocation7 + $0x108] sm:$0xff] }
 0x516   :  { %v1706_v23 = vmul.f32 %v3697_v34, %v1686_v33  ;;  %v1721_v38 = vsel %vm1713_vm5, %v1709_v36, %v1717_v63  ;;  %v2081_v30 = vld [vmem:[#allocation2 + $0x2e8] sm:$0xff] }
 0x517   :  { %v1725_v42 = vadd.f32 1.0, %v1721_v38  ;;  %v1728_v11 = vmul.f32 %v1724_v46, %v1628_v4  ;;  %v2115_v46 = vld [vmem:[#allocation2 + $0x3f8] sm:$0xff]  ;;  %v2074_v4 = vld [vmem:[#allocation2 + $0x2b0] sm:$0xff] }
 0x518   :  { %v1710_v21 = vsub.f32 1.0, %v1706_v23 }
 0x519   :  { %v1729_v7 = vmul.f32 %v1725_v42, %v1629_v32 }
 0x51a   :  { %v1718_v58 = vsub.f32 0.0, %v1710_v21 }
 0x51b   :  { %1767 = vmatpush.msrb.mxu2 %v1729_v7  ;;  %v2083_v7 = vld [vmem:[#allocation2 + $0x2f8] sm:$0xff] }
 0x51c   :  { %v1722_v25 = vsel %vm1714_vm7, %v1710_v21, %v1718_v58  ;;  %v2080_v58 = vld [vmem:[#allocation2 + $0x2e0] sm:$0xff] }
 0x51d   :  { %v1726_v40 = vadd.f32 1.0, %v1722_v25  ;;  %1768 = vmatpush.msrb.mxu2 %v1727_v5  ;;  %v2078_v25 = vld [vmem:[#allocation2 + $0x2d0] sm:$0xff]  ;;  %v2079_v5 = vld [vmem:[#allocation2 + $0x2d8] sm:$0xff] }
 0x51e   :  { %3552 = vmatmul.msk.f32.vlgmr.msrb.gmra.mxu2 %vm582_vm4, %v3548_v37 }
 0x51f   :  { %v1730_v57 = vmul.f32 %v1726_v40, %v1630_v10  ;;  %1849 = vmatpush.msra.mxu2 %v4923_v49  ;;  %v2114_v10 = vld [vmem:[#allocation2 + $0x3f0] sm:$0xff]  ;;  %v2077_v40 = vld [vmem:[#allocation2 + $0x2c8] sm:$0xff] }
 0x521   :  { %1790 = vmatpush.msrb.mxu3 %v1730_v57  ;;  %1850 = vmatpush.msra.mxu2 %v4926_v47  ;;  %v2112_v57 = vld [vmem:[#allocation2 + $0x3e0] sm:$0xff] }
 0x523   :  { %1791 = vmatpush.msrb.mxu3 %v1728_v11  ;;  %1851 = vmatpush.msra.mxu2 %v3808_v39  ;;  %v2113_v11 = vld [vmem:[#allocation2 + $0x3e8] sm:$0xff] }
 0x524   :  { %3554 = vmatmul.msk.f32.vlgmr.msrb.gmra.mxu3 %vm582_vm4, %v3548_v37  ;;  %v2076_v37 = vld [vmem:[#allocation2 + $0x2c0] sm:$0xff] }
 0x525   :  { %1872 = vmatpush.msra.mxu3 %v3809_v52  ;;  %1852 = vmatpush.msra.mxu2 %v3810_v31 }
 0x526   :  { %3553 = vmatmul.msk.f32.gmra.mxu2 %vm582_vm4, %v3549_v48 }
 0x527   :  { %1873 = vmatpush.msra.mxu3 %v3811_v44  ;;  %1853 = vmatpush.msra.mxu2 %v3812_v53 }
 0x529   :  { %1874 = vmatpush.msra.mxu3 %v3813_v50  ;;  %1854 = vmatpush.msra.mxu2 %v3814_v55 }
 0x52b   :  { %1875 = vmatpush.msra.mxu3 %v3815_v35  ;;  %1855 = vmatpush.msra.mxu2 %v3816_v56 }
 0x52c   :  { %3555 = vmatmul.msk.f32.gmra.mxu3 %vm582_vm4, %v3549_v48  ;;  %v2110_v48 = vld [vmem:[#allocation2 + $0x3d0] sm:$0xff] }
 0x52d   :  { %1876 = vmatpush.msra.mxu3 %v3817_v59  ;;  %1856 = vmatpush.msra.mxu2 %v3818_v61 }
 0x52f   :  { %1877 = vmatpush.msra.mxu3 %v3819_v22  ;;  %1857 = vmatpush.msra.mxu2 %v3820_v3 }
 0x531   :  { %1878 = vmatpush.msra.mxu3 %v3821_v45  ;;  %1858 = vmatpush.msra.mxu2 %v3822_v62 }
 0x533   :  { %1879 = vmatpush.msra.mxu3 %v3823_v41  ;;  %1859 = vmatpush.msra.mxu2 %v3824_v60 }
 0x535   :  { %1880 = vmatpush.msra.mxu3 %v3825_v0  ;;  %1860 = vmatpush.msra.mxu2 %v3826_v29 }
 0x537   :  { %1881 = vmatpush.msra.mxu3 %v3827_v15  ;;  %1861 = vmatpush.msra.mxu2 %v3828_v13 }
 0x539   :  { %1882 = vmatpush.msra.mxu3 %v3829_v18  ;;  %1862 = vmatpush.msra.mxu2 %v3830_v2 }
 0x53b   :  { %1883 = vmatpush.msra.mxu3 %v3831_v6  ;;  %1863 = vmatpush.msra.mxu2 %v3832_v17 }
 0x53d   :  { %1884 = vmatpush.msra.mxu3 %v3833_v20  ;;  %1864 = vmatpush.msra.mxu2 %v3834_v14 }
 0x53f   :  { %1945 = vmatpush.msrb.mxu2 %v4923_v49  ;;  %1885 = vmatpush.msra.mxu3 %v3835_v51  ;;  %v2075_v49 = vld [vmem:[#allocation2 + $0x2b8] sm:$0xff] }
 0x541   :  { %1946 = vmatpush.msrb.mxu2 %v4926_v47  ;;  %1886 = vmatpush.msra.mxu3 %v3836_v24  ;;  %v2072_v47 = vld [vmem:[#allocation2 + $0x2a0] sm:$0xff] }
 0x543   :  { %1947 = vmatpush.msrb.mxu2 %v3808_v39  ;;  %1887 = vmatpush.msra.mxu3 %v3837_v26  ;;  %v2073_v39 = vld [vmem:[#allocation2 + $0x2a8] sm:$0xff] }
 0x545   :  { %1968 = vmatpush.msrb.mxu3 %v3809_v52  ;;  %1948 = vmatpush.msrb.mxu2 %v3810_v31  ;;  %v2111_v52 = vld [vmem:[#allocation2 + $0x3d8] sm:$0xff]  ;;  %v2070_v31 = vld [vmem:[#allocation2 + $0x290] sm:$0xff] }
 0x547   :  { %1969 = vmatpush.msrb.mxu3 %v3811_v44  ;;  %1949 = vmatpush.msrb.mxu2 %v3812_v53  ;;  %v2108_v44 = vld [vmem:[#allocation2 + $0x3c0] sm:$0xff]  ;;  %v2071_v53 = vld [vmem:[#allocation2 + $0x298] sm:$0xff] }
 0x549   :  { %1970 = vmatpush.msrb.mxu3 %v3813_v50  ;;  %1950 = vmatpush.msrb.mxu2 %v3814_v55  ;;  %v2109_v50 = vld [vmem:[#allocation2 + $0x3c8] sm:$0xff]  ;;  %v2068_v55 = vld [vmem:[#allocation2 + $0x280] sm:$0xff] }
 0x54b   :  { %1971 = vmatpush.msrb.mxu3 %v3815_v35  ;;  %1951 = vmatpush.msrb.mxu2 %v3816_v56  ;;  %v2106_v35 = vld [vmem:[#allocation2 + $0x3b0] sm:$0xff]  ;;  %v2069_v56 = vld [vmem:[#allocation2 + $0x288] sm:$0xff] }
 0x54d   :  { %1972 = vmatpush.msrb.mxu3 %v3817_v59  ;;  %1952 = vmatpush.msrb.mxu2 %v3818_v61  ;;  %v2107_v61 = vld [vmem:[#allocation2 + $0x3b8] sm:$0xff] }
 0x54f   :  { %1973 = vmatpush.msrb.mxu3 %v3819_v22  ;;  %1953 = vmatpush.msrb.mxu2 %v3820_v3  ;;  %v2066_v22 = vld [vmem:[#allocation2 + $0x270] sm:$0xff]  ;;  %v2104_v3 = vld [vmem:[#allocation2 + $0x3a0] sm:$0xff] }
 0x551   :  { %1974 = vmatpush.msrb.mxu3 %v3821_v45  ;;  %1954 = vmatpush.msrb.mxu2 %v3822_v62  ;;  %v2067_v45 = vld [vmem:[#allocation2 + $0x278] sm:$0xff]  ;;  %v2105_v62 = vld [vmem:[#allocation2 + $0x3a8] sm:$0xff] }
 0x553   :  { %1975 = vmatpush.msrb.mxu3 %v3823_v41  ;;  %1955 = vmatpush.msrb.mxu2 %v3824_v60  ;;  %v2064_v41 = vld [vmem:[#allocation2 + $0x260] sm:$0xff]  ;;  %v2102_v60 = vld [vmem:[#allocation2 + $0x390] sm:$0xff] }
 0x555   :  { %1976 = vmatpush.msrb.mxu3 %v3825_v0  ;;  %1956 = vmatpush.msrb.mxu2 %v3826_v29  ;;  %v2065_v0 = vld [vmem:[#allocation2 + $0x268] sm:$0xff]  ;;  %v2103_v29 = vld [vmem:[#allocation2 + $0x398] sm:$0xff] }
 0x557   :  { %1977 = vmatpush.msrb.mxu3 %v3827_v15  ;;  %1957 = vmatpush.msrb.mxu2 %v3828_v13  ;;  %v2062_v13 = vld [vmem:[#allocation2 + $0x250] sm:$0xff] }
 0x559   :  { %1978 = vmatpush.msrb.mxu3 %v3829_v18  ;;  %1958 = vmatpush.msrb.mxu2 %v3830_v2  ;;  %v2100_v18 = vld [vmem:[#allocation2 + $0x380] sm:$0xff]  ;;  %v2063_v2 = vld [vmem:[#allocation2 + $0x258] sm:$0xff] }
 0x55b   :  { %1979 = vmatpush.msrb.mxu3 %v3831_v6  ;;  %1959 = vmatpush.msrb.mxu2 %v3832_v17  ;;  %v2101_v17 = vld [vmem:[#allocation2 + $0x388] sm:$0xff] }
 0x55d   :  { %1980 = vmatpush.msrb.mxu3 %v3833_v20  ;;  %1960 = vmatpush.msrb.mxu2 %v3834_v14  ;;  %v2060_v20 = vld [vmem:[#allocation2 + $0x240] sm:$0xff]  ;;  %v2098_v14 = vld [vmem:[#allocation2 + $0x370] sm:$0xff] }
 0x55f   :  { %1981 = vmatpush.msrb.mxu3 %v3835_v51  ;;  %v2061_v51 = vld [vmem:[#allocation2 + $0x248] sm:$0xff] }
 0x561   :  { %1982 = vmatpush.msrb.mxu3 %v3836_v24  ;;  %v2099_v24 = vld [vmem:[#allocation2 + $0x378] sm:$0xff] }
 0x563   :  { %1983 = vmatpush.msrb.mxu3 %v3837_v26 }
 0x5a1   :  { %v1770_v28 = vpop.f32.mrf.mxu2 }
 0x5a2   :  { %v1771_v36 = vadd.f32 %v1770_v28, %v1740_v27  ;;  %v2096_v28 = vld [vmem:[#allocation2 + $0x360] sm:$0xff] }
 0x5a4   :  { %v4938_v33 = vadd.f32 %v1771_v36, %v4832_v1  ;;  %v2059_v36 = vld [vmem:[#allocation2 + $0x238] sm:$0xff] }
 0x5a6   :  { %1819 = vmatmul.f32.vlgmr.msra.gmra.mxu0 %v4938_v33  ;;  %1865 = vmatmul.f32.vlgmr.msra.gmra.mxu2 %v4938_v33 }
 0x5a7   :  { %v1793_v34 = vpop.f32.mrf.mxu3  ;;  %2123 = vmatpush.msra.mxu0 %v2082_v43  ;;  %2169 = vmatpush.msra.mxu2 %v2083_v7  ;;  %v2052_v7 = vld [vmem:[#allocation2 + $0x200] sm:$0xff] }
 0x5a8   :  { %v1794_v63 = vadd.f32 %v1793_v34, %v1740_v27  ;;  %v2058_v27 = vld [vmem:[#allocation2 + $0x230] sm:$0xff]  ;;  %v2097_v34 = vld [vmem:[#allocation2 + $0x368] sm:$0xff] }
 0x5a9   :  { %v1773_v54 = vpop.f32.mrf.mxu2  ;;  %2124 = vmatpush.msra.mxu0 %v2080_v58  ;;  %2170 = vmatpush.msra.mxu2 %v2081_v30  ;;  %v2090_v58 = vld [vmem:[#allocation2 + $0x330] sm:$0xff]  ;;  %v2053_v30 = vld [vmem:[#allocation2 + $0x208] sm:$0xff] }
 0x5aa   :  { %v4943_v23 = vadd.f32 %v1794_v63, %v4844_v16  ;;  %v1774_v38 = vadd.f32 %v1773_v54, %v1745_v8  ;;  %v1895_v16 = vmul.f32 %v4938_v33, %v4938_v33  ;;  %v2094_v54 = vld [vmem:[#allocation2 + $0x350] sm:$0xff] }
 0x5ab   :  { %2125 = vmatpush.msra.mxu0 %v2078_v25  ;;  %2171 = vmatpush.msra.mxu2 %v2079_v5  ;;  %v2091_v25 = vld [vmem:[#allocation2 + $0x338] sm:$0xff]  ;;  %v2088_v5 = vld [vmem:[#allocation2 + $0x320] sm:$0xff] }
 0x5ac   :  { %1842 = vmatmul.f32.vlgmr.msra.gmra.mxu1 %v4943_v23  ;;  %1888 = vmatmul.f32.vlgmr.msra.gmra.mxu3 %v4943_v23  ;;  %v4948_v32 = vadd.f32 %v1774_v38, %v4835_v12  ;;  %v1896_v12 = vmul.f32 %v4943_v23, %v4943_v23  ;;  %v2057_v38 = vld [vmem:[#allocation2 + $0x228] sm:$0xff] }
 0x5ad   :  { %2126 = vmatpush.msra.mxu0 %v2076_v37  ;;  %2146 = vmatpush.msra.mxu1 %v2114_v10  ;;  %v2089_v37 = vld [vmem:[#allocation2 + $0x328] sm:$0xff] }
 0x5ae   :  { %1822 = vmatmul.f32.gmra.mxu0 %v4948_v32  ;;  %1868 = vmatmul.f32.gmra.mxu2 %v4948_v32  ;;  %v1897_v9 = vmul.f32 %v4948_v32, %v4948_v32 }
 0x5af   :  { %v1796_v1 = vpop.f32.mrf.mxu3  ;;  %2172 = vmatpush.msra.mxu2 %v2077_v40  ;;  %2192 = vmatpush.msra.mxu3 %v2115_v46 }
 0x5b0   :  { %v1797_v42 = vadd.f32 %v1796_v1, %v1745_v8  ;;  %2127 = vmatpush.msra.mxu0 %v2074_v4  ;;  %2147 = vmatpush.msra.mxu1 %v2112_v57  ;;  %v2056_v8 = vld [vmem:[#allocation2 + $0x220] sm:$0xff]  ;;  %v2095_v1 = vld [vmem:[#allocation2 + $0x358] sm:$0xff]  ;;  %v2086_v4 = vld [vmem:[#allocation2 + $0x310] sm:$0xff] }
 0x5b1   :  { %2173 = vmatpush.msra.mxu2 %v2075_v49  ;;  %2193 = vmatpush.msra.mxu3 %v2113_v11  ;;  %v2087_v57 = vld [vmem:[#allocation2 + $0x318] sm:$0xff]  ;;  %v2084_v49 = vld [vmem:[#allocation2 + $0x300] sm:$0xff]  ;;  %v2085_v11 = vld [vmem:[#allocation2 + $0x308] sm:$0xff] }
 0x5b2   :  { %v4953_v21 = vadd.f32 %v1797_v42, %v4847_v19  ;;  %2128 = vmatpush.msra.mxu0 %v2072_v47  ;;  %2148 = vmatpush.msra.mxu1 %v2110_v48 }
 0x5b3   :  { %2174 = vmatpush.msra.mxu2 %v2073_v39  ;;  %2194 = vmatpush.msra.mxu3 %v2111_v52 }
 0x5b4   :  { %1845 = vmatmul.f32.gmra.mxu1 %v4953_v21  ;;  %1891 = vmatmul.f32.gmra.mxu3 %v4953_v21  ;;  %v1898_v19 = vmul.f32 %v4953_v21, %v4953_v21 }
 0x5b5   :  { %2129 = vmatpush.msra.mxu0 %v2070_v31  ;;  %2149 = vmatpush.msra.mxu1 %v2108_v44 }
 0x5b6   :  { %1915 = vmatmul.f32.vlgmr.msrb.gmra.mxu0 %v1895_v16  ;;  %1961 = vmatmul.f32.vlgmr.msrb.gmra.mxu2 %v1895_v16  ;;  %v2054_v16 = vld [vmem:[#allocation2 + $0x210] sm:$0xff] }
 0x5b7   :  { %2175 = vmatpush.msra.mxu2 %v2071_v53  ;;  %2195 = vmatpush.msra.mxu3 %v2109_v50 }
 0x5b8   :  { %2130 = vmatpush.msra.mxu0 %v2068_v55  ;;  %2150 = vmatpush.msra.mxu1 %v2106_v35 }
 0x5b9   :  { %2176 = vmatpush.msra.mxu2 %v2069_v56  ;;  %2196 = vmatpush.msra.mxu3 %v2107_v61 }
 0x5ba   :  { %2131 = vmatpush.msra.mxu0 %v2066_v22  ;;  %2151 = vmatpush.msra.mxu1 %v2104_v3 }
 0x5bb   :  { %2177 = vmatpush.msra.mxu2 %v2067_v45  ;;  %2197 = vmatpush.msra.mxu3 %v2105_v62 }
 0x5bc   :  { %1938 = vmatmul.f32.vlgmr.msrb.gmra.mxu1 %v1896_v12  ;;  %1984 = vmatmul.f32.vlgmr.msrb.gmra.mxu3 %v1896_v12  ;;  %v2092_v12 = vld [vmem:[#allocation2 + $0x340] sm:$0xff] }
 0x5bd   :  { %2132 = vmatpush.msra.mxu0 %v2064_v41  ;;  %2152 = vmatpush.msra.mxu1 %v2102_v60 }
 0x5be   :  { %1918 = vmatmul.f32.gmra.mxu0 %v1897_v9  ;;  %1964 = vmatmul.f32.gmra.mxu2 %v1897_v9  ;;  %v2055_v9 = vld [vmem:[#allocation2 + $0x218] sm:$0xff] }
 0x5bf   :  { %2178 = vmatpush.msra.mxu2 %v2065_v0  ;;  %2198 = vmatpush.msra.mxu3 %v2103_v29 }
 0x5c0   :  { %2133 = vmatpush.msra.mxu0 %v2062_v13  ;;  %2153 = vmatpush.msra.mxu1 %v2100_v18 }
 0x5c1   :  { %2179 = vmatpush.msra.mxu2 %v2063_v2  ;;  %2199 = vmatpush.msra.mxu3 %v2101_v17 }
 0x5c2   :  { %2134 = vmatpush.msra.mxu0 %v2060_v20  ;;  %2154 = vmatpush.msra.mxu1 %v2098_v14 }
 0x5c3   :  { %2180 = vmatpush.msra.mxu2 %v2061_v51  ;;  %2200 = vmatpush.msra.mxu3 %v2099_v24 }
 0x5c4   :  { %1941 = vmatmul.f32.gmra.mxu1 %v1898_v19  ;;  %1987 = vmatmul.f32.gmra.mxu3 %v1898_v19  ;;  %v2093_v19 = vld [vmem:[#allocation2 + $0x348] sm:$0xff] }
 0x5c5   :  { %2135 = vmatpush.msra.mxu0 %v2058_v27  ;;  %2155 = vmatpush.msra.mxu1 %v2096_v28 }
 0x5c6   :  { %2181 = vmatpush.msra.mxu2 %v2059_v36  ;;  %2201 = vmatpush.msra.mxu3 %v2097_v34 }
 0x5c7   :  { %2136 = vmatpush.msra.mxu0 %v2056_v8  ;;  %2156 = vmatpush.msra.mxu1 %v2094_v54 }
 0x5c8   :  { %2182 = vmatpush.msra.mxu2 %v2057_v38  ;;  %2202 = vmatpush.msra.mxu3 %v2095_v1 }
 0x5c9   :  { %2137 = vmatpush.msra.mxu0 %v2054_v16  ;;  %2157 = vmatpush.msra.mxu1 %v2092_v12 }
 0x5ca   :  { %2183 = vmatpush.msra.mxu2 %v2055_v9  ;;  %2203 = vmatpush.msra.mxu3 %v2093_v19 }
 0x5cb   :  { %2138 = vmatpush.msra.mxu0 %v2052_v7  ;;  %2158 = vmatpush.msra.mxu1 %v2090_v58 }
 0x5cc   :  { %2184 = vmatpush.msra.mxu2 %v2053_v30  ;;  %2204 = vmatpush.msra.mxu3 %v2091_v25 }
 0x5cd   :  { %2159 = vmatpush.msra.mxu1 %v2088_v5 }
 0x5ce   :  { %2205 = vmatpush.msra.mxu3 %v2089_v37 }
 0x5cf   :  { %2160 = vmatpush.msra.mxu1 %v2086_v4 }
 0x5d0   :  { %2206 = vmatpush.msra.mxu3 %v2087_v57 }
 0x5d1   :  { %2161 = vmatpush.msra.mxu1 %v2084_v49 }
 0x5d2   :  { %2207 = vmatpush.msra.mxu3 %v2085_v11 }
 0x623   :  { %v4965_v59 = vpop.f32.mrf.mxu0 }
 0x629   :  { %v1843_v15 = vpop.f32.mrf.mxu1  ;;  %v4967_v6 = vpop.f32.mrf.mxu2 }
 0x62a   :  { %v1844_v10 = vadd.f32 %v1843_v15, %v4965_v59 }
 0x62b   :  { %v1823_v26 = vpop.f32.mrf.mxu0 }
 0x62c   :  { %v1991_v48 = vmul.f32 %v1844_v10, %v1844_v10  ;;  %v1999_v8 = vsub.f32 %v4938_v33, %v1844_v10 }
 0x62f   :  { %v1889_v63 = vpop.f32.mrf.mxu3 }
 0x630   :  { %v4971_v52 = vadd.f32 %v1889_v63, %v4967_v6 }
 0x631   :  { %v1846_v42 = vpop.f32.mrf.mxu1  ;;  %v1869_v43 = vpop.f32.mrf.mxu2 }
 0x632   :  { %v4973_v53 = vadd.f32 %v1846_v42, %v1823_v26  ;;  %v1992_v35 = vmul.f32 %v4971_v52, %v4971_v52  ;;  %v2000_v58 = vsub.f32 %v4943_v23, %v4971_v52  ;;  %v2351_v52 = vld [vmem:[#allocation5 + $0x2f8] sm:$0xff] }
 0x633   :  { %v1916_v40 = vpop.f32.mrf.mxu0  ;;  %2437 = vmatpush.msrb.mxu2 %v2351_v52  ;;  %v2327_v52 = vld [vmem:[#allocation5 + $0x238] sm:$0xff] }
 0x634   :  { %v1993_v22 = vmul.f32 %v4973_v53, %v4973_v53  ;;  %v2001_v37 = vsub.f32 %v4948_v32, %v4973_v53  ;;  %v2346_v53 = vld [vmem:[#allocation5 + $0x2d0] sm:$0xff] }
 0x637   :  { %v1892_v46 = vpop.f32.mrf.mxu3 }
 0x638   :  { %v4979_v62 = vadd.f32 %v1892_v46, %v1869_v43 }
 0x639   :  { %v1939_v47 = vpop.f32.mrf.mxu1  ;;  %v1962_v44 = vpop.f32.mrf.mxu2 }
 0x63a   :  { %v1940_v39 = vadd.f32 %v1939_v47, %v1916_v40  ;;  %v1994_v2 = vmul.f32 %v4979_v62, %v4979_v62  ;;  %v2002_v11 = vsub.f32 %v4953_v21, %v4979_v62  ;;  %v2381_v62 = vld [vmem:[#allocation5 + $0x3e8] sm:$0xff] }
 0x63b   :  { %v1919_v59 = vpop.f32.mrf.mxu0 }
 0x63c   :  { %v1995_v31 = vsub.f32 %v1940_v39, %v1991_v48  ;;  %v2350_v39 = vld [vmem:[#allocation5 + $0x2f0] sm:$0xff] }
 0x63d   :  { %2391 = vmatpush.msrb.mxu0 %v2350_v39  ;;  %v2364_v39 = vld [vmem:[#allocation5 + $0x360] sm:$0xff] }
 0x63e   :  { %v2003_v50 = vadd.f32 1e-05, %v1995_v31  ;;  %v2348_v31 = vld [vmem:[#allocation5 + $0x2e0] sm:$0xff] }
 0x63f   :  { %v1985_v55 = vpop.f32.mrf.mxu3  ;;  %2392 = vmatpush.msrb.mxu0 %v2348_v31 }
 0x640   :  { %3698 = vrsqrt.f32 %v2003_v50  ;;  %v1986_v56 = vadd.f32 %v1985_v55, %v1962_v44  ;;  %vm2013_vm8 = vweird.f32 %v2003_v50  ;;  %v2349_v44 = vld [vmem:[#allocation5 + $0x2e8] sm:$0xff]  ;;  %v2344_v55 = vld [vmem:[#allocation5 + $0x2c0] sm:$0xff] }
 0x641   :  { %v1942_v61 = vpop.f32.mrf.mxu1  ;;  %v1965_v13 = vpop.f32.mrf.mxu2  ;;  %2438 = vmatpush.msrb.mxu2 %v2349_v44  ;;  %2393 = vmatpush.msrb.mxu0 %v2346_v53  ;;  %v2365_v53 = vld [vmem:[#allocation5 + $0x368] sm:$0xff] }
 0x642   :  { %v1996_v3 = vsub.f32 %v1986_v56, %v1992_v35  ;;  %v1943_v45 = vadd.f32 %v1942_v61, %v1919_v59  ;;  %v2382_v35 = vld [vmem:[#allocation5 + $0x3f0] sm:$0xff]  ;;  %v2345_v56 = vld [vmem:[#allocation5 + $0x2c8] sm:$0xff]  ;;  %v4993_v59 = vld [vmem:[%s5502_s8 + $0x2] sm:$0x3] }
 0x643   :  { %2394 = vmatpush.msrb.mxu0 %v2344_v55  ;;  %2414 = vmatpush.msrb.mxu1 %v2382_v35  ;;  %v2383_v61 = vld [vmem:[#allocation5 + $0x3f8] sm:$0xff]  ;;  %v2324_v35 = vld [vmem:[#allocation5 + $0x220] sm:$0xff] }
 0x644   :  { %v2004_v41 = vadd.f32 1e-05, %v1996_v3  ;;  %v1997_v60 = vsub.f32 %v1943_v45, %v1993_v22  ;;  %2460 = vmatpush.msrb.mxu3 %v2383_v61  ;;  %v2342_v22 = vld [vmem:[#allocation5 + $0x2b0] sm:$0xff]  ;;  %v2380_v3 = vld [vmem:[#allocation5 + $0x3e0] sm:$0xff]  ;;  %v2343_v45 = vld [vmem:[#allocation5 + $0x2b8] sm:$0xff] }
 0x645   :  { %2395 = vmatpush.msrb.mxu0 %v2342_v22  ;;  %2415 = vmatpush.msrb.mxu1 %v2380_v3  ;;  %v2325_v61 = vld [vmem:[#allocation5 + $0x228] sm:$0xff]  ;;  %v2363_v3 = vld [vmem:[#allocation5 + $0x358] sm:$0xff] }
 0x646   :  { %v3699_v0 = vpop.eup %3698  ;;  %3700 = vrsqrt.f32 %v2004_v41  ;;  %v2005_v29 = vadd.f32 1e-05, %v1997_v60  ;;  %vm2023_vm11 = vweird.f32 %v2004_v41  ;;  %2461 = vmatpush.msrb.mxu3 %v2381_v62  ;;  %v2378_v60 = vld [vmem:[#allocation5 + $0x3d0] sm:$0xff] }
 0x647   :  { %v2008_v15 = vmul.f32 %v3699_v0, %v2003_v50  ;;  %v1988_v18 = vpop.f32.mrf.mxu3  ;;  %vm2014_vm4 = vweird.f32 %v3699_v0  ;;  %v2347_v50 = vld [vmem:[#allocation5 + $0x2d8] sm:$0xff]  ;;  %2416 = vmatpush.msrb.mxu1 %v2378_v60  ;;  %v2322_v62 = vld [vmem:[#allocation5 + $0x210] sm:$0xff] }
 0x648   :  { %3702 = vrsqrt.f32 %v2005_v29  ;;  %v1989_v6 = vadd.f32 %v1988_v18, %v1965_v13  ;;  %vm2015_vm9 = vmor %vm2013_vm8, %vm2014_vm4  ;;  %vm2033_vm14 = vweird.f32 %v2005_v29  ;;  %2439 = vmatpush.msrb.mxu2 %v2347_v50  ;;  %v2379_v13 = vld [vmem:[#allocation5 + $0x3d8] sm:$0xff]  ;;  %v2338_v18 = vld [vmem:[#allocation5 + $0x290] sm:$0xff]  ;;  %vm2494_vm4 = vcmask 261120  }
 0x649   :  { %v2009_v17 = vmul.f32 %v3699_v0, %v2008_v15  ;;  %2462 = vmatpush.msrb.mxu3 %v2379_v13  ;;  %v2323_v60 = vld [vmem:[#allocation5 + $0x218] sm:$0xff] }
 0x64a   :  { %v1998_v20 = vsub.f32 %v1989_v6, %v1994_v2  ;;  %2440 = vmatpush.msrb.mxu2 %v2345_v56  ;;  %v2376_v2 = vld [vmem:[#allocation5 + $0x3c0] sm:$0xff]  ;;  %v2339_v6 = vld [vmem:[#allocation5 + $0x298] sm:$0xff]  ;;  %v2362_v56 = vld [vmem:[#allocation5 + $0x350] sm:$0xff] }
 0x64b   :  { %v2010_v14 = vmul.f32 0.5, %v2009_v17  ;;  %2417 = vmatpush.msrb.mxu1 %v2376_v2  ;;  %v2377_v17 = vld [vmem:[#allocation5 + $0x3c8] sm:$0xff]  ;;  %v2320_v2 = vld [vmem:[#allocation5 + $0x200] sm:$0xff] }
 0x64c   :  { %v3701_v51 = vpop.eup %3700  ;;  %v2006_v24 = vadd.f32 1e-05, %v1998_v20  ;;  %2441 = vmatpush.msrb.mxu2 %v2343_v45  ;;  %2463 = vmatpush.msrb.mxu3 %v2377_v17  ;;  %v2336_v20 = vld [vmem:[#allocation5 + $0x280] sm:$0xff]  ;;  %v2321_v17 = vld [vmem:[#allocation5 + $0x208] sm:$0xff] }
 0x64d   :  { %v2011_v26 = vsub.f32 1.5, %v2010_v14  ;;  %v2018_v27 = vmul.f32 %v3701_v51, %v2004_v41  ;;  %vm2024_vm10 = vweird.f32 %v3701_v51  ;;  %v2340_v41 = vld [vmem:[#allocation5 + $0x2a0] sm:$0xff]  ;;  %v2374_v14 = vld [vmem:[#allocation5 + $0x3b0] sm:$0xff] }
 0x64e   :  { %v3703_v28 = vpop.eup %3702  ;;  %3704 = vrsqrt.f32 %v2006_v24  ;;  %vm2025_vm13 = vmor %vm2023_vm11, %vm2024_vm10  ;;  %vm2043_vm1 = vweird.f32 %v2006_v24  ;;  %2396 = vmatpush.msrb.mxu0 %v2340_v41  ;;  %2418 = vmatpush.msrb.mxu1 %v2374_v14  ;;  %v2360_v41 = vld [vmem:[#allocation5 + $0x340] sm:$0xff] }
 0x64f   :  { %v2012_v36 = vmul.f32 %v3699_v0, %v2011_v26  ;;  %v2019_v34 = vmul.f32 %v3701_v51, %v2018_v27  ;;  %v2028_v63 = vmul.f32 %v3703_v28, %v2005_v29  ;;  %vm2034_vm12 = vweird.f32 %v3703_v28  ;;  %v2375_v26 = vld [vmem:[#allocation5 + $0x3b8] sm:$0xff] }
 0x650   :  { %vm2035_vm15 = vmor %vm2033_vm14, %vm2034_vm12  ;;  %v2119_v29 = vperm.slane %v4993_v59, 0  ;;  %2397 = vmatpush.msrb.mxu0 %v2338_v18  ;;  %2464 = vmatpush.msrb.mxu3 %v2375_v26  ;;  %v2357_v26 = vld [vmem:[#allocation5 + $0x328] sm:$0xff] }
 0x651   :  { %v2020_v54 = vmul.f32 0.5, %v2019_v34  ;;  %v2029_v38 = vmul.f32 %v3703_v28, %v2028_v63  ;;  %v2016_v1 = vsel %vm2015_vm9, %v3699_v0, %v2012_v36  ;;  %v2341_v0 = vld [vmem:[#allocation5 + $0x2a8] sm:$0xff]  ;;  %v2334_v36 = vld [vmem:[#allocation5 + $0x270] sm:$0xff]  ;;  %v2372_v34 = vld [vmem:[#allocation5 + $0x3a0] sm:$0xff] }
 0x652   :  { %v2047_v42 = vmul.f32 %v2016_v1, %v1999_v8  ;;  %2442 = vmatpush.msrb.mxu2 %v2341_v0  ;;  %2398 = vmatpush.msrb.mxu0 %v2336_v20  ;;  %v2335_v63 = vld [vmem:[#allocation5 + $0x278] sm:$0xff]  ;;  %v2332_v1 = vld [vmem:[#allocation5 + $0x260] sm:$0xff] }
 0x653   :  { %v2021_v16 = vsub.f32 1.5, %v2020_v54  ;;  %v2030_v12 = vmul.f32 0.5, %v2029_v38  ;;  %v2120_v54 = vperm.slane %v4993_v59, 1  ;;  %2419 = vmatpush.msrb.mxu1 %v2372_v34  ;;  %v2373_v38 = vld [vmem:[#allocation5 + $0x3a8] sm:$0xff]  ;;  %v2356_v59 = vld [vmem:[#allocation5 + $0x320] sm:$0xff] }
 0x654   :  { %v3705_v9 = vpop.eup %3704  ;;  %2139 = vmatmul.f32.vlgmr.msra.gmra.mxu0 %v2047_v42  ;;  %2185 = vmatmul.f32.vlgmr.msra.gmra.mxu2 %v2047_v42  ;;  %v2370_v42 = vld [vmem:[#allocation5 + $0x390] sm:$0xff] }
 0x655   :  { %v2022_v19 = vmul.f32 %v3701_v51, %v2021_v16  ;;  %v2038_v43 = vmul.f32 %v3705_v9, %v2006_v24  ;;  %v2031_v7 = vsub.f32 1.5, %v2030_v12  ;;  %vm2044_vm0 = vweird.f32 %v3705_v9  ;;  %2443 = vmatpush.msrb.mxu2 %v2339_v6  ;;  %2399 = vmatpush.msrb.mxu0 %v2334_v36  ;;  %v2333_v16 = vld [vmem:[#allocation5 + $0x268] sm:$0xff]  ;;  %v2358_v6 = vld [vmem:[#allocation5 + $0x330] sm:$0xff] }
 0x656   :  { %vm2045_vm2 = vmor %vm2043_vm1, %vm2044_vm0  ;;  %2465 = vmatpush.msrb.mxu3 %v2373_v38  ;;  %2420 = vmatpush.msrb.mxu1 %v2370_v42  ;;  %v2355_v38 = vld [vmem:[#allocation5 + $0x318] sm:$0xff]  ;;  %v2352_v42 = vld [vmem:[#allocation5 + $0x300] sm:$0xff] }
 0x657   :  { %v2039_v30 = vmul.f32 %v3705_v9, %v2038_v43  ;;  %v2026_v25 = vsel %vm2025_vm13, %v3701_v51, %v2022_v19  ;;  %v2032_v5 = vmul.f32 %v3703_v28, %v2031_v7  ;;  %v2337_v51 = vld [vmem:[#allocation5 + $0x288] sm:$0xff]  ;;  %2400 = vmatpush.msrb.mxu0 %v2332_v1  ;;  %v2330_v19 = vld [vmem:[#allocation5 + $0x250] sm:$0xff]  ;;  %v2368_v43 = vld [vmem:[#allocation5 + $0x380] sm:$0xff] }
 0x658   :  { %v2048_v10 = vmul.f32 %v2026_v25, %v2000_v58  ;;  %2444 = vmatpush.msrb.mxu2 %v2337_v51  ;;  %v2331_v7 = vld [vmem:[#allocation5 + $0x258] sm:$0xff]  ;;  %2421 = vmatpush.msrb.mxu1 %v2368_v43 }
 0x659   :  { %v2036_v40 = vsel %vm2035_vm15, %v3703_v28, %v2032_v5  ;;  %v2040_v46 = vmul.f32 0.5, %v2039_v30  ;;  %2401 = vmatpush.msrb.mxu0 %v2330_v19  ;;  %v2369_v5 = vld [vmem:[#allocation5 + $0x388] sm:$0xff]  ;;  %v2359_v51 = vld [vmem:[#allocation5 + $0x338] sm:$0xff] }
 0x65a   :  { %2162 = vmatmul.f32.vlgmr.msra.gmra.mxu1 %v2048_v10  ;;  %2208 = vmatmul.f32.vlgmr.msra.gmra.mxu3 %v2048_v10  ;;  %v2049_v4 = vmul.f32 %v2036_v40, %v2001_v37  ;;  %v2328_v10 = vld [vmem:[#allocation5 + $0x240] sm:$0xff]  ;;  %v2366_v40 = vld [vmem:[#allocation5 + $0x370] sm:$0xff] }
 0x65b   :  { %v2041_v57 = vsub.f32 1.5, %v2040_v46  ;;  %2445 = vmatpush.msrb.mxu2 %v2335_v63  ;;  %v2329_v46 = vld [vmem:[#allocation5 + $0x248] sm:$0xff]  ;;  %2402 = vmatpush.msrb.mxu0 %v2328_v10 }
 0x65c   :  { %2142 = vmatmul.f32.gmra.mxu0 %v2049_v4  ;;  %2188 = vmatmul.f32.gmra.mxu2 %v2049_v4 }
 0x65d   :  { %v2042_v49 = vmul.f32 %v3705_v9, %v2041_v57  ;;  %2446 = vmatpush.msrb.mxu2 %v2333_v16  ;;  %2422 = vmatpush.msrb.mxu1 %v2366_v40  ;;  %v2353_v16 = vld [vmem:[#allocation5 + $0x308] sm:$0xff] }
 0x65f   :  { %v2046_v47 = vsel %vm2045_vm2, %v3705_v9, %v2042_v49  ;;  %v2371_v9 = vld [vmem:[#allocation5 + $0x398] sm:$0xff]  ;;  %2447 = vmatpush.msrb.mxu2 %v2331_v7  ;;  %2423 = vmatpush.msrb.mxu1 %v2364_v39 }
 0x660   :  { %v2050_v48 = vmul.f32 %v2046_v47, %v2002_v11  ;;  %2466 = vmatpush.msrb.mxu3 %v2371_v9  ;;  %v2367_v49 = vld [vmem:[#allocation5 + $0x378] sm:$0xff] }
 0x661   :  { %2448 = vmatpush.msrb.mxu2 %v2329_v46  ;;  %2424 = vmatpush.msrb.mxu1 %v2362_v56 }
 0x662   :  { %2165 = vmatmul.f32.gmra.mxu1 %v2050_v48  ;;  %2211 = vmatmul.f32.gmra.mxu3 %v2050_v48  ;;  %v2326_v48 = vld [vmem:[#allocation5 + $0x230] sm:$0xff] }
 0x663   :  { %2467 = vmatpush.msrb.mxu3 %v2369_v5  ;;  %2403 = vmatpush.msrb.mxu0 %v2326_v48 }
 0x664   :  { %2449 = vmatpush.msrb.mxu2 %v2327_v52  ;;  %2425 = vmatpush.msrb.mxu1 %v2360_v41 }
 0x665   :  { %2468 = vmatpush.msrb.mxu3 %v2367_v49  ;;  %2404 = vmatpush.msrb.mxu0 %v2324_v35 }
 0x666   :  { %2450 = vmatpush.msrb.mxu2 %v2325_v61  ;;  %2426 = vmatpush.msrb.mxu1 %v2358_v6 }
 0x667   :  { %2469 = vmatpush.msrb.mxu3 %v2365_v53  ;;  %2405 = vmatpush.msrb.mxu0 %v2322_v62 }
 0x668   :  { %2451 = vmatpush.msrb.mxu2 %v2323_v60  ;;  %2427 = vmatpush.msrb.mxu1 %v2356_v59 }
 0x669   :  { %2470 = vmatpush.msrb.mxu3 %v2363_v3  ;;  %2406 = vmatpush.msrb.mxu0 %v2320_v2 }
 0x66a   :  { %2452 = vmatpush.msrb.mxu2 %v2321_v17 }
 0x6d1   :  { %v2140_v15 = vpop.f32.mrf.mxu0 }
 0x6d2   :  { %v2141_v24 = vadd.f32 %v2140_v15, %v2119_v29  ;;  %v2361_v15 = vld [vmem:[#allocation5 + $0x348] sm:$0xff] }
 0x6d3   :  { %2471 = vmatpush.msrb.mxu3 %v2361_v15 }
 0x6d5   :  { %2472 = vmatpush.msrb.mxu3 %v2359_v51 }
 0x6d7   :  { %v2163_v27 = vpop.f32.mrf.mxu1  ;;  %v2186_v28 = vpop.f32.mrf.mxu2  ;;  %2473 = vmatpush.msrb.mxu3 %v2357_v26 }
 0x6d8   :  { %v4998_v8 = vadd.f32 %v2163_v27, %v2141_v24  ;;  %v2187_v30 = vadd.f32 %v2186_v28, %v2120_v54 }
 0x6d9   :  { %v2143_v25 = vpop.f32.mrf.mxu0  ;;  %2474 = vmatpush.msrb.mxu3 %v2355_v38 }
 0x6da   :  { %v5002_v12 = vmul.f32 0.70710677, %v4998_v8  ;;  %v2144_v11 = vadd.f32 %v2143_v25, %v2119_v29 }
 0x6db   :  { %2475 = vmatpush.msrb.mxu3 %v2353_v16 }
 0x6dc   :  { %v5005_v58 = vand.u32 2147483647, %v5002_v12  ;;  %vm2299_vm3 = vcmp.ge.f32.partialorder %v5002_v12, 0.0 }
 0x6dd   :  { %v2209_v37 = vpop.f32.mrf.mxu3 }
 0x6de   :  { %v2227_v4 = vmul.f32 0.3275911, %v5005_v58  ;;  %v5010_v57 = vadd.f32 %v2209_v37, %v2187_v30  ;;  %v2275_v28 = vsub.f32 0.0, %v5005_v58 }
 0x6df   :  { %v2166_v47 = vpop.f32.mrf.mxu1  ;;  %v2189_v55 = vpop.f32.mrf.mxu2 }
 0x6e0   :  { %v2231_v31 = vadd.f32 1.0, %v2227_v4  ;;  %v5015_v44 = vmul.f32 0.70710677, %v5010_v57  ;;  %v5017_v50 = vadd.f32 %v2166_v47, %v2144_v11  ;;  %v2190_v29 = vadd.f32 %v2189_v55, %v2120_v54  ;;  %v2354_v54 = vld [vmem:[#allocation5 + $0x310] sm:$0xff] }
 0x6e1   :  { %2428 = vmatpush.msrb.mxu1 %v2354_v54  ;;  %v2279_v19 = vmul.f32 %v2275_v28, %v5005_v58 }
 0x6e2   :  { %3706 = vrcp.f32 %v2231_v31  ;;  %v5020_v22 = vand.u32 2147483647, %v5015_v44  ;;  %v5023_v45 = vmul.f32 0.70710677, %v5017_v50  ;;  %vm2300_vm5 = vcmp.ge.f32.partialorder %v5015_v44, 0.0 }
 0x6e3   :  { %2429 = vmatpush.msrb.mxu1 %v2352_v42  ;;  %v2283_v40 = vmul.f32 1.442695, %v2279_v19 }
 0x6e4   :  { %v2228_v0 = vmul.f32 0.3275911, %v5020_v22  ;;  %v2225_v13 = vand.u32 2147483647, %v5023_v45  ;;  %v2276_v25 = vsub.f32 0.0, %v5020_v22  ;;  %vm2301_vm6 = vcmp.ge.f32.partialorder %v5023_v45, 0.0 }
 0x6e5   :  { %v2212_v18 = vpop.f32.mrf.mxu3 }
 0x6e6   :  { %v2232_v20 = vadd.f32 1.0, %v2228_v0  ;;  %v5029_v14 = vadd.f32 %v2212_v18, %v2190_v29  ;;  %v2229_v24 = vmul.f32 0.3275911, %v2225_v13  ;;  %v2277_v11 = vsub.f32 0.0, %v2225_v13 }
 0x6e7   :  { %v2280_v47 = vmul.f32 %v2276_v25, %v5020_v22 }
 0x6e8   :  { %v3707_v27 = vpop.eup %3706  ;;  %3708 = vrcp.f32 %v2232_v20  ;;  %v5033_v36 = vmul.f32 0.70710677, %v5029_v14  ;;  %v2233_v63 = vadd.f32 1.0, %v2229_v24  ;;  %v2281_v55 = vmul.f32 %v2277_v11, %v2225_v13 }
 0x6e9   :  { %v2239_v34 = vmul.f32 1.0614054, %v3707_v27  ;;  %v2285_v56 = vmul.f32 1.442695, %v2280_v47 }
 0x6ea   :  { %v2226_v1 = vand.u32 2147483647, %v5033_v36  ;;  %3710 = vrcp.f32 %v2233_v63  ;;  %v2287_v18 = vmul.f32 1.442695, %v2281_v55  ;;  %vm2302_vm7 = vcmp.ge.f32.partialorder %v5033_v36, 0.0 }
 0x6eb   :  { %v2243_v9 = vadd.f32 -1.4531521, %v2239_v34 }
 0x6ec   :  { %v2230_v43 = vmul.f32 0.3275911, %v2226_v1  ;;  %v2278_v61 = vsub.f32 0.0, %v2226_v1 }
 0x6ed   :  { %v2247_v7 = vmul.f32 %v3707_v27, %v2243_v9 }
 0x6ee   :  { %v3709_v30 = vpop.eup %3708  ;;  %v2234_v5 = vadd.f32 1.0, %v2230_v43  ;;  %v2282_v6 = vmul.f32 %v2278_v61, %v2226_v1  ;;  %v2215_v43 = vmul.f32 0.5, %v4998_v8  ;;  %v2216_v8 = vmul.f32 0.5, %v5010_v57 }
 0x6ef   :  { %v2251_v37 = vadd.f32 1.4214138, %v2247_v7  ;;  %v2240_v10 = vmul.f32 1.0614054, %v3709_v30 }
 0x6f0   :  { %3712 = vrcp.f32 %v2234_v5  ;;  %v3711_v46 = vpop.eup %3710  ;;  %v2289_v34 = vmul.f32 1.442695, %v2282_v6 }
 0x6f1   :  { %v2255_v4 = vmul.f32 %v3707_v27, %v2251_v37  ;;  %v2244_v49 = vadd.f32 -1.4531521, %v2240_v10  ;;  %v2241_v48 = vmul.f32 1.0614054, %v3711_v46  ;;  %3714 = vpow2.f32 %v2283_v40 }
 0x6f2   :  { %3716 = vpow2.f32 %v2285_v56 }
 0x6f3   :  { %v2259_v58 = vadd.f32 -0.28449672, %v2255_v4  ;;  %v2248_v39 = vmul.f32 %v3709_v30, %v2244_v49  ;;  %v2245_v52 = vadd.f32 -1.4531521, %v2241_v48  ;;  %3718 = vpow2.f32 %v2287_v18 }
 0x6f4   :  { %3720 = vpow2.f32 %v2289_v34 }
 0x6f5   :  { %v2263_v31 = vmul.f32 %v3707_v27, %v2259_v58  ;;  %v2252_v53 = vadd.f32 1.4214138, %v2248_v39  ;;  %v2249_v3 = vmul.f32 %v3711_v46, %v2245_v52 }
 0x6f6   :  { %v3713_v35 = vpop.eup %3712 }
 0x6f7   :  { %v2267_v62 = vadd.f32 0.2548296, %v2263_v31  ;;  %v2256_v41 = vmul.f32 %v3709_v30, %v2252_v53  ;;  %v2242_v60 = vmul.f32 1.0614054, %v3713_v35  ;;  %v2253_v0 = vadd.f32 1.4214138, %v2249_v3  ;;  %v3715_v2 = vpop.eup %3714 }
 0x6f8   :  { %v3717_v42 = vpop.eup %3716  ;;  %v2217_v53 = vmul.f32 0.5, %v5017_v50  ;;  %v5050_v50 = vld [vmem:[%s5504_s10 + $0x2] sm:$0x3]  ;;  %s3948_s10 = smov 64  }
 0x6f9   :  { %v2271_v29 = vmul.f32 %v3707_v27, %v2267_v62  ;;  %v2260_v15 = vadd.f32 -0.28449672, %v2256_v41  ;;  %v2246_v22 = vadd.f32 -1.4531521, %v2242_v60  ;;  %v2257_v17 = vmul.f32 %v3711_v46, %v2253_v0  ;;  %v3719_v5 = vpop.eup %3718 }
 0x6fa   :  { %v3721_v48 = vpop.eup %3720  ;;  %v2387_v41 = vperm.slane %v5050_v50, 0 }
 0x6fb   :  { %v2291_v20 = vmul.f32 %v3715_v2, %v2271_v29  ;;  %v2264_v51 = vmul.f32 %v3709_v30, %v2260_v15  ;;  %v2250_v24 = vmul.f32 %v3713_v35, %v2246_v22  ;;  %v2261_v13 = vadd.f32 -0.28449672, %v2257_v17 }
 0x6fd   :  { %v2295_v59 = vsub.f32 1.0, %v2291_v20  ;;  %v2268_v26 = vadd.f32 0.2548296, %v2264_v51  ;;  %v2254_v28 = vadd.f32 1.4214138, %v2250_v24  ;;  %v2265_v63 = vmul.f32 %v3711_v46, %v2261_v13 }
 0x6ff   :  { %v2303_v54 = vsub.f32 0.0, %v2295_v59  ;;  %v2272_v38 = vmul.f32 %v3709_v30, %v2268_v26  ;;  %v2258_v27 = vmul.f32 %v3713_v35, %v2254_v28  ;;  %v2269_v16 = vadd.f32 0.2548296, %v2265_v63 }
 0x701   :  { %v2307_v9 = vsel %vm2299_vm3, %v2295_v59, %v2303_v54  ;;  %v2292_v1 = vmul.f32 %v3717_v42, %v2272_v38  ;;  %v2262_v19 = vadd.f32 -0.28449672, %v2258_v27  ;;  %v2273_v25 = vmul.f32 %v3711_v46, %v2269_v16 }
 0x702   :  { %v2311_v7 = vadd.f32 1.0, %v2307_v9  ;;  %v3949_v59 = vmov 512.0  }
 0x703   :  { %v2296_v37 = vsub.f32 1.0, %v2292_v1  ;;  %v2266_v10 = vmul.f32 %v3713_v35, %v2262_v19  ;;  %v2293_v4 = vmul.f32 %v3719_v5, %v2273_v25  ;;  %3722 = vrcp.f32 %v3949_v59 }
 0x704   :  { %v2315_v40 = vmul.f32 %v2311_v7, %v2215_v43 }
 0x705   :  { %v2304_v49 = vsub.f32 0.0, %v2296_v37  ;;  %v2270_v30 = vadd.f32 0.2548296, %v2266_v10  ;;  %v2297_v12 = vsub.f32 1.0, %v2293_v4 }
 0x706   :  { %2407 = vmatmul.f32.vlgmr.msrb.gmra.mxu0 %v2315_v40  ;;  %2453 = vmatmul.f32.vlgmr.msrb.gmra.mxu2 %v2315_v40 }
 0x707   :  { %v2308_v11 = vsel %vm2300_vm5, %v2296_v37, %v2304_v49  ;;  %v2274_v47 = vmul.f32 %v3713_v35, %v2270_v30  ;;  %v2305_v39 = vsub.f32 0.0, %v2297_v12  ;;  %v2218_v35 = vmul.f32 0.5, %v5029_v14 }
 0x708   :  { %v2312_v58 = vadd.f32 1.0, %v2308_v11 }
 0x709   :  { %v2294_v46 = vmul.f32 %v3721_v48, %v2274_v47  ;;  %v2309_v31 = vsel %vm2301_vm6, %v2297_v12, %v2305_v39  ;;  %v3723_v28 = vpop.eup %3722 }
 0x70a   :  { %v2316_v52 = vmul.f32 %v2312_v58, %v2216_v8  ;;  %v2313_v55 = vadd.f32 1.0, %v2309_v31  ;;  %v2508_v34 = vmul.f32 512.0, %v3723_v28  ;;  %vm2512_vm8 = vweird.f32 %v3723_v28 }
 0x70b   :  { %v2298_v56 = vsub.f32 1.0, %v2294_v46 }
 0x70c   :  { %2430 = vmatmul.f32.vlgmr.msrb.gmra.mxu1 %v2316_v52  ;;  %2476 = vmatmul.f32.vlgmr.msrb.gmra.mxu3 %v2316_v52  ;;  %v2317_v44 = vmul.f32 %v2313_v55, %v2217_v53  ;;  %v2509_v42 = vsub.f32 1.0, %v2508_v34 }
 0x70d   :  { %v2306_v61 = vsub.f32 0.0, %v2298_v56 }
 0x70e   :  { %2410 = vmatmul.f32.gmra.mxu0 %v2317_v44  ;;  %2456 = vmatmul.f32.gmra.mxu2 %v2317_v44  ;;  %v2510_v7 = vmul.f32 %v3723_v28, %v2509_v42  ;;  %v2388_v44 = vperm.slane %v5050_v50, 1 }
 0x70f   :  { %v2310_v57 = vsel %vm2302_vm7, %v2298_v56, %v2306_v61 }
 0x710   :  { %v2314_v3 = vadd.f32 1.0, %v2310_v57  ;;  %v2511_v4 = vadd.f32 %v3723_v28, %v2510_v7 }
 0x712   :  { %v2318_v45 = vmul.f32 %v2314_v3, %v2218_v35  ;;  %v2513_v11 = vsel %vm2512_vm8, %v3723_v28, %v2511_v4 }
 0x714   :  { %2433 = vmatmul.f32.gmra.mxu1 %v2318_v45  ;;  %2479 = vmatmul.f32.gmra.mxu3 %v2318_v45 }
 0x783   :  { %v2408_v62 = vpop.f32.mrf.mxu0 }
 0x784   :  { %v2409_v60 = vadd.f32 %v2408_v62, %v2387_v41 }
 0x789   :  { %v2431_v0 = vpop.f32.mrf.mxu1  ;;  %v2454_v61 = vpop.f32.mrf.mxu2 }
 0x78a   :  { %v2432_v36 = vadd.f32 %v2431_v0, %v2409_v60  ;;  %v2455_v35 = vadd.f32 %v2454_v61, %v2388_v44 }
 0x78b   :  { %v2411_v15 = vpop.f32.mrf.mxu0 }
 0x78c   :  { %v5054_v29 = vadd.f32 %v2432_v36, %v4938_v33  ;;  %v2412_v14 = vadd.f32 %v2411_v15, %v2387_v41 }
 0x78e   :  { %2611 = vrot.lane.b32.xlu1 %v5054_v29, %s3947_s24  ;;  %v5063_v6 = vmul.f32 %v5054_v29, %v5054_v29  ;;  %v2495_v33 = vsel %vm2494_vm4, %v5054_v29, 0.0 }
 0x78f   :  { %v2477_v57 = vpop.f32.mrf.mxu3 }
 0x790   :  { %v2478_v3 = vadd.f32 %v2477_v57, %v2455_v35 }
 0x791   :  { %v2434_v18 = vpop.f32.mrf.mxu1  ;;  %v2457_v62 = vpop.f32.mrf.mxu2 }
 0x792   :  { %v2435_v22 = vadd.f32 %v2434_v18, %v2412_v14  ;;  %v5107_v45 = vadd.f32 %v2478_v3, %v4943_v23  ;;  %v2458_v60 = vadd.f32 %v2457_v62, %v2388_v44 }
 0x794   :  { %v5059_v2 = vadd.f32 %v2435_v22, %v4948_v32  ;;  %v2518_v32 = vsel %vm2494_vm4, %v5063_v6, 0.0  ;;  %v5113_v0 = vmul.f32 %v5107_v45, %v5107_v45 }
 0x796   :  { %2613 = vrot.lane.b32.xlu1 %v5059_v2, %s3947_s24  ;;  %v2496_v17 = vsel %vm2494_vm4, %v5059_v2, 0.0  ;;  %v5073_v20 = vmul.f32 %v5059_v2, %v5059_v2 }
 0x797   :  { %v2497_v51 = vadd.f32 %v2496_v17, %v2495_v33  ;;  %v2480_v41 = vpop.f32.mrf.mxu3 }
 0x798   :  { %v2519_v24 = vsel %vm2494_vm4, %v5073_v20, 0.0  ;;  %v2481_v50 = vadd.f32 %v2480_v41, %v2458_v60 }
 0x799   :  { %2498 = vadd.xlane.f32.xlu2 %v2497_v51  ;;  %v2520_v13 = vadd.f32 %v2519_v24, %v2518_v32 }
 0x79a   :  { %v5118_v36 = vadd.f32 %v2481_v50, %v4953_v21 }
 0x79b   :  { %2521 = vadd.xlane.f32.xlu0 %v2520_v13 }
 0x79c   :  { %v5130_v23 = vmul.f32 %v5118_v36, %v5118_v36 }
 0x79e   :  { %2640 = vrot.lane.b32.xlu1 %v5063_v6, %s3947_s24 }
 0x7a6   :  { %2642 = vrot.lane.b32.xlu1 %v5073_v20, %s3947_s24 }
 0x7af   :  { %2756 = vrot.lane.b32.xlu0 %v5059_v2, %s3948_s10 }
 0x7b1   :  { %2754 = vrot.lane.b32.xlu2 %v5054_v29, %s3948_s10 }
 0x7b7   :  { %2781 = vrot.lane.b32.xlu0 %v5063_v6, %s3948_s10 }
 0x800   :  { %v2612_v26 = vpop.permute.xlu1 %2611 }
 0x801   :  { %v2617_v54 = vsel %vm2494_vm4, %v2612_v26, 0.0 }
 0x808   :  { %v2614_v63 = vpop.permute.xlu1 %2613 }
 0x809   :  { %v2618_v38 = vsel %vm2494_vm4, %v2614_v63, 0.0 }
 0x80a   :  { %v2619_v27 = vadd.f32 %v2618_v38, %v2617_v54 }
 0x80c   :  { %2620 = vadd.xlane.f32.xlu1 %v2619_v27  ;;  %v2499_v16 = vpop.xlane.xlu2 %2498 }
 0x80d   :  { %v2500_v9 = vrot.slane %v2499_v16, 4 }
 0x80e   :  { %v2522_v1 = vpop.xlane.xlu0 %2521 }
 0x80f   :  { %v2501_v19 = vadd.f32 %v2500_v9, %v2499_v16  ;;  %v2523_v43 = vrot.slane %v2522_v1, 4 }
 0x810   :  { %v2641_v25 = vpop.permute.xlu1 %2640 }
 0x811   :  { %v2502_v5 = vrot.slane %v2501_v19, 2  ;;  %v2524_v37 = vadd.f32 %v2523_v43, %v2522_v1  ;;  %v2646_v8 = vsel %vm2494_vm4, %v2641_v25, 0.0 }
 0x813   :  { %v2525_v10 = vrot.slane %v2524_v37, 2  ;;  %v2503_v40 = vadd.f32 %v2502_v5, %v2501_v19 }
 0x814   :  { %v2755_v52 = vpop.permute.xlu2 %2754 }
 0x815   :  { %v2504_v49 = vrot.slane %v2503_v40, 1  ;;  %v2526_v30 = vadd.f32 %v2525_v10, %v2524_v37  ;;  %v2760_v53 = vsel %vm2494_vm4, %v2755_v52, 0.0 }
 0x817   :  { %v2505_v12 = vadd.f32 %v2504_v49, %v2503_v40  ;;  %v2527_v47 = vrot.slane %v2526_v30, 1 }
 0x818   :  { %v2643_v48 = vpop.permute.xlu1 %2642 }
 0x819   :  { %v2647_v58 = vsel %vm2494_vm4, %v2643_v48, 0.0  ;;  %3566 = vpush %v2505_v12  ;;  %v2528_v39 = vadd.f32 %v2527_v47, %v2526_v30  ;;  %v3029_v48 = vsel %vm2494_vm4, %v5118_v36, 0.0 }
 0x81a   :  { %3568 = vpush %v2513_v11  ;;  %v2648_v46 = vadd.f32 %v2647_v58, %v2646_v8  ;;  %v3028_v8 = vsel %vm2494_vm4, %v5107_v45, 0.0 }
 0x81b   :  { %3570 = vpush %v2528_v39  ;;  %v3030_v39 = vadd.f32 %v3029_v48, %v3028_v8 }
 0x81c   :  { %2649 = vadd.xlane.f32.xlu2 %v2648_v46 }
 0x821   :  { %v2757_v31 = vpop.permute.xlu0 %2756 }
 0x822   :  { %v2761_v55 = vsel %vm2494_vm4, %v2757_v31, 0.0 }
 0x823   :  { %v2762_v56 = vadd.f32 %v2761_v55, %v2760_v53  ;;  %v3052_v55 = vsel %vm2494_vm4, %v5130_v23, 0.0 }
 0x825   :  { %2891 = vrot.lane.b32.xlu1 %v5054_v29, %s3950_s11  ;;  %2763 = vadd.xlane.f32.xlu0 %v2762_v56  ;;  %v3051_v56 = vsel %vm2494_vm4, %v5113_v0, 0.0 }
 0x826   :  { %v3053_v44 = vadd.f32 %v3052_v55, %v3051_v56 }
 0x829   :  { %v2782_v54 = vpop.permute.xlu0 %2781 }
 0x82a   :  { %v2787_v16 = vsel %vm2494_vm4, %v2782_v54, 0.0 }
 0x82d   :  { %2893 = vrot.lane.b32.xlu1 %v5059_v2, %s3950_s11 }
 0x834   :  { %2783 = vrot.lane.b32.xlu2 %v5073_v20, %s3948_s10 }
 0x835   :  { %2918 = vrot.lane.b32.xlu1 %v5063_v6, %s3950_s11 }
 0x839   :  { %2920 = vrot.lane.b32.xlu0 %v5073_v20, %s3950_s11 }
 0x841   :  { %3137 = vrot.lane.b32.xlu0 %v5107_v45, %s3947_s24 }
 0x849   :  { %3166 = vrot.lane.b32.xlu0 %v5113_v0, %s3947_s24 }
 0x84a   :  { %s3567_s25 = spop %3566 }
 0x84b   :  { %s5120_s26 = spop %3568 }
 0x84c   :  { %s5123_s27 = smul.f32 %s5120_s26, %s3567_s25  ;;  %s3571_s6 = spop %3570 }
 0x84d   :  { %s2538_s1 = smul.f32 %s3571_s6, %s5120_s26 }
 0x84e   :  { %s2539_s2 = smul.f32 %s5123_s27, %s5123_s27  ;;  %v2541_v27 = vstv %s5123_s27 }
 0x84f   :  { %v2542_v19 = vsub.f32 %v5054_v29, %v2541_v27  ;;  %v2543_v43 = vsub.f32 %v5059_v2, %v2541_v27 }
 0x850   :  { %s2540_s28 = ssub.f32 %s2538_s1, %s2539_s2 }
 0x851   :  { %3168 = vrot.lane.b32.xlu0 %v5130_v23, %s3947_s24 }
 0x852   :  { %s2544_s29 = sadd.f32 1e-05, %s2540_s28 }
 0x854   :  { %v2545_v21 = vstv %s2544_s29 }
 0x855   :  { %3724 = vrsqrt.f32 %v2545_v21  ;;  %vm2552_vm10 = vweird.f32 %v2545_v21 }
 0x85b   :  { %v3725_v15 = vpop.eup %3724 }
 0x85c   :  { %v2547_v14 = vmul.f32 %v3725_v15, %v2545_v21  ;;  %vm2553_vm9 = vweird.f32 %v3725_v15 }
 0x85d   :  { %vm2554_vm11 = vmor %vm2552_vm10, %vm2553_vm9 }
 0x85e   :  { %v2548_v18 = vmul.f32 %v3725_v15, %v2547_v14 }
 0x860   :  { %v2549_v22 = vmul.f32 0.5, %v2548_v18 }
 0x862   :  { %v2550_v6 = vsub.f32 1.5, %v2549_v22 }
 0x864   :  { %v2551_v33 = vmul.f32 %v3725_v15, %v2550_v6 }
 0x866   :  { %v2555_v17 = vsel %vm2554_vm11, %v3725_v15, %v2551_v33 }
 0x867   :  { %3572 = vpush %v2555_v17 }
 0x87f   :  { %v2621_v20 = vpop.xlane.xlu1 %2620 }
 0x880   :  { %v2622_v51 = vrot.slane %v2621_v20, 4 }
 0x882   :  { %v2623_v32 = vadd.f32 %v2622_v51, %v2621_v20 }
 0x884   :  { %v2624_v24 = vrot.slane %v2623_v32, 2 }
 0x886   :  { %v2625_v13 = vadd.f32 %v2624_v24, %v2623_v32 }
 0x888   :  { %v2626_v59 = vrot.slane %v2625_v13, 1 }
 0x88a   :  { %v2627_v26 = vadd.f32 %v2626_v59, %v2625_v13 }
 0x88c   :  { %3574 = vpush %v2627_v26 }
 0x88f   :  { %v2650_v28 = vpop.xlane.xlu2 %2649 }
 0x890   :  { %v2651_v34 = vrot.slane %v2650_v28, 4 }
 0x892   :  { %v2652_v63 = vadd.f32 %v2651_v34, %v2650_v28 }
 0x894   :  { %v2653_v38 = vrot.slane %v2652_v63, 2 }
 0x896   :  { %v2654_v42 = vadd.f32 %v2653_v38, %v2652_v63 }
 0x897   :  { %v2892_v9 = vpop.permute.xlu1 %2891  ;;  %v2784_v1 = vpop.permute.xlu2 %2783 }
 0x898   :  { %s3573_s30 = spop %3572  ;;  %v2788_v7 = vsel %vm2494_vm4, %v2784_v1, 0.0  ;;  %v2655_v25 = vrot.slane %v2654_v42, 1  ;;  %v2897_v30 = vsel %vm2494_vm4, %v2892_v9, 0.0  ;;  %v2764_v47 = vpop.xlane.xlu0 %2763 }
 0x899   :  { %v2557_v5 = vstv %s3573_s30  ;;  %v2789_v37 = vadd.f32 %v2788_v7, %v2787_v16  ;;  %v2765_v60 = vrot.slane %v2764_v47, 4 }
 0x89a   :  { %v5139_v10 = vmul.f32 %v2557_v5, %v2542_v19  ;;  %v5141_v40 = vmul.f32 %v2557_v5, %v2543_v43  ;;  %v2656_v4 = vadd.f32 %v2655_v25, %v2654_v42 }
 0x89b   :  { %2790 = vadd.xlane.f32.xlu2 %v2789_v37  ;;  %v2766_v21 = vadd.f32 %v2765_v60, %v2764_v47 }
 0x89c   :  { %3576 = vpush %v2656_v4 }
 0x89d   :  { %v2767_v15 = vrot.slane %v2766_v21, 2 }
 0x89f   :  { %v2894_v49 = vpop.permute.xlu1 %2893  ;;  %v2768_v6 = vadd.f32 %v2767_v15, %v2766_v21 }
 0x8a0   :  { %v2898_v12 = vsel %vm2494_vm4, %v2894_v49, 0.0 }
 0x8a1   :  { %v2899_v11 = vadd.f32 %v2898_v12, %v2897_v30  ;;  %v2769_v20 = vrot.slane %v2768_v6, 1 }
 0x8a3   :  { %2900 = vadd.xlane.f32.xlu2 %v2899_v11  ;;  %v2770_v24 = vadd.f32 %v2769_v20, %v2768_v6  ;;  %v5216_v20 = vld [vmem:[%s5507_s13] sm:$0xff] }
 0x8a7   :  { %v2919_v58 = vpop.permute.xlu1 %2918 }
 0x8a8   :  { %v2924_v52 = vsel %vm2494_vm4, %v2919_v58, 0.0 }
 0x8ab   :  { %v2921_v46 = vpop.permute.xlu0 %2920  ;;  %3031 = vadd.xlane.f32.xlu2 %v3030_v39 }
 0x8ac   :  { %v2925_v31 = vsel %vm2494_vm4, %v2921_v46, 0.0 }
 0x8ad   :  { %v2926_v53 = vadd.f32 %v2925_v31, %v2924_v52 }
 0x8af   :  { %2927 = vadd.xlane.f32.xlu1 %v2926_v53 }
 0x8b3   :  { %v3138_v61 = vpop.permute.xlu0 %3137  ;;  %3054 = vadd.xlane.f32.xlu2 %v3053_v44 }
 0x8b4   :  { %v3143_v5 = vsel %vm2494_vm4, %v3138_v61, 0.0 }
 0x8bb   :  { %v3167_v57 = vpop.permute.xlu0 %3166 }
 0x8bc   :  { %v3172_v3 = vsel %vm2494_vm4, %v3167_v57, 0.0 }
 0x8bd   :  { %s3575_s0 = spop %3574 }
 0x8be   :  { %s5158_s17 = smul.f32 %s3575_s0, %s5120_s26 }
 0x8c0   :  { %s2667_s4 = smul.f32 %s5158_s17, %s5158_s17  ;;  %v2669_v34 = vstv %s5158_s17 }
 0x8c1   :  { %v2670_v27 = vsub.f32 %v5054_v29, %v2669_v34  ;;  %v2671_v42 = vsub.f32 %v5059_v2, %v2669_v34 }
 0x8c3   :  { %v3169_v35 = vpop.permute.xlu0 %3168 }
 0x8c4   :  { %v3173_v62 = vsel %vm2494_vm4, %v3169_v35, 0.0 }
 0x8c5   :  { %v3174_v41 = vadd.f32 %v3173_v62, %v3172_v3 }
 0x8c7   :  { %3175 = vadd.xlane.f32.xlu1 %v3174_v41 }
 0x8cb   :  { %3139 = vrot.lane.b32.xlu2 %v5118_v36, %s3947_s24 }
 0x8cd   :  { %s3577_s18 = spop %3576 }
 0x8ce   :  { %s2666_s19 = smul.f32 %s3577_s18, %s5120_s26 }
 0x8d0   :  { %s2668_s7 = ssub.f32 %s2666_s19, %s2667_s4 }
 0x8d2   :  { %s2672_s3 = sadd.f32 1e-05, %s2668_s7 }
 0x8d3   :  { %3264 = vrot.lane.b32.xlu2 %v5107_v45, %s3948_s10 }
 0x8d4   :  { %v2673_v50 = vstv %s2672_s3 }
 0x8d5   :  { %3726 = vrsqrt.f32 %v2673_v50  ;;  %vm2680_vm13 = vweird.f32 %v2673_v50 }
 0x8db   :  { %v3727_v14 = vpop.eup %3726  ;;  %3291 = vrot.lane.b32.xlu2 %v5113_v0, %s3948_s10 }
 0x8dc   :  { %v2675_v18 = vmul.f32 %v3727_v14, %v2673_v50  ;;  %vm2681_vm12 = vweird.f32 %v3727_v14 }
 0x8dd   :  { %vm2682_vm14 = vmor %vm2680_vm13, %vm2681_vm12 }
 0x8de   :  { %v2676_v22 = vmul.f32 %v3727_v14, %v2675_v18 }
 0x8e0   :  { %3266 = vrot.lane.b32.xlu1 %v5118_v36, %s3948_s10  ;;  %v2677_v33 = vmul.f32 0.5, %v2676_v22 }
 0x8e2   :  { %v2678_v17 = vsub.f32 1.5, %v2677_v33 }
 0x8e3   :  { %3293 = vrot.lane.b32.xlu2 %v5130_v23, %s3948_s10 }
 0x8e4   :  { %v2679_v51 = vmul.f32 %v3727_v14, %v2678_v17  ;;  %v5209_v17 = vld [vmem:[%s5506_s12] sm:$0xff] }
 0x8e6   :  { %v2683_v32 = vsel %vm2682_vm14, %v3727_v14, %v2679_v51 }
 0x8e7   :  { %3578 = vpush %v2683_v32  ;;  %v5233_v32 = vld [vmem:[%s5506_s12 + $0x8] sm:$0xff] }
 0x8e8   :  { %3580 = vpush %v2770_v24 }
 0x90e   :  { %v2791_v13 = vpop.xlane.xlu2 %2790 }
 0x90f   :  { %v2792_v59 = vrot.slane %v2791_v13, 4 }
 0x911   :  { %v2793_v26 = vadd.f32 %v2792_v59, %v2791_v13 }
 0x913   :  { %v2794_v28 = vrot.slane %v2793_v26, 2 }
 0x915   :  { %v2795_v63 = vadd.f32 %v2794_v28, %v2793_v26 }
 0x916   :  { %v2901_v54 = vpop.xlane.xlu2 %2900 }
 0x917   :  { %v2796_v38 = vrot.slane %v2795_v63, 1  ;;  %v2902_v39 = vrot.slane %v2901_v54, 4 }
 0x918   :  { %s3579_s20 = spop %3578 }
 0x919   :  { %v2685_v16 = vstv %s3579_s20  ;;  %v2797_v9 = vadd.f32 %v2796_v38, %v2795_v63  ;;  %s3581_s9 = spop %3580  ;;  %v2903_v44 = vadd.f32 %v2902_v39, %v2901_v54 }
 0x91a   :  { %v5176_v1 = vmul.f32 %v2685_v16, %v2670_v27  ;;  %v5178_v19 = vmul.f32 %v2685_v16, %v2671_v42  ;;  %s5191_s21 = smul.f32 %s3581_s9, %s5120_s26 }
 0x91b   :  { %3582 = vpush %v2797_v9  ;;  %v2904_v57 = vrot.slane %v2903_v44, 2 }
 0x91c   :  { %s2808_s5 = smul.f32 %s5191_s21, %s5191_s21  ;;  %v2810_v51 = vstv %s5191_s21 }
 0x91d   :  { %v2905_v60 = vadd.f32 %v2904_v57, %v2903_v44  ;;  %v2811_v24 = vsub.f32 %v5054_v29, %v2810_v51  ;;  %v2812_v13 = vsub.f32 %v5059_v2, %v2810_v51 }
 0x91e   :  { %v5180_v43 = vpop.xlane.xlu2 %3031 }
 0x91f   :  { %v2906_v14 = vrot.slane %v2905_v60, 1  ;;  %v3033_v34 = vrot.slane %v5180_v43, 4 }
 0x921   :  { %v2907_v33 = vadd.f32 %v2906_v14, %v2905_v60  ;;  %v3034_v38 = vadd.f32 %v3033_v34, %v5180_v43 }
 0x922   :  { %v2928_v12 = vpop.xlane.xlu1 %2927 }
 0x923   :  { %v2929_v46 = vrot.slane %v2928_v12, 4  ;;  %v3035_v42 = vrot.slane %v3034_v38, 2 }
 0x925   :  { %v2930_v61 = vadd.f32 %v2929_v46, %v2928_v12 }
 0x926   :  { %v5182_v7 = vpop.xlane.xlu2 %3054 }
 0x927   :  { %v2931_v3 = vrot.slane %v2930_v61, 2  ;;  %v3056_v63 = vrot.slane %v5182_v7, 4 }
 0x929   :  { %v2932_v50 = vadd.f32 %v2931_v3, %v2930_v61  ;;  %v3057_v27 = vadd.f32 %v3056_v63, %v5182_v7 }
 0x92b   :  { %v2933_v18 = vrot.slane %v2932_v50, 1  ;;  %v3058_v9 = vrot.slane %v3057_v27, 2 }
 0x92e   :  { %v3140_v25 = vpop.permute.xlu2 %3139 }
 0x92f   :  { %v3144_v37 = vsel %vm2494_vm4, %v3140_v25, 0.0 }
 0x930   :  { %v3145_v4 = vadd.f32 %v3144_v37, %v3143_v5  ;;  %v3036_v37 = vadd.f32 %v3035_v42, %v3034_v38 }
 0x932   :  { %3146 = vadd.xlane.f32.xlu0 %v3145_v4  ;;  %v3059_v4 = vadd.f32 %v3058_v9, %v3057_v27  ;;  %v3037_v12 = vrot.slane %v3036_v37, 1 }
 0x934   :  { %v3038_v43 = vadd.f32 %v3037_v12, %v3036_v37 }
 0x936   :  { %v3265_v49 = vpop.permute.xlu2 %3264 }
 0x937   :  { %v3270_v31 = vsel %vm2494_vm4, %v3265_v49, 0.0 }
 0x93a   :  { %v5193_v58 = vpop.xlane.xlu1 %3175 }
 0x93e   :  { %v3292_v30 = vpop.permute.xlu2 %3291 }
 0x93f   :  { %v3297_v47 = vsel %vm2494_vm4, %v3292_v30, 0.0 }
 0x946   :  { %3389 = vrot.lane.b32.xlu0 %v5107_v45, %s3950_s11  ;;  %v3294_v11 = vpop.permute.xlu2 %3293 }
 0x947   :  { %v3298_v48 = vsel %vm2494_vm4, %v3294_v11, 0.0 }
 0x948   :  { %v3299_v8 = vadd.f32 %v3298_v48, %v3297_v47  ;;  %v3060_v47 = vrot.slane %v3059_v4, 1 }
 0x94a   :  { %3300 = vadd.xlane.f32.xlu1 %v3299_v8  ;;  %v3061_v7 = vadd.f32 %v3060_v47, %v3059_v4  ;;  %v2561_v4 = vmul.f32 %v5141_v40, %v5233_v32 }
 0x94c   :  { %s3583_s22 = spop %3582 }
 0x94d   :  { %s2807_s8 = smul.f32 %s3583_s22, %s5120_s26 }
 0x94e   :  { %3391 = vrot.lane.b32.xlu0 %v5118_v36, %s3950_s11 }
 0x94f   :  { %s2809_s23 = ssub.f32 %s2807_s8, %s2808_s5 }
 0x951   :  { %s2813_s25 = sadd.f32 1e-05, %s2809_s23 }
 0x952   :  { %v3267_v52 = vpop.permute.xlu1 %3266 }
 0x953   :  { %v2814_v53 = vstv %s2813_s25  ;;  %v3271_v55 = vsel %vm2494_vm4, %v3267_v52, 0.0 }
 0x954   :  { %3728 = vrsqrt.f32 %v2814_v53  ;;  %v3272_v56 = vadd.f32 %v3271_v55, %v3270_v31  ;;  %vm2821_vm0 = vweird.f32 %v2814_v53 }
 0x956   :  { %3416 = vrot.lane.b32.xlu0 %v5113_v0, %s3950_s11  ;;  %3273 = vadd.xlane.f32.xlu2 %v3272_v56  ;;  %v2934_v0 = vadd.f32 %v2933_v18, %v2932_v50 }
 0x95a   :  { %v3729_v35 = vpop.eup %3728 }
 0x95b   :  { %v2816_v62 = vmul.f32 %v3729_v35, %v2814_v53  ;;  %vm2822_vm15 = vweird.f32 %v3729_v35 }
 0x95c   :  { %vm2823_vm1 = vmor %vm2821_vm0, %vm2822_vm15 }
 0x95d   :  { %v2817_v41 = vmul.f32 %v3729_v35, %v2816_v62 }
 0x95f   :  { %v2818_v21 = vmul.f32 0.5, %v2817_v41 }
 0x961   :  { %v2819_v15 = vsub.f32 1.5, %v2818_v21 }
 0x963   :  { %v2820_v22 = vmul.f32 %v3729_v35, %v2819_v15 }
 0x965   :  { %v2824_v6 = vsel %vm2823_vm1, %v3729_v35, %v2820_v22 }
 0x966   :  { %3584 = vpush %v2824_v6 }
 0x967   :  { %3586 = vpush %v2907_v33 }
 0x968   :  { %3588 = vpush %v2934_v0 }
 0x96e   :  { %3418 = vrot.lane.b32.xlu2 %v5130_v23, %s3950_s11  ;;  %v5223_v23 = vld [vmem:[%s5507_s13 + $0x8] sm:$0xff] }
 0x976   :  { %2690 = vrot.lane.b32.xlu2 %v5209_v17, %s3950_s11 }
 0x97e   :  { %2700 = vrot.lane.b32.xlu2 %v5216_v20, %s3950_s11 }
 0x986   :  { %2702 = vrot.lane.b32.xlu2 %v5223_v23, %s3950_s11 }
 0x98e   :  { %2966 = vrot.lane.b32.xlu2 %v5209_v17, %s3947_s24 }
 0x996   :  { %2968 = vrot.lane.b32.xlu2 %v5233_v32, %s3947_s24 }
 0x997   :  { %s3585_s13 = spop %3584 }
 0x998   :  { %v2826_v59 = vstv %s3585_s13  ;;  %s3587_s17 = spop %3586 }
 0x999   :  { %v5239_v26 = vmul.f32 %v2826_v59, %v2811_v24  ;;  %v5241_v28 = vmul.f32 %v2826_v59, %v2812_v13  ;;  %s5244_s4 = smul.f32 %s3587_s17, %s5120_s26  ;;  %s3589_s18 = spop %3588 }
 0x99a   :  { %s2944_s12 = smul.f32 %s3589_s18, %s5120_s26 }
 0x99b   :  { %s2945_s19 = smul.f32 %s5244_s4, %s5244_s4  ;;  %v2947_v60 = vstv %s5244_s4 }
 0x99c   :  { %v2948_v21 = vsub.f32 %v5054_v29, %v2947_v60  ;;  %v2949_v15 = vsub.f32 %v5059_v2, %v2947_v60  ;;  %v3177_v2 = vrot.slane %v5193_v58, 4 }
 0x99d   :  { %s2946_s7 = ssub.f32 %s2944_s12, %s2945_s19 }
 0x99e   :  { %2974 = vrot.lane.b32.xlu2 %v5216_v20, %s3947_s24  ;;  %v3178_v33 = vadd.f32 %v3177_v2, %v5193_v58 }
 0x99f   :  { %s2950_s3 = sadd.f32 1e-05, %s2946_s7 }
 0x9a0   :  { %v3179_v24 = vrot.slane %v3178_v33, 2 }
 0x9a1   :  { %v2951_v54 = vstv %s2950_s3 }
 0x9a2   :  { %3730 = vrsqrt.f32 %v2951_v54  ;;  %vm2958_vm3 = vweird.f32 %v2951_v54  ;;  %v3180_v63 = vadd.f32 %v3179_v24, %v3178_v33 }
 0x9a4   :  { %v3181_v42 = vrot.slane %v3180_v63, 1 }
 0x9a5   :  { %v3147_v11 = vpop.xlane.xlu0 %3146 }
 0x9a6   :  { %v3148_v29 = vrot.slane %v3147_v11, 4 }
 0x9a8   :  { %v3731_v16 = vpop.eup %3730  ;;  %v3149_v6 = vadd.f32 %v3148_v29, %v3147_v11 }
 0x9a9   :  { %v2953_v25 = vmul.f32 %v3731_v16, %v2951_v54  ;;  %vm2959_vm2 = vweird.f32 %v3731_v16 }
 0x9aa   :  { %vm2960_vm5 = vmor %vm2958_vm3, %vm2959_vm2  ;;  %v3150_v0 = vrot.slane %v3149_v6, 2 }
 0x9ab   :  { %v2954_v5 = vmul.f32 %v3731_v16, %v2953_v25  ;;  %v3182_v25 = vadd.f32 %v3181_v42, %v3180_v63 }
 0x9ac   :  { %v3151_v34 = vadd.f32 %v3150_v0, %v3149_v6 }
 0x9ad   :  { %v2955_v49 = vmul.f32 0.5, %v2954_v5  ;;  %v2560_v5 = vmul.f32 %v5139_v10, %v5209_v17 }
 0x9ae   :  { %v3152_v27 = vrot.slane %v3151_v34, 1 }
 0x9af   :  { %v2956_v30 = vsub.f32 1.5, %v2955_v49  ;;  %v2562_v37 = vadd.f32 %v2560_v5, %v5216_v20 }
 0x9b0   :  { %v3153_v9 = vadd.f32 %v3152_v27, %v3151_v34 }
 0x9b1   :  { %v2957_v48 = vmul.f32 %v3731_v16, %v2956_v30  ;;  %v2564_v49 = vsel %vm2494_vm4, %v2562_v37, 0.0  ;;  %v2563_v30 = vadd.f32 %v2561_v4, %v5223_v23 }
 0x9b3   :  { %v2961_v8 = vsel %vm2960_vm5, %v3731_v16, %v2957_v48  ;;  %v2567_v12 = vsel %vm2494_vm4, %v2563_v30, 0.0 }
 0x9b4   :  { %3590 = vpush %v2961_v8 }
 0x9b5   :  { %3592 = vpush %v3038_v43 }
 0x9b6   :  { %3594 = vpush %v3061_v7 }
 0x9b8   :  { %v3390_v39 = vpop.permute.xlu0 %3389 }
 0x9b9   :  { %v3395_v52 = vsel %vm2494_vm4, %v3390_v39, 0.0 }
 0x9bd   :  { %v3301_v43 = vpop.xlane.xlu1 %3300 }
 0x9be   :  { %v3302_v39 = vrot.slane %v3301_v43, 4 }
 0x9c0   :  { %v3392_v46 = vpop.permute.xlu0 %3391 }
 0x9c1   :  { %v3396_v31 = vsel %vm2494_vm4, %v3392_v46, 0.0 }
 0x9c2   :  { %v3397_v53 = vadd.f32 %v3396_v31, %v3395_v52  ;;  %v3303_v31 = vadd.f32 %v3302_v39, %v3301_v43 }
 0x9c4   :  { %3398 = vadd.xlane.f32.xlu0 %v3397_v53 }
 0x9c8   :  { %v3417_v56 = vpop.permute.xlu0 %3416 }
 0x9c9   :  { %v5257_v55 = vpop.xlane.xlu2 %3273  ;;  %v3422_v61 = vsel %vm2494_vm4, %v3417_v56, 0.0 }
 0x9ca   :  { %v3275_v7 = vrot.slane %v5257_v55, 4 }
 0x9cc   :  { %v3276_v52 = vadd.f32 %v3275_v7, %v5257_v55 }
 0x9ce   :  { %v3277_v56 = vrot.slane %v3276_v52, 2 }
 0x9d1   :  { %v3419_v44 = vpop.permute.xlu2 %3418 }
 0x9d2   :  { %v3423_v57 = vsel %vm2494_vm4, %v3419_v44, 0.0 }
 0x9d3   :  { %v3424_v35 = vadd.f32 %v3423_v57, %v3422_v61  ;;  %v3304_v61 = vrot.slane %v3303_v31, 2 }
 0x9d5   :  { %3425 = vadd.xlane.f32.xlu1 %v3424_v35  ;;  %v3305_v60 = vadd.f32 %v3304_v61, %v3303_v31 }
 0x9d7   :  { %v3306_v29 = vrot.slane %v3305_v60, 1 }
 0x9d8   :  { %2829 = vrot.lane.b32.xlu0 %v5209_v17, %s3948_s10 }
 0x9d9   :  { %v5263_v3 = vpop.permute.xlu2 %2690  ;;  %v3307_v6 = vadd.f32 %v3306_v29, %v3305_v60 }
 0x9da   :  { %v2696_v62 = vmul.f32 %v5263_v3, %v5176_v1 }
 0x9e0   :  { %2831 = vrot.lane.b32.xlu0 %v5233_v32, %s3948_s10 }
 0x9e1   :  { %v5269_v41 = vpop.permute.xlu2 %2700 }
 0x9e2   :  { %v2706_v50 = vadd.f32 %v5269_v41, %v2696_v62  ;;  %v3278_v62 = vadd.f32 %v3277_v56, %v3276_v52 }
 0x9e4   :  { %2710 = vrot.lane.b32.xlu2 %v2706_v50, %s3947_s24 }
 0x9e5   :  { %s3591_s20 = spop %3590 }
 0x9e6   :  { %v2963_v14 = vstv %s3591_s20  ;;  %s3593_s9 = spop %3592 }
 0x9e7   :  { %v5276_v18 = vmul.f32 %v2963_v14, %v2948_v21  ;;  %v5278_v1 = vmul.f32 %v2963_v14, %v2949_v15  ;;  %s5281_s21 = smul.f32 %s3593_s9, %s5120_s26  ;;  %s3595_s5 = spop %3594  ;;  %v3279_v14 = vrot.slane %v3278_v62, 1 }
 0x9e8   :  { %s3071_s22 = smul.f32 %s3595_s5, %s5120_s26  ;;  %2837 = vrot.lane.b32.xlu0 %v5216_v20, %s3948_s10 }
 0x9e9   :  { %s3072_s8 = smul.f32 %s5281_s21, %s5281_s21  ;;  %v3074_v11 = vstv %s5281_s21 }
 0x9ea   :  { %v3075_v47 = vsub.f32 %v5107_v45, %v3074_v11  ;;  %v3076_v10 = vsub.f32 %v5118_v36, %v3074_v11 }
 0x9eb   :  { %s3073_s23 = ssub.f32 %s3071_s22, %s3072_s8 }
 0x9ed   :  { %s3077_s25 = sadd.f32 1e-05, %s3073_s23 }
 0x9ee   :  { %2692 = vrot.lane.b32.xlu1 %v5233_v32, %s3950_s11 }
 0x9ef   :  { %v3078_v22 = vstv %s3077_s25 }
 0x9f0   :  { %3732 = vrsqrt.f32 %v3078_v22  ;;  %2839 = vrot.lane.b32.xlu0 %v5223_v23, %s3948_s10  ;;  %vm3085_vm7 = vweird.f32 %v3078_v22 }
 0x9f6   :  { %v3733_v51 = vpop.eup %3732 }
 0x9f7   :  { %v3080_v13 = vmul.f32 %v3733_v51, %v3078_v22  ;;  %vm3086_vm6 = vweird.f32 %v3733_v51  ;;  %v3280_v22 = vadd.f32 %v3279_v14, %v3278_v62 }
 0x9f8   :  { %2976 = vrot.lane.b32.xlu0 %v5223_v23, %s3947_s24  ;;  %vm3087_vm8 = vmor %vm3085_vm7, %vm3086_vm6 }
 0x9f9   :  { %v3081_v59 = vmul.f32 %v3733_v51, %v3080_v13 }
 0x9fb   :  { %v3082_v54 = vmul.f32 0.5, %v3081_v59  ;;  %v5330_v59 = vpop.permute.xlu2 %2702 }
 0x9fd   :  { %v3083_v38 = vsub.f32 1.5, %v3082_v54 }
 0x9ff   :  { %v3084_v16 = vmul.f32 %v3733_v51, %v3083_v38 }
 0xa01   :  { %v3088_v58 = vsel %vm3087_vm8, %v3733_v51, %v3084_v16 }
 0xa02   :  { %3596 = vpush %v3088_v58  ;;  %v3951_v58 = vmov 32.0  }
 0xa03   :  { %3598 = vpush %v3153_v9  ;;  %v5342_v42 = vpop.permute.xlu2 %2966 }
 0xa04   :  { %3600 = vpush %v3182_v25 }
 0xa0b   :  { %v5344_v16 = vpop.permute.xlu2 %2968 }
 0xa18   :  { %2565 = vadd.xlane.f32.xlu1 %v2564_v49 }
 0xa20   :  { %2568 = vadd.xlane.f32.xlu1 %v2567_v12 }
 0xa33   :  { %s3597_s27 = spop %3596 }
 0xa34   :  { %v3090_v48 = vstv %s3597_s27  ;;  %s3599_s6 = spop %3598 }
 0xa35   :  { %v5307_v8 = vmul.f32 %v3090_v48, %v3075_v47  ;;  %v5309_v40 = vmul.f32 %v3090_v48, %v3076_v10  ;;  %s5312_s1 = smul.f32 %s3599_s6, %s5120_s26  ;;  %s3601_s2 = spop %3600 }
 0xa36   :  { %s3192_s28 = smul.f32 %s3601_s2, %s5120_s26 }
 0xa37   :  { %s3193_s29 = smul.f32 %s5312_s1, %s5312_s1  ;;  %v5319_v53 = vpop.xlane.xlu0 %3398  ;;  %v3195_v9 = vstv %s5312_s1 }
 0xa38   :  { %v3196_v5 = vsub.f32 %v5107_v45, %v3195_v9  ;;  %v3197_v37 = vsub.f32 %v5118_v36, %v3195_v9  ;;  %v3400_v43 = vrot.slane %v5319_v53, 4 }
 0xa39   :  { %s3194_s30 = ssub.f32 %s3192_s28, %s3193_s29  ;;  %s3521_s29 = sshll.u32 %s5510_s16, 4  ;;  %s3522_s29 = int_to_ptr.hbm [resolvable:$true] %s3521_s29 }
 0xa3a   :  { %v3401_v31 = vadd.f32 %v3400_v43, %v5319_v53 }
 0xa3b   :  { %s3198_s0 = sadd.f32 1e-05, %s3194_s30 }
 0xa3c   :  { %v3402_v61 = vrot.slane %v3401_v31, 2 }
 0xa3d   :  { %v3199_v46 = vstv %s3198_s0 }
 0xa3e   :  { %3734 = vrsqrt.f32 %v3199_v46  ;;  %vm3206_vm10 = vweird.f32 %v3199_v46 }
 0xa3f   :  { %3736 = vrcp.f32 %v3951_v58 }
 0xa44   :  { %v3735_v44 = vpop.eup %3734 }
 0xa45   :  { %v3201_v57 = vmul.f32 %v3735_v44, %v3199_v46  ;;  %vm3207_vm9 = vweird.f32 %v3735_v44 }
 0xa46   :  { %vm3208_vm11 = vmor %vm3206_vm10, %vm3207_vm9 }
 0xa47   :  { %v3202_v35 = vmul.f32 %v3735_v44, %v3201_v57 }
 0xa48   :  { %v3426_v0 = vpop.xlane.xlu1 %3425 }
 0xa49   :  { %v3203_v50 = vmul.f32 0.5, %v3202_v35  ;;  %v3427_v7 = vrot.slane %v3426_v0, 4 }
 0xa4a   :  { %v5321_v21 = vpop.permute.xlu0 %2829 }
 0xa4b   :  { %v3204_v15 = vsub.f32 1.5, %v3203_v50  ;;  %v2835_v51 = vmul.f32 %v5321_v21, %v5239_v26  ;;  %v3428_v56 = vadd.f32 %v3427_v7, %v3426_v0  ;;  %v5370_v50 = vld [vmem:[%s5508_s14] sm:$0xff] }
 0xa4d   :  { %v3205_v2 = vmul.f32 %v3735_v44, %v3204_v15  ;;  %v3429_v35 = vrot.slane %v3428_v56, 2  ;;  %v5375_v15 = vld [vmem:[%s5508_s14 + $0x8] sm:$0xff] }
 0xa4f   :  { %v3209_v55 = vsel %vm3208_vm11, %v3735_v44, %v3205_v2  ;;  %v3403_v2 = vadd.f32 %v3402_v61, %v3401_v31  ;;  %v3093_v61 = vmul.f32 %v5307_v8, %v5209_v17 }
 0xa50   :  { %3602 = vpush %v3209_v55 }
 0xa51   :  { %3604 = vpush %v3280_v22 }
 0xa52   :  { %3606 = vpush %v3307_v6  ;;  %v5323_v33 = vpop.permute.xlu0 %2831  ;;  %v3430_v6 = vadd.f32 %v3429_v35, %v3428_v56 }
 0xa53   :  { %v2836_v63 = vmul.f32 %v5323_v33, %v5241_v28  ;;  %v5346_v28 = vpop.permute.xlu2 %2974 }
 0xa5a   :  { %v5327_v24 = vpop.permute.xlu0 %2837 }
 0xa5b   :  { %v2843_v13 = vadd.f32 %v5327_v24, %v2835_v51  ;;  %v2711_v49 = vpop.permute.xlu2 %2710 }
 0xa5c   :  { %v2716_v10 = vsel %vm2494_vm4, %v2711_v49, 0.0 }
 0xa5d   :  { %2847 = vrot.lane.b32.xlu1 %v2843_v13, %s3948_s10 }
 0xa60   :  { %v2693_v34 = vpop.permute.xlu1 %2692 }
 0xa61   :  { %v2697_v54 = vmul.f32 %v2693_v34, %v5178_v19  ;;  %v3737_v19 = vpop.eup %3736 }
 0xa62   :  { %v5336_v38 = vpop.permute.xlu0 %2839  ;;  %v2571_v25 = vmul.f32 32.0, %v3737_v19  ;;  %vm2575_vm12 = vweird.f32 %v3737_v19 }
 0xa63   :  { %v2707_v27 = vadd.f32 %v5330_v59, %v2697_v54  ;;  %v2844_v26 = vadd.f32 %v5336_v38, %v2836_v63  ;;  %v3431_v54 = vrot.slane %v3430_v6, 1 }
 0xa64   :  { %v2572_v11 = vsub.f32 1.0, %v2571_v25 }
 0xa65   :  { %2849 = vrot.lane.b32.xlu2 %v2844_v26, %s3948_s10  ;;  %2712 = vrot.lane.b32.xlu0 %v2707_v27, %s3947_s24  ;;  %v3432_v25 = vadd.f32 %v3431_v54, %v3430_v6 }
 0xa66   :  { %v2573_v48 = vmul.f32 %v3737_v19, %v2572_v11 }
 0xa68   :  { %v2574_v46 = vadd.f32 %v3737_v19, %v2573_v48 }
 0xa6a   :  { %v5364_v44 = vsel %vm2575_vm12, %v3737_v19, %v2574_v46 }
 0xa81   :  { %s3603_s13 = spop %3602 }
 0xa82   :  { %v3211_v4 = vstv %s3603_s13  ;;  %s3605_s17 = spop %3604 }
 0xa83   :  { %v5351_v30 = vmul.f32 %v3211_v4, %v3196_v5  ;;  %v3213_v12 = vmul.f32 %v3211_v4, %v3197_v37  ;;  %s5354_s4 = smul.f32 %s3605_s17, %s5120_s26  ;;  %s3607_s18 = spop %3606  ;;  %v5383_v4 = vld [vmem:[%s5509_s15] sm:$0x1] }
 0xa84   :  { %s3317_s12 = smul.f32 %s3607_s18, %s5120_s26 }
 0xa85   :  { %v5357_v47 = vmul.f32 %v3213_v12, %v2693_v34  ;;  %s3318_s19 = smul.f32 %s5354_s4, %s5354_s4  ;;  %v3404_v34 = vrot.slane %v3403_v2, 1  ;;  %v3320_v17 = vstv %s5354_s4 }
 0xa86   :  { %v3322_v6 = vsub.f32 %v5118_v36, %v3320_v17 }
 0xa87   :  { %s3319_s7 = ssub.f32 %s3317_s12, %s3318_s19  ;;  %2717 = vadd.xlane.f32.xlu1 %v2716_v10  ;;  %v3405_v19 = vadd.f32 %v3404_v34, %v3403_v2 }
 0xa89   :  { %s3323_s3 = sadd.f32 1e-05, %s3319_s7 }
 0xa8b   :  { %v3324_v39 = vstv %s3323_s3  ;;  %v2566_v52 = vpop.xlane.xlu1 %2565 }
 0xa8c   :  { %3738 = vrsqrt.f32 %v3324_v39  ;;  %v2577_v62 = vmul.f32 %v5364_v44, %v2566_v52  ;;  %vm3331_vm14 = vweird.f32 %v3324_v39 }
 0xa8e   :  { %v2579_v55 = vmul.f32 %v2577_v62, %v5370_v50 }
 0xa92   :  { %v3739_v57 = vpop.eup %3738 }
 0xa93   :  { %v3326_v60 = vmul.f32 %v3739_v57, %v3324_v39  ;;  %v2569_v53 = vpop.xlane.xlu1 %2568  ;;  %vm3332_vm13 = vweird.f32 %v3739_v57 }
 0xa94   :  { %v2578_v14 = vmul.f32 %v5364_v44, %v2569_v53  ;;  %vm3333_vm15 = vmor %vm3331_vm14, %vm3332_vm13 }
 0xa95   :  { %v3327_v29 = vmul.f32 %v3739_v57, %v3326_v60 }
 0xa96   :  { %v2580_v22 = vmul.f32 %v2578_v14, %v5375_v15  ;;  %v3095_v14 = vadd.f32 %v3093_v61, %v5216_v20 }
 0xa97   :  { %v3328_v0 = vmul.f32 0.5, %v3327_v29  ;;  %v3094_v29 = vmul.f32 %v5309_v40, %v5233_v32 }
 0xa98   :  { %v2581_v51 = vadd.f32 %v2580_v22, %v2579_v55  ;;  %v3097_v2 = vsel %vm2494_vm4, %v3095_v14, 0.0  ;;  %v5395_v55 = vpop.permute.xlu0 %2976  ;;  %v3321_v22 = vsub.f32 %v5107_v45, %v3320_v17 }
 0xa99   :  { %v3329_v13 = vsub.f32 1.5, %v3328_v0  ;;  %v3096_v8 = vadd.f32 %v3094_v29, %v5223_v23 }
 0xa9a   :  { %v2582_v63 = vrot.slane %v2581_v51, 4 }
 0xa9b   :  { %v3330_v27 = vmul.f32 %v3739_v57, %v3329_v13  ;;  %v3100_v40 = vsel %vm2494_vm4, %v3096_v8, 0.0 }
 0xa9c   :  { %v2583_v26 = vadd.f32 %v2582_v63, %v2581_v51 }
 0xa9d   :  { %v3334_v58 = vsel %vm3333_vm15, %v3739_v57, %v3330_v27 }
 0xa9e   :  { %v2584_v9 = vrot.slane %v2583_v26, 2  ;;  %3608 = vpush %v3334_v58  ;;  %v3214_v58 = vmul.f32 %v5351_v30, %v5263_v3  ;;  %v2973_v3 = vmul.f32 %v5344_v16, %v5278_v1 }
 0xa9f   :  { %3610 = vpush %v3405_v19 }
 0xaa0   :  { %v2585_v5 = vadd.f32 %v2584_v9, %v2583_v26  ;;  %3612 = vpush %v3432_v25  ;;  %v3216_v25 = vadd.f32 %v3214_v58, %v5269_v41  ;;  %v2981_v30 = vadd.f32 %v5395_v55, %v2973_v3 }
 0xaa2   :  { %v2586_v37 = vrot.slane %v2585_v5, 1 }
 0xaa4   :  { %v2587_v49 = vadd.f32 %v2586_v37, %v2585_v5 }
 0xaa6   :  { %v2588_v12 = vadd.f32 %v2587_v49, %v5383_v4  ;;  %v2972_v49 = vmul.f32 %v5342_v42, %v5276_v18 }
 0xaa8   :  { %v3558_v11 = vmul.f32 -1.442695, %v2588_v12  ;;  %v2980_v12 = vadd.f32 %v5346_v28, %v2972_v49 }
 0xaaa   :  { %3740 = vpow2.f32 %v3558_v11 }
 0xab0   :  { %v3741_v10 = vpop.eup %3740 }
 0xab1   :  { %v2592_v48 = vadd.f32 1.0, %v3741_v10 }
 0xab3   :  { %3742 = vrcp.f32 %v2592_v48  ;;  %v2604_v46 = vand.u32 2147483648, %v2592_v48  ;;  %v2602_v31 = vand.u32 2147483647, %v2592_v48  ;;  %vm2598_vm1 = vweird.f32 %v2592_v48 }
 0xab5   :  { %v2605_v62 = vor.u32 1.1754944e-38, %v2604_v46  ;;  %vm2603_vm3 = vcmp.eq.f32.partialorder %v2602_v31, 8.507059e+37 }
 0xab9   :  { %v3743_v43 = vpop.eup %3742 }
 0xaba   :  { %v2594_v7 = vmul.f32 %v3743_v43, %v2592_v48  ;;  %vm2599_vm0 = vweird.f32 %v3743_v43 }
 0xabb   :  { %vm2600_vm2 = vmor %vm2598_vm1, %vm2599_vm0 }
 0xabc   :  { %v2595_v39 = vsub.f32 1.0, %v2594_v7 }
 0xabe   :  { %v2596_v52 = vmul.f32 %v3743_v43, %v2595_v39 }
 0xabf   :  { %v2850_v56 = vpop.permute.xlu2 %2849 }
 0xac0   :  { %v2597_v57 = vadd.f32 %v3743_v43, %v2596_v52  ;;  %v2856_v35 = vsel %vm2494_vm4, %v2850_v56, 0.0 }
 0xac1   :  { %2857 = vadd.xlane.f32.xlu1 %v2856_v35 }
 0xac2   :  { %v2601_v60 = vsel %vm2600_vm2, %v3743_v43, %v2597_v57 }
 0xac3   :  { %v2606_v53 = vsel %vm2603_vm3, %v2605_v62, %v2601_v60 }
 0xac4   :  { %2608 = vst [vmem:[#allocation8] sm:$0x1] %v2606_v53 }
 0xac9   :  { %3098 = vadd.xlane.f32.xlu1 %v3097_v2 }
 0xacf   :  { %s3609_s15 = spop %3608  ;;  %v2848_v0 = vpop.permute.xlu1 %2847 }
 0xad0   :  { %v3336_v20 = vstv %s3609_s15  ;;  %s3611_s8 = spop %3610  ;;  %v2853_v32 = vsel %vm2494_vm4, %v2848_v0, 0.0 }
 0xad1   :  { %v5401_v51 = vmul.f32 %v3336_v20, %v3321_v22  ;;  %v5403_v13 = vmul.f32 %v3336_v20, %v3322_v6  ;;  %s5406_s23 = smul.f32 %s3611_s8, %s5120_s26  ;;  %s3613_s25 = spop %3612  ;;  %2854 = vadd.xlane.f32.xlu0 %v2853_v32  ;;  %3101 = vadd.xlane.f32.xlu1 %v3100_v40 }
 0xad2   :  { %s3442_s27 = smul.f32 %s3613_s25, %s5120_s26 }
 0xad3   :  { %s3443_s6 = smul.f32 %s5406_s23, %s5406_s23 }
 0xad5   :  { %s3444_s1 = ssub.f32 %s3442_s27, %s3443_s6 }
 0xad7   :  { %s3448_s2 = sadd.f32 1e-05, %s3444_s1  ;;  %v2713_v23 = vpop.permute.xlu0 %2712 }
 0xad8   :  { %v2719_v34 = vsel %vm2494_vm4, %v2713_v23, 0.0 }
 0xad9   :  { %v3449_v63 = vstv %s3448_s2  ;;  %2720 = vadd.xlane.f32.xlu2 %v2719_v34 }
 0xada   :  { %3744 = vrsqrt.f32 %v3449_v63  ;;  %vm3456_vm6 = vweird.f32 %v3449_v63 }
 0xae0   :  { %v3745_v54 = vpop.eup %3744 }
 0xae1   :  { %v3451_v27 = vmul.f32 %v3745_v54, %v3449_v63  ;;  %vm3457_vm5 = vweird.f32 %v3745_v54 }
 0xae2   :  { %vm3458_vm7 = vmor %vm3456_vm6, %vm3457_vm5 }
 0xae3   :  { %v3452_v26 = vmul.f32 %v3745_v54, %v3451_v27 }
 0xae5   :  { %v3453_v19 = vmul.f32 0.5, %v3452_v26 }
 0xae7   :  { %v3454_v9 = vsub.f32 1.5, %v3453_v19 }
 0xae9   :  { %v3455_v5 = vmul.f32 %v3745_v54, %v3454_v9 }
 0xaea   :  { %3220 = vrot.lane.b32.xlu1 %v3216_v25, %s3947_s24 }
 0xaeb   :  { %v3459_v37 = vsel %vm3458_vm7, %v3745_v54, %v3455_v5 }
 0xaec   :  { %3614 = vpush %v3459_v37 }
 0xaf1   :  { %2984 = vrot.lane.b32.xlu2 %v2980_v12, %s3950_s11 }
 0xaf9   :  { %2986 = vrot.lane.b32.xlu2 %v2981_v30, %s3950_s11 }
 0xafa   :  { %v2718_v41 = vpop.xlane.xlu1 %2717 }
 0xafb   :  { %v2722_v35 = vmul.f32 %v2718_v41, %v5364_v44 }
 0xafd   :  { %v2724_v17 = vmul.f32 %v2722_v35, %v5370_v50 }
 0xb1d   :  { %s5449_s26 = spop %3614 }
 0xb34   :  { %v2858_v11 = vpop.xlane.xlu1 %2857 }
 0xb35   :  { %v2860_v48 = vmul.f32 %v2858_v11, %v5364_v44 }
 0xb37   :  { %v2862_v52 = vmul.f32 %v2860_v48, %v5375_v15 }
 0xb3c   :  { %v3099_v10 = vpop.xlane.xlu1 %3098 }
 0xb3d   :  { %v3103_v43 = vmul.f32 %v3099_v10, %v5364_v44 }
 0xb3f   :  { %v3105_v1 = vmul.f32 %v3103_v43, %v5370_v50 }
 0xb44   :  { %v2855_v7 = vpop.xlane.xlu0 %2854  ;;  %v3102_v18 = vpop.xlane.xlu1 %3101 }
 0xb45   :  { %v2859_v39 = vmul.f32 %v2855_v7, %v5364_v44  ;;  %v3104_v46 = vmul.f32 %v3102_v18, %v5364_v44 }
 0xb47   :  { %v2861_v31 = vmul.f32 %v2859_v39, %v5370_v50  ;;  %v3106_v56 = vmul.f32 %v3104_v46, %v5375_v15 }
 0xb49   :  { %v2863_v61 = vadd.f32 %v2862_v52, %v2861_v31  ;;  %v3107_v57 = vadd.f32 %v3106_v56, %v3105_v1 }
 0xb4b   :  { %v2864_v62 = vrot.slane %v2863_v61, 4  ;;  %v3108_v60 = vrot.slane %v3107_v57, 4 }
 0xb4c   :  { %v2721_v53 = vpop.xlane.xlu2 %2720 }
 0xb4d   :  { %v2865_v14 = vadd.f32 %v2864_v62, %v2863_v61  ;;  %v3109_v29 = vadd.f32 %v3108_v60, %v3107_v57  ;;  %v2723_v2 = vmul.f32 %v2721_v53, %v5364_v44  ;;  %v3339_v57 = vmul.f32 %v5401_v51, %v5321_v21 }
 0xb4e   :  { %v3217_v62 = vadd.f32 %v5357_v47, %v5330_v59  ;;  %v3340_v53 = vmul.f32 %v5403_v13, %v5323_v33  ;;  %v3461_v33 = vstv %s5449_s26 }
 0xb4f   :  { %v2866_v8 = vrot.slane %v2865_v14, 2  ;;  %v3110_v22 = vrot.slane %v3109_v29, 2  ;;  %v2725_v6 = vmul.f32 %v2723_v2, %v5375_v15  ;;  %v3341_v59 = vadd.f32 %v3339_v57, %v5327_v24 }
 0xb51   :  { %v2867_v0 = vadd.f32 %v2866_v8, %v2865_v14  ;;  %v3111_v20 = vadd.f32 %v3110_v22, %v3109_v29  ;;  %v2726_v32 = vadd.f32 %v2725_v6, %v2724_v17  ;;  %v3445_v14 = vstv %s5406_s23 }
 0xb52   :  { %v3446_v47 = vsub.f32 %v5107_v45, %v3445_v14 }
 0xb53   :  { %v2868_v40 = vrot.slane %v2867_v0, 1  ;;  %v3112_v23 = vrot.slane %v3111_v20, 1  ;;  %v2727_v34 = vrot.slane %v2726_v32, 4 }
 0xb54   :  { %v2985_v63 = vpop.permute.xlu2 %2984 }
 0xb55   :  { %v2869_v54 = vadd.f32 %v2868_v40, %v2867_v0  ;;  %v3113_v27 = vadd.f32 %v3112_v23, %v3111_v20  ;;  %v2728_v26 = vadd.f32 %v2727_v34, %v2726_v32  ;;  %v2990_v58 = vsel %vm2494_vm4, %v2985_v63, 0.0 }
 0xb56   :  { %2991 = vadd.xlane.f32.xlu2 %v2990_v58  ;;  %v3342_v32 = vadd.f32 %v3340_v53, %v5336_v38  ;;  %v3462_v34 = vmul.f32 %v3461_v33, %v3446_v47 }
 0xb57   :  { %v2870_v19 = vadd.f32 %v2869_v54, %v5383_v4  ;;  %v3114_v9 = vadd.f32 %v3113_v27, %v5383_v4  ;;  %v2729_v25 = vrot.slane %v2728_v26, 2 }
 0xb59   :  { %v3560_v5 = vmul.f32 -1.442695, %v2870_v19  ;;  %v3562_v37 = vmul.f32 -1.442695, %v3114_v9  ;;  %v2730_v49 = vadd.f32 %v2729_v25, %v2728_v26  ;;  %v3464_v19 = vmul.f32 %v3462_v34, %v5342_v42 }
 0xb5a   :  { %v3447_v25 = vsub.f32 %v5118_v36, %v3445_v14 }
 0xb5b   :  { %3746 = vpow2.f32 %v3560_v5  ;;  %v2731_v12 = vrot.slane %v2730_v49, 1 }
 0xb5c   :  { %3748 = vpow2.f32 %v3562_v37  ;;  %v3221_v3 = vpop.permute.xlu1 %3220  ;;  %v2987_v30 = vpop.permute.xlu2 %2986 }
 0xb5d   :  { %v2732_v41 = vadd.f32 %v2731_v12, %v2730_v49  ;;  %v3226_v11 = vsel %vm2494_vm4, %v3221_v3, 0.0  ;;  %v2993_v10 = vsel %vm2494_vm4, %v2987_v30, 0.0  ;;  %v3463_v49 = vmul.f32 %v3461_v33, %v3447_v25 }
 0xb5e   :  { %3227 = vadd.xlane.f32.xlu1 %v3226_v11  ;;  %2994 = vadd.xlane.f32.xlu0 %v2993_v10  ;;  %v3466_v3 = vadd.f32 %v3464_v19, %v5346_v28 }
 0xb5f   :  { %v2733_v48 = vadd.f32 %v2732_v41, %v5383_v4  ;;  %v3465_v30 = vmul.f32 %v3463_v49, %v5344_v16 }
 0xb61   :  { %v3747_v43 = vpop.eup %3746  ;;  %v3559_v7 = vmul.f32 -1.442695, %v2733_v48  ;;  %v3467_v41 = vadd.f32 %v3465_v30, %v5395_v55 }
 0xb62   :  { %v3749_v18 = vpop.eup %3748  ;;  %v2874_v39 = vadd.f32 1.0, %v3747_v43 }
 0xb63   :  { %v3118_v46 = vadd.f32 1.0, %v3749_v18  ;;  %3750 = vpow2.f32 %v3559_v7 }
 0xb64   :  { %3752 = vrcp.f32 %v2874_v39  ;;  %v2886_v29 = vand.u32 2147483648, %v2874_v39  ;;  %v2884_v21 = vand.u32 2147483647, %v2874_v39  ;;  %vm2880_vm10 = vweird.f32 %v2874_v39 }
 0xb65   :  { %3754 = vrcp.f32 %v3118_v46  ;;  %v3130_v51 = vand.u32 2147483648, %v3118_v46  ;;  %v3128_v22 = vand.u32 2147483647, %v3118_v46  ;;  %vm3124_vm12 = vweird.f32 %v3118_v46 }
 0xb66   :  { %v2887_v0 = vor.u32 1.1754944e-38, %v2886_v29  ;;  %vm2885_vm13 = vcmp.eq.f32.partialorder %v2884_v21, 8.507059e+37 }
 0xb67   :  { %v3131_v23 = vor.u32 1.1754944e-38, %v3130_v51  ;;  %vm3129_vm15 = vcmp.eq.f32.partialorder %v3128_v22, 8.507059e+37 }
 0xb69   :  { %v3751_v52 = vpop.eup %3750 }
 0xb6a   :  { %v3753_v1 = vpop.eup %3752  ;;  %v2737_v31 = vadd.f32 1.0, %v3751_v52 }
 0xb6b   :  { %v3755_v56 = vpop.eup %3754  ;;  %v2876_v61 = vmul.f32 %v3753_v1, %v2874_v39  ;;  %vm2881_vm8 = vweird.f32 %v3753_v1 }
 0xb6c   :  { %v3120_v35 = vmul.f32 %v3755_v56, %v3118_v46  ;;  %3756 = vrcp.f32 %v2737_v31  ;;  %vm3125_vm9 = vweird.f32 %v3755_v56  ;;  %vm2882_vm11 = vmor %vm2880_vm10, %vm2881_vm8  ;;  %v2749_v26 = vand.u32 2147483648, %v2737_v31 }
 0xb6d   :  { %v2877_v60 = vsub.f32 1.0, %v2876_v61  ;;  %vm3126_vm14 = vmor %vm3124_vm12, %vm3125_vm9  ;;  %v2747_v38 = vand.u32 2147483647, %v2737_v31  ;;  %vm2743_vm1 = vweird.f32 %v2737_v31 }
 0xb6e   :  { %v3121_v2 = vsub.f32 1.0, %v3120_v35  ;;  %3222 = vrot.lane.b32.xlu2 %v3217_v62, %s3947_s24  ;;  %v2750_v5 = vor.u32 1.1754944e-38, %v2749_v26  ;;  %s3952_s24 = smov [#allocation8]  }
 0xb6f   :  { %v2878_v17 = vmul.f32 %v3753_v1, %v2877_v60  ;;  %vm2748_vm3 = vcmp.eq.f32.partialorder %v2747_v38, 8.507059e+37 }
 0xb70   :  { %v3122_v8 = vmul.f32 %v3755_v56, %v3121_v2 }
 0xb71   :  { %v2879_v13 = vadd.f32 %v3753_v1, %v2878_v17 }
 0xb72   :  { %v3757_v6 = vpop.eup %3756  ;;  %v3123_v20 = vadd.f32 %v3755_v56, %v3122_v8  ;;  %3345 = vrot.lane.b32.xlu0 %v3341_v59, %s3948_s10 }
 0xb73   :  { %v2883_v40 = vsel %vm2882_vm11, %v3753_v1, %v2879_v13  ;;  %v2739_v24 = vmul.f32 %v3757_v6, %v2737_v31  ;;  %vm2744_vm0 = vweird.f32 %v3757_v6 }
 0xb74   :  { %v2888_v45 = vsel %vm2885_vm13, %v2887_v0, %v2883_v40  ;;  %v3127_v63 = vsel %vm3126_vm14, %v3755_v56, %v3123_v20  ;;  %vm2745_vm2 = vmor %vm2743_vm1, %vm2744_vm0 }
 0xb75   :  { %2890 = vst [vmem:[#allocation8 + $0x2] sm:$0x1] %v2888_v45  ;;  %v3132_v54 = vsel %vm3129_vm15, %v3131_v23, %v3127_v63  ;;  %v2740_v27 = vsub.f32 1.0, %v2739_v24 }
 0xb76   :  { %3134 = vst [vmem:[#allocation8 + $0x4] sm:$0x1] %v3132_v54  ;;  %3347 = vrot.lane.b32.xlu2 %v3342_v32, %s3948_s10  ;;  %s3519_s10 = sshll.u32 %s3952_s24, 4  ;;  %s3520_s10 = int_to_ptr.vmem [resolvable:$true] %s3519_s10 }
 0xb77   :  { %v2741_v58 = vmul.f32 %v3757_v6, %v2740_v27 }
 0xb79   :  { %v2742_v9 = vadd.f32 %v3757_v6, %v2741_v58 }
 0xb7b   :  { %v2746_v37 = vsel %vm2745_vm2, %v3757_v6, %v2742_v9 }
 0xb7c   :  { %v2751_v12 = vsel %vm2748_vm3, %v2750_v5, %v2746_v37 }
 0xb7d   :  { %2753 = vst [vmem:[#allocation8 + $0x1] sm:$0x1] %v2751_v12 }
 0xb7e   :  { %3470 = vrot.lane.b32.xlu2 %v3466_v3, %s3950_s11 }
 0xb86   :  { %3472 = vrot.lane.b32.xlu2 %v3467_v41, %s3950_s11 }
 0xbc9   :  { %v2992_v42 = vpop.xlane.xlu2 %2991 }
 0xbca   :  { %v2996_v36 = vmul.f32 %v2992_v42, %v5364_v44 }
 0xbcc   :  { %v2998_v28 = vmul.f32 %v2996_v36, %v5370_v50 }
 0xbd1   :  { %v2995_v11 = vpop.xlane.xlu0 %2994  ;;  %v3223_v48 = vpop.permute.xlu2 %3222 }
 0xbd2   :  { %v2997_v10 = vmul.f32 %v2995_v11, %v5364_v44  ;;  %v3229_v43 = vsel %vm2494_vm4, %v3223_v48, 0.0  ;;  %v3228_v20 = vpop.xlane.xlu1 %3227 }
 0xbd3   :  { %3230 = vadd.xlane.f32.xlu0 %v3229_v43  ;;  %v3232_v32 = vmul.f32 %v3228_v20, %v5364_v44 }
 0xbd4   :  { %v2999_v7 = vmul.f32 %v2997_v10, %v5375_v15 }
 0xbd5   :  { %v3234_v24 = vmul.f32 %v3232_v32, %v5370_v50 }
 0xbd6   :  { %v3000_v18 = vadd.f32 %v2999_v7, %v2998_v28 }
 0xbd8   :  { %v3001_v16 = vrot.slane %v3000_v18, 4 }
 0xbd9   :  { %v3348_v55 = vpop.permute.xlu2 %3347 }
 0xbda   :  { %v3002_v39 = vadd.f32 %v3001_v16, %v3000_v18  ;;  %v3354_v46 = vsel %vm2494_vm4, %v3348_v55, 0.0 }
 0xbdb   :  { %3355 = vadd.xlane.f32.xlu1 %v3354_v46 }
 0xbdc   :  { %v3003_v52 = vrot.slane %v3002_v39, 2 }
 0xbde   :  { %v3004_v1 = vadd.f32 %v3003_v52, %v3002_v39 }
 0xbe0   :  { %v3005_v31 = vrot.slane %v3004_v1, 1 }
 0xbe1   :  { %v3471_v61 = vpop.permute.xlu2 %3470 }
 0xbe2   :  { %v3006_v56 = vadd.f32 %v3005_v31, %v3004_v1  ;;  %v3476_v57 = vsel %vm2494_vm4, %v3471_v61, 0.0 }
 0xbe3   :  { %3477 = vadd.xlane.f32.xlu2 %v3476_v57 }
 0xbe4   :  { %v3007_v35 = vadd.f32 %v3006_v56, %v5383_v4  ;;  %v3346_v62 = vpop.permute.xlu0 %3345 }
 0xbe5   :  { %v3351_v60 = vsel %vm2494_vm4, %v3346_v62, 0.0 }
 0xbe6   :  { %v3561_v53 = vmul.f32 -1.442695, %v3007_v35  ;;  %3352 = vadd.xlane.f32.xlu0 %v3351_v60 }
 0xbe8   :  { %3758 = vpow2.f32 %v3561_v53 }
 0xbe9   :  { %v3473_v14 = vpop.permute.xlu2 %3472 }
 0xbea   :  { %v3479_v29 = vsel %vm2494_vm4, %v3473_v14, 0.0 }
 0xbeb   :  { %3480 = vadd.xlane.f32.xlu1 %v3479_v29 }
 0xbee   :  { %v3759_v2 = vpop.eup %3758 }
 0xbef   :  { %v3011_v17 = vadd.f32 1.0, %v3759_v2 }
 0xbf1   :  { %3760 = vrcp.f32 %v3011_v17  ;;  %v3023_v22 = vand.u32 2147483648, %v3011_v17  ;;  %v3021_v47 = vand.u32 2147483647, %v3011_v17  ;;  %vm3017_vm6 = vweird.f32 %v3011_v17 }
 0xbf3   :  { %v3024_v13 = vor.u32 1.1754944e-38, %v3023_v22  ;;  %vm3022_vm8 = vcmp.eq.f32.partialorder %v3021_v47, 8.507059e+37 }
 0xbf7   :  { %v3761_v21 = vpop.eup %3760 }
 0xbf8   :  { %v3013_v51 = vmul.f32 %v3761_v21, %v3011_v17  ;;  %vm3018_vm5 = vweird.f32 %v3761_v21 }
 0xbf9   :  { %vm3019_vm7 = vmor %vm3017_vm6, %vm3018_vm5 }
 0xbfa   :  { %v3014_v8 = vsub.f32 1.0, %v3013_v51 }
 0xbfc   :  { %v3015_v59 = vmul.f32 %v3761_v21, %v3014_v8 }
 0xbfe   :  { %v3016_v33 = vadd.f32 %v3761_v21, %v3015_v59 }
 0xc00   :  { %v3020_v6 = vsel %vm3019_vm7, %v3761_v21, %v3016_v33 }
 0xc01   :  { %v3025_v0 = vsel %vm3022_vm8, %v3024_v13, %v3020_v6 }
 0xc02   :  { %3027 = vst [vmem:[#allocation8 + $0x3] sm:$0x1] %v3025_v0 }
 0xc46   :  { %v3231_v40 = vpop.xlane.xlu0 %3230 }
 0xc47   :  { %v3233_v23 = vmul.f32 %v3231_v40, %v5364_v44 }
 0xc49   :  { %v3235_v34 = vmul.f32 %v3233_v23, %v5375_v15 }
 0xc4b   :  { %v3236_v45 = vadd.f32 %v3235_v34, %v3234_v24 }
 0xc4d   :  { %v3237_v63 = vrot.slane %v3236_v45, 4 }
 0xc4e   :  { %v3356_v58 = vpop.xlane.xlu1 %3355 }
 0xc4f   :  { %v3238_v54 = vadd.f32 %v3237_v63, %v3236_v45  ;;  %v3358_v9 = vmul.f32 %v3356_v58, %v5364_v44 }
 0xc51   :  { %v3239_v27 = vrot.slane %v3238_v54, 2  ;;  %v3360_v3 = vmul.f32 %v3358_v9, %v5375_v15 }
 0xc53   :  { %v3240_v26 = vadd.f32 %v3239_v27, %v3238_v54 }
 0xc55   :  { %v3241_v38 = vrot.slane %v3240_v26, 1 }
 0xc56   :  { %v3478_v49 = vpop.xlane.xlu2 %3477 }
 0xc57   :  { %v3242_v19 = vadd.f32 %v3241_v38, %v3240_v26  ;;  %v3482_v41 = vmul.f32 %v3478_v49, %v5364_v44 }
 0xc59   :  { %v3353_v25 = vpop.xlane.xlu0 %3352  ;;  %v3243_v5 = vadd.f32 %v3242_v19, %v5383_v4  ;;  %v3484_v48 = vmul.f32 %v3482_v41, %v5370_v50 }
 0xc5a   :  { %v3357_v37 = vmul.f32 %v3353_v25, %v5364_v44 }
 0xc5b   :  { %v3563_v12 = vmul.f32 -1.442695, %v3243_v5 }
 0xc5c   :  { %v3359_v30 = vmul.f32 %v3357_v37, %v5370_v50 }
 0xc5d   :  { %3762 = vpow2.f32 %v3563_v12 }
 0xc5e   :  { %v3361_v42 = vadd.f32 %v3360_v3, %v3359_v30  ;;  %v3481_v36 = vpop.xlane.xlu1 %3480 }
 0xc5f   :  { %v3483_v10 = vmul.f32 %v3481_v36, %v5364_v44 }
 0xc60   :  { %v3362_v11 = vrot.slane %v3361_v42, 4 }
 0xc61   :  { %v3485_v28 = vmul.f32 %v3483_v10, %v5375_v15 }
 0xc62   :  { %v3363_v43 = vadd.f32 %v3362_v11, %v3361_v42 }
 0xc63   :  { %v3763_v7 = vpop.eup %3762  ;;  %v3486_v16 = vadd.f32 %v3485_v28, %v3484_v48 }
 0xc64   :  { %v3364_v18 = vrot.slane %v3363_v43, 2  ;;  %v3247_v39 = vadd.f32 1.0, %v3763_v7 }
 0xc65   :  { %v3487_v46 = vrot.slane %v3486_v16, 4 }
 0xc66   :  { %v3365_v55 = vadd.f32 %v3364_v18, %v3363_v43  ;;  %3764 = vrcp.f32 %v3247_v39  ;;  %v3259_v53 = vand.u32 2147483648, %v3247_v39  ;;  %v3257_v29 = vand.u32 2147483647, %v3247_v39 }
 0xc67   :  { %v3488_v1 = vadd.f32 %v3487_v46, %v3486_v16  ;;  %vm3253_vm9 = vweird.f32 %v3247_v39 }
 0xc68   :  { %v3366_v52 = vrot.slane %v3365_v55, 1  ;;  %v3260_v51 = vor.u32 1.1754944e-38, %v3259_v53  ;;  %vm3258_vm11 = vcmp.eq.f32.partialorder %v3257_v29, 8.507059e+37 }
 0xc69   :  { %v3489_v56 = vrot.slane %v3488_v1, 2 }
 0xc6a   :  { %v3367_v31 = vadd.f32 %v3366_v52, %v3365_v55 }
 0xc6b   :  { %v3490_v57 = vadd.f32 %v3489_v56, %v3488_v1 }
 0xc6c   :  { %v3368_v61 = vadd.f32 %v3367_v31, %v5383_v4  ;;  %v3765_v44 = vpop.eup %3764 }
 0xc6d   :  { %v3249_v35 = vmul.f32 %v3765_v44, %v3247_v39  ;;  %v3491_v62 = vrot.slane %v3490_v57, 1  ;;  %vm3254_vm4 = vweird.f32 %v3765_v44 }
 0xc6e   :  { %v3564_v50 = vmul.f32 -1.442695, %v3368_v61  ;;  %vm3255_vm10 = vmor %vm3253_vm9, %vm3254_vm4 }
 0xc6f   :  { %v3250_v60 = vsub.f32 1.0, %v3249_v35  ;;  %v3492_v15 = vadd.f32 %v3491_v62, %v3490_v57 }
 0xc70   :  { %3766 = vpow2.f32 %v3564_v50 }
 0xc71   :  { %v3251_v14 = vmul.f32 %v3765_v44, %v3250_v60  ;;  %v3493_v2 = vadd.f32 %v3492_v15, %v5383_v4 }
 0xc73   :  { %v3252_v17 = vadd.f32 %v3765_v44, %v3251_v14  ;;  %v3565_v21 = vmul.f32 -1.442695, %v3493_v2 }
 0xc75   :  { %v3256_v22 = vsel %vm3255_vm10, %v3765_v44, %v3252_v17  ;;  %3768 = vpow2.f32 %v3565_v21 }
 0xc76   :  { %v3767_v8 = vpop.eup %3766  ;;  %v3261_v59 = vsel %vm3258_vm11, %v3260_v51, %v3256_v22 }
 0xc77   :  { %v3372_v47 = vadd.f32 1.0, %v3767_v8  ;;  %3263 = vst [vmem:[#allocation8 + $0x5] sm:$0x1] %v3261_v59 }
 0xc79   :  { %3770 = vrcp.f32 %v3372_v47  ;;  %v3384_v4 = vand.u32 2147483648, %v3372_v47  ;;  %v3382_v40 = vand.u32 2147483647, %v3372_v47  ;;  %vm3378_vm13 = vweird.f32 %v3372_v47 }
 0xc7b   :  { %v3769_v33 = vpop.eup %3768  ;;  %v3385_v45 = vor.u32 1.1754944e-38, %v3384_v4  ;;  %vm3383_vm15 = vcmp.eq.f32.partialorder %v3382_v40, 8.507059e+37 }
 0xc7c   :  { %v3497_v13 = vadd.f32 1.0, %v3769_v33 }
 0xc7e   :  { %3772 = vrcp.f32 %v3497_v13  ;;  %v3509_v26 = vand.u32 2147483648, %v3497_v13  ;;  %v3507_v38 = vand.u32 2147483647, %v3497_v13  ;;  %vm3503_vm1 = vweird.f32 %v3497_v13 }
 0xc7f   :  { %v3771_v6 = vpop.eup %3770 }
 0xc80   :  { %v3374_v0 = vmul.f32 %v3771_v6, %v3372_v47  ;;  %vm3379_vm12 = vweird.f32 %v3771_v6  ;;  %v3510_v9 = vor.u32 1.1754944e-38, %v3509_v26  ;;  %vm3508_vm3 = vcmp.eq.f32.partialorder %v3507_v38, 8.507059e+37 }
 0xc81   :  { %vm3380_vm14 = vmor %vm3378_vm13, %vm3379_vm12 }
 0xc82   :  { %v3375_v20 = vsub.f32 1.0, %v3374_v0 }
 0xc84   :  { %v3376_v32 = vmul.f32 %v3771_v6, %v3375_v20  ;;  %v3773_v23 = vpop.eup %3772 }
 0xc85   :  { %v3499_v34 = vmul.f32 %v3773_v23, %v3497_v13  ;;  %vm3504_vm0 = vweird.f32 %v3773_v23 }
 0xc86   :  { %v3377_v24 = vadd.f32 %v3771_v6, %v3376_v32  ;;  %vm3505_vm2 = vmor %vm3503_vm1, %vm3504_vm0 }
 0xc87   :  { %v3500_v54 = vsub.f32 1.0, %v3499_v34 }
 0xc88   :  { %v3381_v63 = vsel %vm3380_vm14, %v3771_v6, %v3377_v24 }
 0xc89   :  { %v3386_v27 = vsel %vm3383_vm15, %v3385_v45, %v3381_v63  ;;  %v3501_v58 = vmul.f32 %v3773_v23, %v3500_v54 }
 0xc8a   :  { %3388 = vst [vmem:[#allocation8 + $0x6] sm:$0x1] %v3386_v27 }
 0xc8b   :  { %v3502_v19 = vadd.f32 %v3773_v23, %v3501_v58 }
 0xc8d   :  { %v3506_v25 = vsel %vm3505_vm2, %v3773_v23, %v3502_v19 }
 0xc8e   :  { %v3511_v5 = vsel %vm3508_vm3, %v3510_v9, %v3506_v25 }
 0xc8f   :  { %3513 = vst [vmem:[#allocation8 + $0x7] sm:$0x1] %v3511_v5 }
 0xc90   :  { %3524 = dma.vmem_to_hbm [thread:$0]  %s3520_s10, 128, %s3522_s29, [#allocation4]  }
 0xc91   :  { %3938 = dma.done.wait [#allocation4], 128  }
 0xc92   :  { %3939 = vsyncadd [#allocation4], 4294967168 }
 0xc93   :  { %3529 = vsyncpa [#allocation3], 1 }
 0xc94   :  { %3530 = vsyncpa [#allocation6], 1 }
 0xc95   :  { %3531 = vsyncpa [#allocation4], 1 }

</bundles_post_ra>
